<compile_context>
chip_gen: v7x
topology: tpu7x:2x2x1
jax: 0.10.0
libtpu: 0.0.40
codegen_flags: <defaults>
</compile_context>

<pallas_src>
import functools

import jax
import jax.numpy as jnp
from jax import lax
from jax.experimental import pallas as pl
from jax.experimental.pallas import tpu as pltpu


# --------------------------------------------------------------------------- #
# Kernel
# --------------------------------------------------------------------------- #
def attention_head_kernel(feat_ref, w_ref, bw_ref, v_ref, out_ref, *,
                          matmul_dtype):
    feat = feat_ref[...]                       # (Bt, S, D)  streamed dtype
    w    = w_ref[...]                          # (D, H)      transposed torch W
    bw   = bw_ref[...]                         # (1, H)
    v    = v_ref[...]                          # (1, H)      V weight as a row

    Bt, S, D = feat.shape
    H = w.shape[1]

    mm_dtype = (jnp.dtype(matmul_dtype) if matmul_dtype is not None
                else jnp.dtype(feat.dtype))
    # HIGHEST keeps the f32 path within the 1e-5 test tolerance; bf16 operands
    # take the single-pass bf16 MXU path regardless.
    mm_prec = lax.Precision.HIGHEST if mm_dtype == jnp.float32 else None

    # ---- projection: one large (Bt*S, D) @ (D, H) MXU matmul ----------------
    # block_b*S is kept a multiple of the sublane tile, so this flatten is a
    # free relayout and it fills the MXU's M dimension.
    lhs = feat.reshape(Bt * S, D).astype(mm_dtype)
    rhs = w.astype(mm_dtype)
    att = jnp.tanh(                                                    # EUP
        jnp.dot(lhs, rhs, preferred_element_type=jnp.float32, precision=mm_prec)
        + bw.astype(jnp.float32))                                      # (Bt*S, H) f32
    # NOTE(v5e): tanh/exp share one EUP with no bf16 path; for small D this
    # phase is EUP-bound — large tiles keep the EUP work hidden under the DMA.

    # ---- score: VPU multiply + lane reduce (skip the N=1 MXU matmul) --------
    # bV is dropped: softmax over the sequence axis is invariant to a constant
    # shift, so the forward output is unchanged.
    score = jnp.sum(att.reshape(Bt, S, H) * v.astype(jnp.float32)[None, :, :],
                    axis=-1)                                           # (Bt, S) lane-dense

    # ---- softmax statistics over the sequence axis (torch dim=1) ------------
    m = jnp.max(score, axis=-1, keepdims=True)                         # (Bt, 1)
    e = jnp.exp(score - m)                                             # (Bt, S)
    l = jnp.sum(e, axis=-1, keepdims=True)                             # (Bt, 1)

    # ---- context: contract S on the otherwise-idle MXU ----------------------
    # Batched (1,S)@(S,D) dot_general — avoids a (Bt,S,D) f32 broadcast
    # temporary and the attn lane->sublane relayout of the VPU version.
    ctx_prec = lax.Precision.HIGHEST if feat.dtype == jnp.float32 else None
    ctx = jnp.einsum("bqs,bsd->bqd", e[:, None, :].astype(feat.dtype), feat,
                     preferred_element_type=jnp.float32,
                     precision=ctx_prec)[:, 0, :]                      # (Bt, D) f32

    # Fold the softmax normalization in after the S-reduction.  Exact divide to
    # hold the 1e-5 tolerance; pl.reciprocal(l, approx=True) is the cheap
    # EUP-slot alternative when that accuracy is not required.
    ctx = ctx * (1.0 / l)

    # TODO(synk): nn.Dropout(0.3) is identity in eval mode; training-mode
    # dropout would use pltpu.prng_seed + pltpu.prng_random_bits here.
    out_ref[...] = ctx.astype(out_ref.dtype)


# --------------------------------------------------------------------------- #
# Tile sizing / VMEM model
# --------------------------------------------------------------------------- #
def _vmem_tile_model(S, D, H, feat_isz, mm_isz, single_buffer_weights):
    """Returns (fixed_bytes, per_batch_row_bytes) VMEM model for one grid step."""
    wbuf = 1 if single_buffer_weights else 2
    fixed = wbuf * (D * H + 2 * H) * 4                 # W, bW, V (f32 upper bound)
    cast = S * D * mm_isz if mm_isz != feat_isz else 0  # bf16 copy of matmul lhs
    per_b = (
        2 * S * D * feat_isz   # double-buffered feature tile
        + cast
        + 2 * S * H * 4        # att (f32) + att*v broadcast temporary
        + 8 * S                # score / exp / softmax vectors
        + 4 * D * 4            # ctx accumulator + double-buffered out tile
    )
    return fixed, per_b


def _vmem_budget_bytes():
    """(physical_capacity, working-set budget) for the current TPU generation."""
    try:
        cap = int(pltpu.get_tpu_info().vmem_capacity_bytes)
    except Exception:          # query unavailable -> assume the smallest (v7x)
        cap = 64 * 1024 * 1024
    # Target ~half the physical VMEM for this kernel's working set:
    # ~64 MiB on v5e/v6e (128 MiB physical), ~32 MiB on v7x (64 MiB per core).
    return cap, min(cap // 2, 64 * 1024 * 1024)


# --------------------------------------------------------------------------- #
# Wrapper
# --------------------------------------------------------------------------- #
def attention_head(features, W, bW, V, bV=None, *, block_b=None,
                   matmul_dtype=None):
    """AttentionHead.forward.

    features: (B, S, D);  W: (D, H);  bW: (H,);  V: (H, 1);  bV: (1,) (unused —
    softmax over the sequence axis is invariant to the scalar V-bias).

    Pass bf16 `features` (and optionally matmul_dtype=jnp.bfloat16) to halve
    the streamed HBM bytes — this kernel is HBM-bound for small/medium H.
    """
    del bV
    B, S, D = features.shape
    H = W.shape[1]

    feat_isz = jnp.dtype(features.dtype).itemsize
    mm_isz = (jnp.dtype(matmul_dtype).itemsize
              if matmul_dtype is not None else feat_isz)

    cap, budget = _vmem_budget_bytes()
    fixed_1, per_b = _vmem_tile_model(S, D, H, feat_isz, mm_isz, True)

    if block_b is None:
        headroom = 1 << 20                       # compiler-internal scratch slack
        avail = max(per_b, budget - fixed_1 - headroom)
        block_b = min(B, avail // per_b)
        # Keep >=2 grid steps so the "parallel" axis can shard across v7x's two
        # TensorCores (>=4 when the batch allows, so each core still pipelines).
        if B >= 32:
            block_b = min(block_b, max(8, pl.cdiv(B, 4)))
        elif B >= 2:
            block_b = min(block_b, pl.cdiv(B, 2))
        # Sublane-align the output tile (unmasked vst) and keep the
        # (Bt,S,D)->(Bt*S,D) flatten a free relayout.
        if block_b >= 8:
            block_b = (block_b // 8) * 8
    block_b = int(max(1, min(int(block_b), B)))
    grid = (int(pl.cdiv(B, block_b)),)
    # NOTE: if B % block_b != 0 the padded rows of the last step see garbage
    # (they are masked on write and batch rows are independent, so valid
    # outputs are unaffected).

    # Explicit VMEM limit from the *real* footprint, sized against the 2-buffer
    # fallback as an upper bound.
    fixed_2, _ = _vmem_tile_model(S, D, H, feat_isz, mm_isz, False)
    est = fixed_2 + block_b * per_b + (1 << 20)
    vmem_limit = int(min(cap, max(32 * 1024 * 1024, int(est * 1.25))))

    cparams = pltpu.CompilerParams(
        dimension_semantics=("parallel",),       # megacore sharding on v7x
        vmem_limit_bytes=vmem_limit,
    )
    cost = pl.CostEstimate(
        flops=int(2 * B * S * D * H + 2 * B * S * H + 2 * B * S * D + B * D),
        transcendentals=int(B * S * (H + 1) + B),
        bytes_accessed=int(B * S * D * feat_isz + (D * H + 2 * H) * 4
                           + B * D * feat_isz),
    )

    kernel = functools.partial(attention_head_kernel, matmul_dtype=matmul_dtype)
    out_shape = jax.ShapeDtypeStruct((B, D), features.dtype)
    args = (features, W, bW.reshape(1, H), V.reshape(1, H))

    def _call(single_buffer_weights):
        def _wspec(shape):
            # Grid-invariant operands: single-buffered when supported
            # (double-buffering a constant index_map is pure VMEM waste).
            if single_buffer_weights:
                return pl.BlockSpec(shape, lambda b: (0,) * len(shape),
                                    pipeline_mode=pl.Buffered(1))
            return pl.BlockSpec(shape, lambda b: (0,) * len(shape))

        in_specs = [
            pl.BlockSpec((block_b, S, D), lambda b: (b, 0, 0)),   # features tile
            _wspec((D, H)),                                       # W (resident)
            _wspec((1, H)),                                       # bW row
            _wspec((1, H)),                                       # V row
        ]
        out_specs = pl.BlockSpec((block_b, D), lambda b: (b, 0))
        return pl.pallas_call(
            kernel,
            out_shape=out_shape,
            grid=grid,
            in_specs=in_specs,
            out_specs=out_specs,
            compiler_params=cparams,
            cost_estimate=cost,
        )(*args)

    try:
        return _call(True)
    except Exception:
        # Fallback for JAX versions without BlockSpec pipeline_mode/Buffered(1).
        return _call(False)


# --------------------------------------------------------------------------- #
# Pure-JAX reference
# --------------------------------------------------------------------------- #
def attention_head_ref(features, W, bW, V, bV):
    # "highest" matmul precision so the XLA reference matches the kernel's
    # f32 MXU path at 1e-5.
    with jax.default_matmul_precision("highest"):
        att = jnp.tanh(features @ W + bW)
        score = att @ V + bV
        attn = jax.nn.softmax(score, axis=1)
        return jnp.sum(attn * features, axis=1)


if __name__ == "__main__":
    # Small, lane/sublane-friendly shapes: batch=16, seq=16, in=128, hidden=64.
    B, S, IN, HID = 16, 16, 128, 64

    key = jax.random.PRNGKey(0)
    kx, kw, kbw, kv, kbv = jax.random.split(key, 5)

    # Deterministic PyTorch-style Linear init (uniform +/- 1/sqrt(fan_in)).
    lim_w = 1.0 / jnp.sqrt(jnp.float32(IN))
    lim_v = 1.0 / jnp.sqrt(jnp.float32(HID))
    features = jax.random.normal(kx, (B, S, IN), dtype=jnp.float32)
    W  = jax.random.uniform(kw,  (IN, HID), jnp.float32, -lim_w, lim_w)  # W^T of torch weight
    bW = jax.random.uniform(kbw, (HID,),    jnp.float32, -lim_w, lim_w)
    V  = jax.random.uniform(kv,  (HID, 1),  jnp.float32, -lim_v, lim_v)  # V^T of torch weight
    bV = jax.random.uniform(kbv, (1,),      jnp.float32, -lim_v, lim_v)

    ref = attention_head_ref(features, W, bW, V, bV)

    # f32 path, explicit sublane-aligned tile -> grid=(2,): exercises the
    # multi-step pipeline and the "parallel" megacore axis.
    out = jax.block_until_ready(attention_head(features, W, bW, V, bV, block_b=8))
    assert out.shape == (B, IN)
    assert jnp.allclose(out, ref, atol=1e-5, rtol=1e-5), "mismatch vs reference"

    # Auto-sized tile path (per-generation VMEM budget, >=2 grid steps).
    out2 = jax.block_until_ready(attention_head(features, W, bW, V, bV))
    assert jnp.allclose(out2, ref, atol=1e-5, rtol=1e-5), "mismatch vs reference (auto tile)"

    # bf16-streamed features + bf16 MXU projection (the memory-bound win on
    # v5e/v6e); loose tolerance because of the reduced precision.
    out3 = jax.block_until_ready(
        attention_head(features.astype(jnp.bfloat16), W, bW, V, bV,
                       matmul_dtype=jnp.bfloat16))
    assert out3.dtype == jnp.bfloat16
    assert bool(jnp.all(jnp.isfinite(out3.astype(jnp.float32))))
    assert jnp.allclose(out3.astype(jnp.float32), ref, atol=5e-2, rtol=5e-2), \
        "mismatch vs reference (bf16 path)"

    print("KERNEL_OK")
</pallas_src>

<mosaic_0001>
module attributes {stable_mosaic.version = 11 : i64} {
  func.func @attention_head_kernel(%arg0: i32, %arg1: memref<8x16x128xf32, #tpu.memory_space<vmem>>, %arg2: memref<128x64xf32, #tpu.memory_space<vmem>>, %arg3: memref<1x64xf32, #tpu.memory_space<vmem>>, %arg4: memref<1x64xf32, #tpu.memory_space<vmem>>, %arg5: memref<8x128xf32, #tpu.memory_space<vmem>>) attributes {dimension_semantics = [#tpu.dimension_semantics<parallel>], iteration_bounds = array<i64: 2>, scalar_prefetch = 0 : i64, scratch_operands = 0 : i64, tpu.core_type = #tpu.core_type<tc>, window_params = [{transform_indices = @transform_0, window_bounds = array<i64: 8, 16, 128>}, {pipeline_mode = #tpu.pipeline_mode<synchronous>, transform_indices = @transform_1, window_bounds = array<i64: 128, 64>}, {pipeline_mode = #tpu.pipeline_mode<synchronous>, transform_indices = @transform_2, window_bounds = array<i64: 1, 64>}, {pipeline_mode = #tpu.pipeline_mode<synchronous>, transform_indices = @transform_3, window_bounds = array<i64: 1, 64>}, {transform_indices = @transform_4, window_bounds = array<i64: 8, 128>}]} {
    %c0 = arith.constant 0 : index
    %c0_0 = arith.constant 0 : index
    %c0_1 = arith.constant 0 : index
    %0 = vector.load %arg1[%c0, %c0_0, %c0_1] : memref<8x16x128xf32, #tpu.memory_space<vmem>>, vector<8x16x128xf32>
    %c0_2 = arith.constant 0 : index
    %c0_3 = arith.constant 0 : index
    %1 = vector.load %arg2[%c0_2, %c0_3] : memref<128x64xf32, #tpu.memory_space<vmem>>, vector<128x64xf32>
    %c0_4 = arith.constant 0 : index
    %c0_5 = arith.constant 0 : index
    %2 = vector.load %arg3[%c0_4, %c0_5] : memref<1x64xf32, #tpu.memory_space<vmem>>, vector<1x64xf32>
    %c0_6 = arith.constant 0 : index
    %c0_7 = arith.constant 0 : index
    %3 = vector.load %arg4[%c0_6, %c0_7] : memref<1x64xf32, #tpu.memory_space<vmem>>, vector<1x64xf32>
    %4 = vector.shape_cast %0 : vector<8x16x128xf32> to vector<128x128xf32>
    %cst = arith.constant dense<0.000000e+00> : vector<128x64xf32>
    %5 = tpu.matmul %4, %1, %cst {dimension_numbers = #tpu.dot_dimension_numbers<[1], [0], [0], [1], [0, 0, 1, 1], [], []>, precision = #tpu.contract_precision<fp32>} : vector<128x128xf32>, vector<128x64xf32>, vector<128x64xf32> -> vector<128x64xf32>
    %6 = vector.broadcast %2 : vector<1x64xf32> to vector<128x64xf32>
    %7 = arith.addf %5, %6 : vector<128x64xf32>
    %8 = math.tanh %7 : vector<128x64xf32>
    %9 = vector.shape_cast %8 : vector<128x64xf32> to vector<8x16x64xf32>
    %10 = vector.shape_cast %3 : vector<1x64xf32> to vector<1x1x64xf32>
    %11 = vector.broadcast %10 : vector<1x1x64xf32> to vector<8x16x64xf32>
    %12 = arith.mulf %9, %11 : vector<8x16x64xf32>
    %cst_8 = arith.constant dense<0.000000e+00> : vector<8x16xf32>
    %13 = vector.multi_reduction <add>, %12, %cst_8 [2] : vector<8x16x64xf32> to vector<8x16xf32>
    %cst_9 = arith.constant dense<0xFF800000> : vector<8xf32>
    %14 = vector.multi_reduction <maximumf>, %13, %cst_9 [1] : vector<8x16xf32> to vector<8xf32>
    %15 = vector.shape_cast %14 : vector<8xf32> to vector<8x1xf32>
    %16 = vector.broadcast %15 : vector<8x1xf32> to vector<8x16xf32>
    %17 = arith.subf %13, %16 : vector<8x16xf32>
    %18 = math.exp %17 : vector<8x16xf32>
    %cst_10 = arith.constant dense<0.000000e+00> : vector<8xf32>
    %19 = vector.multi_reduction <add>, %18, %cst_10 [1] : vector<8x16xf32> to vector<8xf32>
    %20 = vector.shape_cast %19 : vector<8xf32> to vector<8x1xf32>
    %21 = vector.shape_cast %18 : vector<8x16xf32> to vector<8x1x16xf32>
    "tpu.trace_start"() <{level = 10 : i32, message = "bqs,bsd->bqd"}> : () -> ()
    %cst_11 = arith.constant dense<0.000000e+00> : vector<8x1x128xf32>
    %22 = tpu.matmul %21, %0, %cst_11 {dimension_numbers = #tpu.dot_dimension_numbers<[2], [1], [1], [2], [0, 0, 0, 1, 1, 2], [0], [0]>, precision = #tpu.contract_precision<fp32>} : vector<8x1x16xf32>, vector<8x16x128xf32>, vector<8x1x128xf32> -> vector<8x1x128xf32>
    "tpu.trace_stop"() : () -> ()
    %23 = vector.shape_cast %22 : vector<8x1x128xf32> to vector<8x128xf32>
    %cst_12 = arith.constant 1.000000e+00 : f32
    %24 = vector.broadcast %cst_12 : f32 to vector<8x1xf32>
    %25 = arith.divf %24, %20 : vector<8x1xf32>
    %26 = vector.broadcast %25 : vector<8x1xf32> to vector<8x128xf32>
    %27 = arith.mulf %23, %26 : vector<8x128xf32>
    %c0_13 = arith.constant 0 : index
    %c0_14 = arith.constant 0 : index
    %28 = vector.load %arg5[%c0_13, %c0_14] : memref<8x128xf32, #tpu.memory_space<vmem>>, vector<8x128xf32>
    tpu.vector_store %arg5[%c0_13, %c0_14], %27 {strides = array<i32>} : memref<8x128xf32, #tpu.memory_space<vmem>>, vector<8x128xf32>,
    return
  }
  func.func @transform_0(%arg0: i32) -> (i32, i32, i32) {
    %c0_i32 = arith.constant 0 : i32
    %c0_i32_0 = arith.constant 0 : i32
    %c0_i32_1 = arith.constant 0 : i32
    return %arg0, %c0_i32, %c0_i32_0 : i32, i32, i32
  }
  func.func @transform_1(%arg0: i32) -> (i32, i32) {
    %c0_i32 = arith.constant 0 : i32
    %c0_i32_0 = arith.constant 0 : i32
    %c0_i32_1 = arith.constant 0 : i32
    return %c0_i32, %c0_i32_0 : i32, i32
  }
  func.func @transform_2(%arg0: i32) -> (i32, i32) {
    %c0_i32 = arith.constant 0 : i32
    %c0_i32_0 = arith.constant 0 : i32
    %c0_i32_1 = arith.constant 0 : i32
    return %c0_i32, %c0_i32_0 : i32, i32
  }
  func.func @transform_3(%arg0: i32) -> (i32, i32) {
    %c0_i32 = arith.constant 0 : i32
    %c0_i32_0 = arith.constant 0 : i32
    %c0_i32_1 = arith.constant 0 : i32
    return %c0_i32, %c0_i32_0 : i32, i32
  }
  func.func @transform_4(%arg0: i32) -> (i32, i32) {
    %c0_i32 = arith.constant 0 : i32
    %c0_i32_0 = arith.constant 0 : i32
    return %arg0, %c0_i32 : i32, i32
  }
}

module attributes {stable_mosaic.version = 11 : i64} {
  func.func @attention_head_kernel(%arg0: i32, %arg1: memref<8x16x128xf32, #tpu.memory_space<vmem>>, %arg2: memref<128x64xf32, #tpu.memory_space<vmem>>, %arg3: memref<1x64xf32, #tpu.memory_space<vmem>>, %arg4: memref<1x64xf32, #tpu.memory_space<vmem>>, %arg5: memref<8x128xf32, #tpu.memory_space<vmem>>) attributes {dimension_semantics = [#tpu.dimension_semantics<parallel>], iteration_bounds = array<i64: 2>, scalar_prefetch = 0 : i64, scratch_operands = 0 : i64, tpu.core_type = #tpu.core_type<tc>, window_params = [{transform_indices = @transform_0, window_bounds = array<i64: 8, 16, 128>}, {pipeline_mode = #tpu.pipeline_mode<synchronous>, transform_indices = @transform_1, window_bounds = array<i64: 128, 64>}, {pipeline_mode = #tpu.pipeline_mode<synchronous>, transform_indices = @transform_2, window_bounds = array<i64: 1, 64>}, {pipeline_mode = #tpu.pipeline_mode<synchronous>, transform_indices = @transform_3, window_bounds = array<i64: 1, 64>}, {transform_indices = @transform_4, window_bounds = array<i64: 8, 128>}]} {
    %c0 = arith.constant 0 : index
    %c0_0 = arith.constant 0 : index
    %c0_1 = arith.constant 0 : index
    %0 = vector.load %arg1[%c0, %c0_0, %c0_1] : memref<8x16x128xf32, #tpu.memory_space<vmem>>, vector<8x16x128xf32>
    %c0_2 = arith.constant 0 : index
    %c0_3 = arith.constant 0 : index
    %1 = vector.load %arg2[%c0_2, %c0_3] : memref<128x64xf32, #tpu.memory_space<vmem>>, vector<128x64xf32>
    %c0_4 = arith.constant 0 : index
    %c0_5 = arith.constant 0 : index
    %2 = vector.load %arg3[%c0_4, %c0_5] : memref<1x64xf32, #tpu.memory_space<vmem>>, vector<1x64xf32>
    %c0_6 = arith.constant 0 : index
    %c0_7 = arith.constant 0 : index
    %3 = vector.load %arg4[%c0_6, %c0_7] : memref<1x64xf32, #tpu.memory_space<vmem>>, vector<1x64xf32>
    %4 = vector.shape_cast %0 : vector<8x16x128xf32> to vector<128x128xf32>
    %cst = arith.constant dense<0.000000e+00> : vector<128x64xf32>
    %5 = tpu.matmul %4, %1, %cst {dimension_numbers = #tpu.dot_dimension_numbers<[1], [0], [0], [1], [0, 0, 1, 1], [], []>, precision = #tpu.contract_precision<fp32>} : vector<128x128xf32>, vector<128x64xf32>, vector<128x64xf32> -> vector<128x64xf32>
    %6 = vector.broadcast %2 : vector<1x64xf32> to vector<128x64xf32>
    %7 = arith.addf %5, %6 : vector<128x64xf32>
    %8 = math.tanh %7 : vector<128x64xf32>
    %9 = vector.shape_cast %8 : vector<128x64xf32> to vector<8x16x64xf32>
    %10 = vector.shape_cast %3 : vector<1x64xf32> to vector<1x1x64xf32>
    %11 = vector.broadcast %10 : vector<1x1x64xf32> to vector<8x16x64xf32>
    %12 = arith.mulf %9, %11 : vector<8x16x64xf32>
    %cst_8 = arith.constant dense<0.000000e+00> : vector<8x16xf32>
    %13 = vector.multi_reduction <add>, %12, %cst_8 [2] : vector<8x16x64xf32> to vector<8x16xf32>
    %cst_9 = arith.constant dense<0xFF800000> : vector<8xf32>
    %14 = vector.multi_reduction <maximumf>, %13, %cst_9 [1] : vector<8x16xf32> to vector<8xf32>
    %15 = vector.shape_cast %14 : vector<8xf32> to vector<8x1xf32>
    %16 = vector.broadcast %15 : vector<8x1xf32> to vector<8x16xf32>
    %17 = arith.subf %13, %16 : vector<8x16xf32>
    %18 = math.exp %17 : vector<8x16xf32>
    %cst_10 = arith.constant dense<0.000000e+00> : vector<8xf32>
    %19 = vector.multi_reduction <add>, %18, %cst_10 [1] : vector<8x16xf32> to vector<8xf32>
    %20 = vector.shape_cast %19 : vector<8xf32> to vector<8x1xf32>
    %21 = vector.shape_cast %18 : vector<8x16xf32> to vector<8x1x16xf32>
    "tpu.trace_start"() <{level = 10 : i32, message = "bqs,bsd->bqd"}> : () -> ()
    %cst_11 = arith.constant dense<0.000000e+00> : vector<8x1x128xf32>
    %22 = tpu.matmul %21, %0, %cst_11 {dimension_numbers = #tpu.dot_dimension_numbers<[2], [1], [1], [2], [0, 0, 0, 1, 1, 2], [0], [0]>, precision = #tpu.contract_precision<fp32>} : vector<8x1x16xf32>, vector<8x16x128xf32>, vector<8x1x128xf32> -> vector<8x1x128xf32>
    "tpu.trace_stop"() : () -> ()
    %23 = vector.shape_cast %22 : vector<8x1x128xf32> to vector<8x128xf32>
    %cst_12 = arith.constant 1.000000e+00 : f32
    %24 = vector.broadcast %cst_12 : f32 to vector<8x1xf32>
    %25 = arith.divf %24, %20 : vector<8x1xf32>
    %26 = vector.broadcast %25 : vector<8x1xf32> to vector<8x128xf32>
    %27 = arith.mulf %23, %26 : vector<8x128xf32>
    %c0_13 = arith.constant 0 : index
    %c0_14 = arith.constant 0 : index
    %28 = vector.load %arg5[%c0_13, %c0_14] : memref<8x128xf32, #tpu.memory_space<vmem>>, vector<8x128xf32>
    tpu.vector_store %arg5[%c0_13, %c0_14], %27 {strides = array<i32>} : memref<8x128xf32, #tpu.memory_space<vmem>>, vector<8x128xf32>,
    return
  }
  func.func @transform_0(%arg0: i32) -> (i32, i32, i32) {
    %c0_i32 = arith.constant 0 : i32
    %c0_i32_0 = arith.constant 0 : i32
    %c0_i32_1 = arith.constant 0 : i32
    return %arg0, %c0_i32, %c0_i32_0 : i32, i32, i32
  }
  func.func @transform_1(%arg0: i32) -> (i32, i32) {
    %c0_i32 = arith.constant 0 : i32
    %c0_i32_0 = arith.constant 0 : i32
    %c0_i32_1 = arith.constant 0 : i32
    return %c0_i32, %c0_i32_0 : i32, i32
  }
  func.func @transform_2(%arg0: i32) -> (i32, i32) {
    %c0_i32 = arith.constant 0 : i32
    %c0_i32_0 = arith.constant 0 : i32
    %c0_i32_1 = arith.constant 0 : i32
    return %c0_i32, %c0_i32_0 : i32, i32
  }
  func.func @transform_3(%arg0: i32) -> (i32, i32) {
    %c0_i32 = arith.constant 0 : i32
    %c0_i32_0 = arith.constant 0 : i32
    %c0_i32_1 = arith.constant 0 : i32
    return %c0_i32, %c0_i32_0 : i32, i32
  }
  func.func @transform_4(%arg0: i32) -> (i32, i32) {
    %c0_i32 = arith.constant 0 : i32
    %c0_i32_0 = arith.constant 0 : i32
    return %arg0, %c0_i32 : i32, i32
  }
}

</mosaic_0001>

<bundles_post_ra>
// kernel: tpu_custom_call.1
= control target key start
LH: loop header
LB: loop body
LE: loop exit
PB: predicated region body
PF: predicated region fallthrough
CT: control target
= control target key end

     0   :  { %9 = vsyncpa [#allocation3], 0  ;;  %s8933_s0 = inlined_call_operand.hbm [shape: f32[16,16,128], index: 0, kind: input, shape index: {}]   ;;  %s8934_s1 = inlined_call_operand.vmem [shape: f32[128,64], index: 1, kind: input, shape index: {}]   ;;  %s8935_s2 = inlined_call_operand.vmem [shape: f32[1,64], index: 2, kind: input, shape index: {}]   ;;  %s8936_s3 = inlined_call_operand.vmem [shape: f32[1,64], index: 3, kind: input, shape index: {}]   ;;  %s8937_s4 = inlined_call_operand.hbm [shape: f32[16,128], index: 4, kind: output, shape index: {}]  }
   0x1   :  { %11 = vsyncpa [#allocation3 + $0x1], 0 }
   0x2   :  { %12 = vsyncpa [#allocation4], 0 }
   0x3   :  { %14 = vsyncpa [#allocation4 + $0x1], 0  ;;  %s7589_s15 = smov 0   ;;  %s7591_s16 = smov 0  }
   0x4   :  { %s7593_s17 = smov 0   ;;  %s7595_s18 = smov 0  }
   0x5 LB: > { %s7610_s19 = sadd.s32 4294967295, %s7554_s18   ;;  %s5800_s20 = sadd.s32 4294967294, %s7554_s18   ;;  %s7554_s18 = sphi %s7595_s18, %s9233_s18   ;;  %s7550_s17 = sphi %s7593_s17, %s9232_s17   ;;  %s7546_s16 = sphi %s7591_s16, %s9231_s16   ;;  %s7542_s15 = sphi %s7589_s15, %s9230_s15  }
   0x6   : > { %s7614_s21 = sadd.s32 1, %s7554_s18   ;;  %s27_s22 = sadd.s32 1, %s7550_s17 }
   0x7   : > { %s24_s23 = ssub.s32 %s7554_s18, %s7614_s21  ;;  %p34_p0 = scmp.ne.s32.totalorder %s7550_s17, %s7546_s16 }
   0x8   : > { %p25_p1 = scmp.eq.s32.totalorder %s24_s23, 0  ;;  %p35_p2 = scmp.eq.s32.totalorder %s7554_s18, 0 }
   0x9   : > { %p40_p3 = scmp.ne.s32.totalorder %s7546_s16, %s7542_s15  ;;  %p41_p4 = scmp.eq.s32.totalorder %s7610_s19, 0 }
   0xa   : > { %s7626_s24 = scalar_select %p25_p1, %s7550_s17, %s27_s22  }
   0xb   : > { %p7628_p5 = por %p35_p2, %p34_p0  ;;  %p7632_p6 = por %p41_p4, %p40_p3 }
   0xc   : > { %p127_p7 = scmp.eq.s32.totalorder %s7610_s19, 1  ;;  %p133_p8 = scmp.eq.s32.totalorder %s5800_s20, 1 }
   0xd   : > { %p7350_p10 = scmp.lt.s32.totalorder %s7554_s18, 2  ;;  %s162_s29 = sand.u32 1, %s7550_s17  }
   0xe   : > { %p7639_p11 = por %p127_p7, %p34_p0  ;;  %p7643_p12 = por %p133_p8, %p40_p3 }
   0xf   : > { %s5817_s30 = sshll.u32 %s7554_s18, 11  ;;  %s5803_s5 = sshll.u32 %s162_s29, 7 }
  0x10   : > { %s9053_s27 = scalar_select %p7639_p11, 1, 0 }
  0x11   : > { %s9054_s28 = scalar_select %p7643_p12, 1, 0 }
  0x12   : > { %s7652_s8 = scalar_lea.hbm %s8933_s0, %s5817_s30  ;;  %s166_s9 = scalar_lea.vmem [#allocation2], %s5803_s5 }
  0x13   : > { %s174_s10 = sshll.u32 %s166_s9, 4  ;;  %p7656_p13 = pnand %p7350_p10, %p7628_p5  ;;  %s7660_s10 = int_to_ptr.vmem [resolvable:$true] %s174_s10 }
  0x14   : > { %s7662_s12 = scalar_lea.sflag [#allocation3], %s162_s29  ;;  %s7458_s13 = scalar_lea.hbm %s7652_s8, 2048 }
  0x15   : > { %p7459_p0 = scmp.ne.s32.totalorder %s7652_s8, %s7458_s13  ;;  %p7460_p1 = pneg %p7656_p13 }
  0x16   : > { %s7463_s22 = scalar_lea.hbm %s8933_s0, 4096  ;;  %p7464_p4 = scmp.lt.u32.totalorder %s7652_s8, %s8933_s0 }
  0x17   : > { %p7461_p2 = pnand %p7460_p1, %p7459_p0  ;;  %p7465_p5 = scmp.lt.u32.totalorder %s7463_s22, %s7458_s13 }
  0x18   : > { %p7467_p8 = scmp.lt.u32.totalorder %s7458_s13, %s7652_s8 }
  0x19   : > { %p7462_p3 = pneg %p7461_p2  ;;  %p7466_p7 = por %p7465_p5, %p7464_p4 }
  0x1b   : > { %p7468_p10 = por %p7467_p8, %p7466_p7 }
  0x1d   : > { %p7469_p9 = pnand %p7468_p10, %p7462_p3 }
  0x1f   : > { %7472 = shalt.err (!%p7469_p9)
}
  0x20   : > { %s7473_s29 = scalar_lea.vmem %s7660_s10, 2048  ;;  %s7556_s30 = smov [#allocation2]  }
  0x21   : > { %p7474_p0 = scmp.ne.s32.totalorder %s7660_s10, %s7473_s29  ;;  %s7478_s5 = sshll.u32 %s7556_s30, 4  ;;  %s7479_s5 = int_to_ptr.vmem [resolvable:$false] %s7478_s5 }
  0x22   : > { %s7480_s6 = scalar_lea.vmem %s7479_s5, 4096  ;;  %p7481_p11 = scmp.lt.s32.totalorder %s7660_s10, %s7479_s5 }
  0x23   : > { %p7476_p2 = pnand %p7474_p0, %p7460_p1  ;;  %p7482_p4 = scmp.lt.s32.totalorder %s7480_s6, %s7473_s29 }
  0x25   : > { %p7477_p12 = pneg %p7476_p2  ;;  %p7483_p5 = por %p7482_p4, %p7481_p11 }
  0x27   : > { %p7484_p7 = pnand %p7483_p5, %p7477_p12 }
  0x29   : > { %7487 = shalt.err (!%p7484_p7)
}
  0x2a   : > { %s7557_s7 = smov 128   ;;  %s7558_s9 = smov 8  }
  0x2b   : > { %7345 = dma.hbm_to_vmem [thread:$0]  (!%p7656_p13), %s7652_s8, 2048, %s7660_s10, %s7662_s12, %s7557_s7, %s7557_s7, %s7558_s9  }
  0x2c   : > { %p5807_p9 = scmp.ge.s32.totalorder %s7554_s18, 1  ;;  %p182_p1 = scmp.lt.s32.totalorder %s7554_s18, 3 }
  0x2e   : > { %p183_p3 = pnand %p5807_p9, %p182_p1 }
  0x30   : > { %186 = sbr.rel (%p183_p3) target bundleno = 1544 (0x608), region = 36 }
  0x37   : > { %s7693_s13 = sand.u32 1, %s7546_s16  }
  0x38   : > { %s5808_s14 = sshll.u32 %s7693_s13, 7  ;;  %s189_s20 = scalar_lea.sflag [#allocation3], %s7693_s13 }
  0x39   : > { %s7697_s22 = scalar_lea.vmem [#allocation2], %s5808_s14 }
  0x3a   : > { %7533 = dma.done.wait (%p7632_p6), %s189_s20, 2048  }
  0x3b   : > { %7535 = vsyncadd (%p7632_p6), %s189_s20, 4294965248  ;;  %v234_v0 = vld [vmem:[%s8934_s1] sm:$0xff]  ;;  %v235_v1 = vld [vmem:[%s8934_s1 + $0x8] sm:$0xff]  ;;  %vm1582_vm0 = vcmask 523264   ;;  %vm1658_vm1 = vcmask 130112   ;;  %vm1723_vm2 = vcmask 1041409  }
  0x3c   : > { %v236_v2 = vld [vmem:[%s8934_s1 + $0x10] sm:$0xff]  ;;  %v259_v3 = vand.u32 4294901760, %v234_v0  ;;  %v262_v4 = vand.u32 4294901760, %v235_v1  ;;  %v237_v5 = vld [vmem:[%s8934_s1 + $0x18] sm:$0xff]  ;;  %v7718_v7 = vld [vmem:[%s8934_s1 + $0x20] sm:$0xff]  ;;  %vm1725_vm3 = vcmask 1042434  }
  0x3d   : > { %v265_v6 = vand.u32 4294901760, %v236_v2  ;;  %v7723_v8 = vld [vmem:[%s8934_s1 + $0x28] sm:$0xff]  ;;  %v268_v9 = vand.u32 4294901760, %v237_v5  ;;  %v271_v10 = vand.u32 4294901760, %v7718_v7  ;;  %v7730_v12 = vld [vmem:[%s8934_s1 + $0x30] sm:$0xff]  ;;  %v7735_v13 = vld [vmem:[%s8934_s1 + $0x38] sm:$0xff] }
  0x3e   : > { %v274_v11 = vand.u32 4294901760, %v7723_v8  ;;  %v7740_v14 = vld [vmem:[%s8934_s1 + $0x40] sm:$0xff]  ;;  %v7742_v15 = vpack.c.bf16 %v262_v4, %v259_v3  ;;  %v277_v16 = vand.u32 4294901760, %v7730_v12  ;;  %v8946_v17 = vand.u32 4294901760, %v7735_v13  ;;  %v7749_v18 = vld [vmem:[%s8934_s1 + $0x48] sm:$0xff]  ;;  %v7754_v19 = vld [vmem:[%s8934_s1 + $0x50] sm:$0xff] }
  0x3f   : > { %v7756_v20 = vpack.c.bf16 %v268_v9, %v265_v6  ;;  %v7761_v21 = vld [vmem:[%s8934_s1 + $0x58] sm:$0xff]  ;;  %v8945_v22 = vand.u32 4294901760, %v7740_v14  ;;  %v7768_v23 = vld [vmem:[%s8934_s1 + $0x60] sm:$0xff]  ;;  %v219_v25 = vld [vmem:[%s7697_s22 + $0x8] sm:$0xff]  ;;  %v8944_v27 = vand.u32 4294901760, %v7749_v18  ;;  %v8942_v28 = vand.u32 4294901760, %v7754_v19 }
  0x40   : > { %6827 = vmatprep.subr.bf16.mxu0 %v7742_v15  ;;  %v218_v24 = vld [vmem:[%s7697_s22] sm:$0xff]  ;;  %v7777_v26 = vpack.c.bf16 %v274_v11, %v271_v10  ;;  %v220_v30 = vld [vmem:[%s7697_s22 + $0x10] sm:$0xff]  ;;  %v221_v31 = vld [vmem:[%s7697_s22 + $0x18] sm:$0xff]  ;;  %v7790_v32 = vpack.c.bf16 %v8946_v17, %v277_v16  ;;  %v8941_v33 = vand.u32 4294901760, %v7761_v21  ;;  %v7798_v35 = vand.u32 4294901760, %v219_v25  ;;  %s5809_s25 = sshll.u32 %s7693_s13, 3 }
  0x41   : > { %9056 = vst [vmem:[#allocation8_spill] sm:$0xff] %v7756_v20  ;;  %6829 = vmatpush3.bf16.msra.mxu0 %v7742_v15  ;;  %v7781_v29 = vand.u32 4294901760, %v218_v24  ;;  %v7796_v34 = vld [vmem:[%s8934_s1 + $0x68] sm:$0xff]  ;;  %v7800_v36 = vsub.f32 %v234_v0, %v259_v3  ;;  %v8948_v37 = vand.u32 4294901760, %v7768_v23  ;;  %v7806_v39 = vsub.f32 %v235_v1, %v262_v4  ;;  %v7823_v46 = vld [vmem:[%s8934_s1 + $0x70] sm:$0xff]  ;;  %v7828_v47 = vld [vmem:[%s8934_s1 + $0x78] sm:$0xff] }
  0x42   : > { %9057 = vst [vmem:[#allocation9_spill] sm:$0xff] %v7777_v26  ;;  %6831 = vmatprep.subr.bf16.mxu0 %v7756_v20  ;;  %9058 = vst [vmem:[#allocation10_spill] sm:$0xff] %v7790_v32  ;;  %v7808_v40 = vand.u32 4294901760, %v220_v30  ;;  %v7811_v41 = vsub.f32 %v219_v25, %v7798_v35  ;;  %v7814_v43 = vand.u32 4294901760, %v221_v31  ;;  %v7816_v44 = vsub.f32 %v236_v2, %v265_v6  ;;  %v222_v59 = vld [vmem:[%s7697_s22 + $0x20] sm:$0xff]  ;;  %v223_v0 = vld [vmem:[%s7697_s22 + $0x28] sm:$0xff] }
  0x43   : > { %v7804_v38 = vsub.f32 %v218_v24, %v7781_v29  ;;  %v8940_v42 = vand.u32 4294901760, %v7800_v36  ;;  %v8947_v45 = vand.u32 4294901760, %v7796_v34  ;;  %v8939_v49 = vand.u32 4294901760, %v7806_v39  ;;  %v224_v25 = vld [vmem:[%s7697_s22 + $0x30] sm:$0xff]  ;;  %s5813_s29 = sshll.u32 %s7610_s19, 7  ;;  %s216_s30 = scalar_lea.vmem [#allocation5], %s5809_s25 }
  0x44   : > { %9059 = vst [vmem:[#allocation11_spill] sm:$0xff] %v7811_v41  ;;  %v7835_v50 = vsub.f32 %v220_v30, %v7808_v40  ;;  %v7842_v51 = vpack.c.bf16 %v8944_v27, %v8945_v22  ;;  %v7845_v52 = vand.u32 4294901760, %v7811_v41  ;;  %v7848_v53 = vsub.f32 %v221_v31, %v7814_v43  ;;  %v227_v22 = vld [vmem:[%s7697_s22 + $0x48] sm:$0xff]  ;;  %s5730_s26 = sshll.u32 %s216_s30, 4  ;;  %s8888_s7 = scalar_lea.hbm %s8937_s4, %s5813_s29  ;;  %s8890_s26 = int_to_ptr.vmem [resolvable:$true] %s5730_s26 }
  0x45   : > { %6833 = vmatpush3.bf16.msra.mxu0 %v7756_v20  ;;  %v7831_v48 = vand.u32 4294901760, %v7804_v38  ;;  %v7850_v54 = vsub.f32 %v237_v5, %v268_v9  ;;  %v503_v56 = vsub.f32 %v7800_v36, %v8940_v42  ;;  %v8943_v58 = vand.u32 4294901760, %v7816_v44  ;;  %s5717_s9 = scalar_lea.sflag [#allocation4], %s7693_s13  ;;  %s7488_s14 = scalar_lea.vmem %s8890_s26, 128 }
  0x46   : > { %9061 = vst [vmem:[#allocation13_spill] sm:$0xff] %v7835_v50  ;;  %6835 = vmatprep.subr.bf16.mxu0 %v7777_v26  ;;  %9062 = vst [vmem:[#allocation14_spill] sm:$0xff] %v7842_v51  ;;  %v7858_v57 = vand.u32 4294901760, %v7835_v50  ;;  %v8963_v60 = vand.u32 4294901760, %v7823_v46  ;;  %v8962_v61 = vand.u32 4294901760, %v7828_v47  ;;  %v352_v62 = vsub.f32 %v7811_v41, %v7845_v52  ;;  %p7489_p6 = scmp.ne.s32.totalorder %s8890_s26, %s7488_s14  ;;  %p9227_p11 = scmp.ne.s32.totalorder %s9053_s27, 0 }
  0x47   : > { %9060 = vst [vmem:[#allocation12_spill] sm:$0xff] %v7831_v48  ;;  %9063 = vst [vmem:[#allocation15_spill] sm:$0xff] %v7845_v52  ;;  %v342_v55 = vsub.f32 %v7804_v38, %v7831_v48  ;;  %v7867_v63 = vand.u32 4294901760, %v7848_v53  ;;  %v7875_v1 = vpack.c.bf16 %v8941_v33, %v8942_v28  ;;  %v510_v3 = vsub.f32 %v7806_v39, %v8939_v49  ;;  %v225_v49 = vld [vmem:[%s7697_s22 + $0x38] sm:$0xff]  ;;  %s7563_s19 = smov [#allocation5]  }
  0x48   : > { %9064 = vst [vmem:[#allocation16_spill] sm:$0xff] %v7848_v53  ;;  %9065 = vst [vmem:[#allocation17_spill] sm:$0xff] %v7858_v57  ;;  %v362_v4 = vsub.f32 %v7835_v50, %v7858_v57  ;;  %v7885_v5 = vand.u32 4294901760, %v352_v62  ;;  %v8949_v9 = vand.u32 4294901760, %v7850_v54  ;;  %v7890_v24 = vand.u32 4294901760, %v222_v59  ;;  %p7490_p12 = pnand %p7489_p6, %p9227_p11  ;;  %s7492_s20 = sshll.u32 %s7563_s19, 4  ;;  %s7493_s20 = int_to_ptr.vmem [resolvable:$false] %s7492_s20 }
  0x49   : > { %9066 = vst [vmem:[#allocation18_spill] sm:$0xff] %v7867_v63  ;;  %6837 = vmatpush3.bf16.msra.mxu0 %v7777_v26  ;;  %9067 = vst [vmem:[#allocation19_spill] sm:$0xff] %v7875_v1  ;;  %v7877_v2 = vand.u32 4294901760, %v342_v55  ;;  %v372_v6 = vsub.f32 %v7848_v53, %v7867_v63  ;;  %v504_v30 = vand.u32 4294901760, %v503_v56  ;;  %v7899_v55 = vsub.f32 %v7816_v44, %v8943_v58  ;;  %s7494_s8 = scalar_lea.vmem %s7493_s20, 256  ;;  %p7495_p8 = scmp.lt.s32.totalorder %s8890_s26, %s7493_s20 }
  0x4a   : > { %6839 = vmatprep.subr.bf16.mxu0 %v7790_v32  ;;  %9069 = vst [vmem:[#allocation21_spill] sm:$0xff] %v7885_v5  ;;  %v7894_v31 = vand.u32 4294901760, %v362_v4  ;;  %v7901_v62 = vand.u32 4294901760, %v223_v0  ;;  %v7909_v28 = vsub.f32 %v222_v59, %v7890_v24  ;;  %v7914_v56 = vsub.f32 %v7718_v7, %v271_v10  ;;  %p7491_p13 = pneg %p7490_p12  ;;  %p7496_p10 = scmp.lt.s32.totalorder %s7494_s8, %s7488_s14 }
  0x4b   : > { %9068 = vst [vmem:[#allocation20_spill] sm:$0xff] %v7877_v2  ;;  %6186 = vmatprep.mubr.f32.mxu0 %v7877_v2  ;;  %v7906_v33 = vand.u32 4294901760, %v372_v6  ;;  %v511_v4 = vand.u32 4294901760, %v510_v3  ;;  %v7923_v42 = vsub.f32 %v7723_v8, %v274_v11  ;;  %v7925_v6 = vand.u32 4294901760, %v224_v25 }
  0x4c   : > { %9070 = vst [vmem:[#allocation22_spill] sm:$0xff] %v7894_v31  ;;  %9072 = vst [vmem:[#allocation24_spill] sm:$0xff] %v7909_v28  ;;  %v7918_v58 = vsub.f32 %v223_v0, %v7901_v62  ;;  %v7931_v7 = vand.u32 4294901760, %v7909_v28  ;;  %v8951_v10 = vand.u32 4294901760, %v7914_v56  ;;  %v7934_v0 = vand.u32 4294901760, %v225_v49  ;;  %p7497_p0 = por %p7496_p10, %p7495_p8 }
  0x4d   : > { %9071 = vst [vmem:[#allocation23_spill] sm:$0xff] %v7906_v33  ;;  %6841 = vmatpush3.bf16.msra.mxu0 %v7790_v32  ;;  %v7940_v8 = vpack.c.bf16 %v8947_v45, %v8948_v37  ;;  %v7946_v3 = vsub.f32 %v224_v25, %v7925_v6  ;;  %v524_v59 = vsub.f32 %v7850_v54, %v8949_v9  ;;  %v9084_v57 = vand.u32 4294901760, %v7735_v13 }
  0x4e   : > { %9073 = vst [vmem:[#allocation25_spill] sm:$0xff] %v7918_v58  ;;  %6843 = vmatprep.subr.bf16.mxu0 %v7842_v51  ;;  %9074 = vst [vmem:[#allocation26_spill] sm:$0xff] %v7931_v7  ;;  %v7943_v11 = vand.u32 4294901760, %v7918_v58  ;;  %v382_v27 = vsub.f32 %v7909_v28, %v7931_v7  ;;  %v7955_v17 = vsub.f32 %v225_v49, %v7934_v0  ;;  %v226_v49 = vld [vmem:[%s7697_s22 + $0x40] sm:$0xff]  ;;  %v9085_v48 = vand.u32 4294901760, %v7923_v42  ;;  %p7498_p2 = pnand %p7497_p0, %p7491_p13 }
  0x4f   : > { %9075 = vst [vmem:[#allocation27_spill] sm:$0xff] %v7940_v8  ;;  %9077 = vst [vmem:[#allocation29_spill] sm:$0xff] %v7946_v3  ;;  %v531_v25 = vsub.f32 %v7914_v56, %v8951_v10  ;;  %v7964_v37 = vand.u32 4294901760, %v7946_v3  ;;  %v7969_v9 = vsub.f32 %v7730_v12, %v277_v16  ;;  %v7978_v2 = vpack.c.bf16 %v8962_v61, %v8963_v60  ;;  %v229_v60 = vld [vmem:[%s7697_s22 + $0x58] sm:$0xff] }
  0x50   : > { %9076 = vst [vmem:[#allocation28_spill] sm:$0xff] %v7943_v11  ;;  %9078 = vst [vmem:[#allocation30_spill] sm:$0xff] %v7955_v17  ;;  %v392_v45 = vsub.f32 %v7918_v58, %v7943_v11  ;;  %v7980_v10 = vpack.c.bf16 %v511_v4, %v504_v30  ;;  %v518_v11 = vand.u32 4294901760, %v7899_v55  ;;  %v7984_v7 = vand.u32 4294901760, %v7955_v17 }
  0x51   : > { %6845 = vmatpush3.bf16.msra.mxu0 %v7842_v51  ;;  %9079 = vst [vmem:[#allocation31_spill] sm:$0xff] %v7964_v37  ;;  %9080 = vst [vmem:[#allocation32_spill] sm:$0xff] %v7978_v2  ;;  %v7986_v12 = vand.u32 4294901760, %v382_v27  ;;  %v402_v63 = vsub.f32 %v7946_v3, %v7964_v37  ;;  %v7995_v52 = vsub.f32 %v7735_v13, %v9084_v57  ;;  %v525_v61 = vand.u32 4294901760, %v524_v59  ;;  %v228_v27 = vld [vmem:[%s7697_s22 + $0x50] sm:$0xff] }
  0x52   : > { %6847 = vmatprep.subr.bf16.mxu0 %v7875_v1  ;;  %9081 = vst [vmem:[#allocation33_spill] sm:$0xff] %v7984_v7  ;;  %v7988_v16 = vand.u32 4294901760, %v392_v45  ;;  %v412_v30 = vsub.f32 %v7955_v17, %v7984_v7  ;;  %v7999_v55 = vand.u32 4294901760, %v226_v49  ;;  %v8001_v4 = vand.u32 4294901760, %v227_v22 }
  0x53   : > { %9082 = vst [vmem:[#allocation34_spill] sm:$0xff] %v7986_v12  ;;  %v532_v37 = vand.u32 4294901760, %v531_v25  ;;  %v538_v13 = vsub.f32 %v7923_v42, %v9085_v48  ;;  %v8013_v59 = vand.u32 4294901760, %v402_v63  ;;  %v9090_v45 = vand.u32 4294901760, %v7740_v14 }
  0x54   : > { %9083 = vst [vmem:[#allocation35_spill] sm:$0xff] %v7988_v16  ;;  %v8015_v7 = vand.u32 4294901760, %v412_v30  ;;  %v8018_v51 = vsub.f32 %v226_v49, %v7999_v55  ;;  %v8029_v57 = vand.u32 4294901760, %v228_v27  ;;  %v8031_v17 = vand.u32 4294901760, %v229_v60 }
  0x55   : > { %6849 = vmatpush3.bf16.msra.mxu0 %v7875_v1  ;;  %9086 = vst [vmem:[#allocation36_spill] sm:$0xff] %v8013_v59  ;;  %v8021_v1 = vsub.f32 %v227_v22, %v8001_v4  ;;  %v8027_v48 = vsub.f32 %v7740_v14, %v9090_v45  ;;  %v9095_v30 = vand.u32 4294901760, %v7749_v18  ;;  %v539_v14 = vand.u32 4294901760, %v538_v13 }
  0x56   : > { %6851 = vmatprep.subr.bf16.mxu0 %v7940_v8  ;;  %9087 = vst [vmem:[#allocation37_spill] sm:$0xff] %v8015_v7  ;;  %9088 = vst [vmem:[#allocation38_spill] sm:$0xff] %v8018_v51  ;;  %v8036_v49 = vand.u32 4294901760, %v8018_v51  ;;  %v9096_v45 = vand.u32 4294901760, %v7969_v9  ;;  %v8051_v63 = vsub.f32 %v228_v27, %v8029_v57  ;;  %v8054_v3 = vsub.f32 %v229_v60, %v8031_v17 }
  0x57   : > { %9089 = vst [vmem:[#allocation39_spill] sm:$0xff] %v8021_v1  ;;  %9091 = vst [vmem:[#allocation40_spill] sm:$0xff] %v8029_v57  ;;  %v8039_v22 = vand.u32 4294901760, %v8021_v1  ;;  %v8044_v25 = vsub.f32 %v7749_v18, %v9095_v30  ;;  %v9099_v13 = vand.u32 4294901760, %v7754_v19  ;;  %v9100_v27 = vand.u32 4294901760, %v7761_v21 }
  0x58   : > { %9092 = vst [vmem:[#allocation41_spill] sm:$0xff] %v8031_v17  ;;  %9093 = vst [vmem:[#allocation42_spill] sm:$0xff] %v8036_v49  ;;  %v545_v32 = vsub.f32 %v7969_v9, %v9096_v45  ;;  %v422_v18 = vsub.f32 %v8018_v51, %v8036_v49  ;;  %v6862_v60 = vpack.c.bf16 %v525_v61, %v518_v11  ;;  %v9101_v58 = vand.u32 4294901760, %v7995_v52  ;;  %v231_v11 = vld [vmem:[%s7697_s22 + $0x68] sm:$0xff] }
  0x59   : > { %9094 = vst [vmem:[#allocation43_spill] sm:$0xff] %v8039_v22  ;;  %6853 = vmatpush3.bf16.msra.mxu0 %v7940_v8  ;;  %9097 = vst [vmem:[#allocation44_spill] sm:$0xff] %v8051_v63  ;;  %v432_v30 = vsub.f32 %v8021_v1, %v8039_v22  ;;  %v8064_v8 = vsub.f32 %v7754_v19, %v9099_v13  ;;  %v8069_v45 = vsub.f32 %v7761_v21, %v9100_v27  ;;  %v230_v1 = vld [vmem:[%s7697_s22 + $0x60] sm:$0xff]  ;;  %vm1727_vm4 = vcmask 1043459  }
  0x5a   : > { %9098 = vst [vmem:[#allocation45_spill] sm:$0xff] %v8054_v3  ;;  %6855 = vmatprep.subr.bf16.mxu0 %v7978_v2  ;;  %v552_v26 = vsub.f32 %v7995_v52, %v9101_v58  ;;  %v8075_v49 = vand.u32 4294901760, %v8051_v63  ;;  %v8078_v22 = vand.u32 4294901760, %v8054_v3  ;;  %v8081_v19 = vand.u32 4294901760, %v422_v18 }
  0x5b   : > { %v8083_v13 = vand.u32 4294901760, %v432_v30  ;;  %v6866_v58 = vpack.c.bf16 %v539_v14, %v532_v37  ;;  %v546_v27 = vand.u32 4294901760, %v545_v32  ;;  %v8098_v21 = vand.u32 4294901760, %v230_v1 }
  0x5c   : > { %9102 = vst [vmem:[#allocation46_spill] sm:$0xff] %v8075_v49  ;;  %9103 = vst [vmem:[#allocation47_spill] sm:$0xff] %v8078_v22  ;;  %v442_v51 = vsub.f32 %v8051_v63, %v8075_v49  ;;  %v452_v28 = vsub.f32 %v8054_v3, %v8078_v22  ;;  %v553_v37 = vand.u32 4294901760, %v552_v26  ;;  %v8105_v49 = vand.u32 4294901760, %v231_v11  ;;  %v233_v22 = vld [vmem:[%s7697_s22 + $0x78] sm:$0xff] }
  0x5d   : > { %9104 = vst [vmem:[#allocation48_spill] sm:$0xff] %v8081_v19  ;;  %6857 = vmatpush3.bf16.msra.mxu0 %v7978_v2  ;;  %9105 = vst [vmem:[#allocation49_spill] sm:$0xff] %v8098_v21  ;;  %v232_v2 = vld [vmem:[%s7697_s22 + $0x70] sm:$0xff]  ;;  %v9109_v3 = vand.u32 4294901760, %v8027_v48  ;;  %v9110_v30 = vand.u32 4294901760, %v8044_v25  ;;  %v8116_v63 = vsub.f32 %v230_v1, %v8098_v21  ;;  %v9112_v26 = vand.u32 4294901760, %v7768_v23 }
  0x5e   : > { %6859 = vmatprep.subr.bf16.mxu0 %v7980_v10  ;;  %v8101_v32 = vand.u32 4294901760, %v442_v51  ;;  %v8103_v14 = vand.u32 4294901760, %v452_v28  ;;  %9108 = vst [vmem:[#allocation52_spill] sm:$0xff] %v8105_v49  ;;  %v6870_v53 = vpack.c.bf16 %v553_v37, %v546_v27  ;;  %v9123_v41 = vand.u32 4294901760, %v7823_v46 }
  0x5f   : > { %v559_v18 = vsub.f32 %v8027_v48, %v9109_v3  ;;  %v566_v61 = vsub.f32 %v8044_v25, %v9110_v30  ;;  %9111 = vst [vmem:[#allocation53_spill] sm:$0xff] %v8116_v63  ;;  %v8121_v28 = vsub.f32 %v7768_v23, %v9112_v26  ;;  %v8128_v3 = vsub.f32 %v231_v11, %v8105_v49 }
  0x60   : > { %9106 = vst [vmem:[#allocation50_spill] sm:$0xff] %v8101_v32  ;;  %9107 = vst [vmem:[#allocation51_spill] sm:$0xff] %v8103_v14  ;;  %6187 = vmatmul.mubr.f32.vlgmr.msra.gmra.mrb[0].mxu0 %v7885_v5  ;;  %v9114_v30 = vand.u32 4294901760, %v7796_v34  ;;  %v8135_v5 = vand.u32 4294901760, %v232_v2  ;;  %v9116_v23 = vand.u32 4294901760, %v8064_v8  ;;  %v9117_v26 = vand.u32 4294901760, %v8069_v45 }
  0x61   : > { %6861 = vmatpush3.bf16.msra.mxu0 %v7980_v10  ;;  %6189 = vmatprep.mubr.f32.mxu0 %v7894_v31  ;;  %9113 = vst [vmem:[#allocation54_spill] sm:$0xff] %v8128_v3  ;;  %v8144_v51 = vand.u32 4294901760, %v8116_v63  ;;  %v8146_v11 = vand.u32 4294901760, %v233_v22  ;;  %v8164_v27 = vsub.f32 %v7823_v46, %v9123_v41  ;;  %v567_v37 = vand.u32 4294901760, %v566_v61 }
  0x62   : > { %v8133_v1 = vsub.f32 %v7796_v34, %v9114_v30  ;;  %9115 = vst [vmem:[#allocation55_spill] sm:$0xff] %v8135_v5  ;;  %6863 = vmatprep.subr.bf16.mxu0 %v6862_v60  ;;  %v573_v10 = vsub.f32 %v8064_v8, %v9116_v23  ;;  %v580_v31 = vsub.f32 %v8069_v45, %v9117_v26  ;;  %v8149_v34 = vand.u32 4294901760, %v8128_v3 }
  0x63   : > { %9118 = vst [vmem:[#allocation56_spill] sm:$0xff] %v8144_v51  ;;  %9119 = vst [vmem:[#allocation57_spill] sm:$0xff] %v8146_v11  ;;  %v586_v30 = vand.u32 4294901760, %v8121_v28  ;;  %v8153_v20 = vsub.f32 %v232_v2, %v8135_v5  ;;  %v560_v23 = vand.u32 4294901760, %v559_v18  ;;  %v462_v26 = vsub.f32 %v8116_v63, %v8144_v51 }
  0x64   : > { %9120 = vst [vmem:[#allocation58_spill] sm:$0xff] %v8149_v34  ;;  %6190 = vmatmul.mubr.f32.gmra.mrb[2].mxu0 %v7906_v33  ;;  %v8159_v50 = vsub.f32 %v233_v22, %v8146_v11  ;;  %v472_v2 = vsub.f32 %v8128_v3, %v8149_v34  ;;  %v593_v18 = vand.u32 4294901760, %v8133_v1  ;;  %v574_v22 = vand.u32 4294901760, %v573_v10 }
  0x65   : > { %9121 = vst [vmem:[#allocation59_spill] sm:$0xff] %v8153_v20  ;;  %6865 = vmatpush3.bf16.msra.mxu0 %v6862_v60  ;;  %6192 = vmatprep.mubr.f32.mxu0 %v7986_v12  ;;  %v8171_v33 = vand.u32 4294901760, %v8153_v20  ;;  %v581_v51 = vand.u32 4294901760, %v580_v31  ;;  %v9126_v41 = vand.u32 4294901760, %v7828_v47  ;;  %v8181_v60 = vand.u32 4294901760, %v462_v26 }
  0x66   : > { %9122 = vst [vmem:[#allocation60_spill] sm:$0xff] %v8159_v50  ;;  %6867 = vmatprep.subr.bf16.mxu0 %v6866_v58  ;;  %v8174_v63 = vand.u32 4294901760, %v8159_v50  ;;  %v8183_v61 = vand.u32 4294901760, %v472_v2  ;;  %v587_v12 = vsub.f32 %v8121_v28, %v586_v30  ;;  %v600_v10 = vand.u32 4294901760, %v8164_v27 }
  0x67   : > { %9124 = vst [vmem:[#allocation61_spill] sm:$0xff] %v8171_v33  ;;  %v8179_v46 = vsub.f32 %v7828_v47, %v9126_v41  ;;  %9127 = vst [vmem:[#allocation63_spill] sm:$0xff] %v8181_v60  ;;  %v482_v34 = vsub.f32 %v8153_v20, %v8171_v33  ;;  %v594_v26 = vsub.f32 %v8133_v1, %v593_v18  ;;  %v9131_v47 = vand.u32 4294901760, %v7800_v36 }
  0x68   : > { %9125 = vst [vmem:[#allocation62_spill] sm:$0xff] %v8174_v63  ;;  %9128 = vst [vmem:[#allocation64_spill] sm:$0xff] %v8183_v61  ;;  %6193 = vmatmul.mubr.f32.gmra.mrb[4].mxu0 %v7988_v16  ;;  %v492_v31 = vsub.f32 %v8159_v50, %v8174_v63  ;;  %v6874_v2 = vpack.c.bf16 %v567_v37, %v560_v23  ;;  %v6878_v20 = vpack.c.bf16 %v581_v51, %v574_v22  ;;  %vm1729_vm5 = vcmask 1044484  }
  0x69   : > { %6869 = vmatpush3.bf16.msra.mxu0 %v6866_v58  ;;  %6195 = vmatprep.mubr.f32.mxu0 %v8013_v59  ;;  %v8196_v41 = vand.u32 4294901760, %v482_v34  ;;  %v607_v16 = vand.u32 4294901760, %v8179_v46  ;;  %v588_v63 = vand.u32 4294901760, %v587_v12  ;;  %v601_v59 = vsub.f32 %v8164_v27, %v600_v10 }
  0x6a   : > { %6871 = vmatprep.subr.bf16.mxu0 %v6870_v53  ;;  %v8198_v33 = vand.u32 4294901760, %v492_v31  ;;  %v9132_v50 = vand.u32 4294901760, %v7806_v39  ;;  %v9134_v34 = vand.u32 4294901760, %v7816_v44  ;;  %v9135_v37 = vand.u32 4294901760, %v7850_v54 }
  0x6b   : > { %9129 = vst [vmem:[#allocation65_spill] sm:$0xff] %v8196_v41  ;;  %v595_v12 = vand.u32 4294901760, %v594_v26  ;;  %v9136_v51 = vand.u32 4294901760, %v7914_v56  ;;  %v9137_v22 = vand.u32 4294901760, %v7923_v42  ;;  %v608_v26 = vsub.f32 %v8179_v46, %v607_v16 }
  0x6c   : > { %9130 = vst [vmem:[#allocation66_spill] sm:$0xff] %v8198_v33  ;;  %6196 = vmatmul.mubr.f32.gmra.mrb[6].mxu0 %v8015_v7  ;;  %v8209_v23 = vpack.c.bf16 %v9132_v50, %v9131_v47  ;;  %v8215_v31 = vpack.c.bf16 %v9135_v37, %v9134_v34  ;;  %v9139_v7 = vand.u32 4294901760, %v7969_v9  ;;  %v9140_v50 = vand.u32 4294901760, %v7995_v52 }
  0x6d   : > { %6873 = vmatpush3.bf16.msra.mxu0 %v6870_v53  ;;  %6198 = vmatprep.mubr.f32.mxu0 %v8081_v19  ;;  %v8222_v58 = vpack.c.bf16 %v9137_v22, %v9136_v51  ;;  %v9142_v34 = vand.u32 4294901760, %v8044_v25  ;;  %v9143_v37 = vand.u32 4294901760, %v8064_v8  ;;  %v9144_v51 = vand.u32 4294901760, %v8069_v45 }
  0x6e   : > { %9133 = vst [vmem:[#allocation67_spill] sm:$0xff] %v8209_v23  ;;  %v8228_v47 = vpack.c.bf16 %v9140_v50, %v9139_v7  ;;  %v9141_v23 = vand.u32 4294901760, %v8027_v48  ;;  %6875 = vmatprep.subr.bf16.mxu0 %v6874_v2  ;;  %v8243_v19 = vpack.c.bf16 %v593_v18, %v586_v30  ;;  %v6882_v7 = vpack.c.bf16 %v595_v12, %v588_v63  ;;  %v9151_v63 = vld [vmem:[#allocation25_spill] sm:$0xff]  ;;  %v9155_v30 = vld [vmem:[#allocation38_spill] sm:$0xff]  ;;  %v9157_v18 = vld [vmem:[#allocation39_spill] sm:$0xff] }
  0x6f   : > { %9138 = vst [vmem:[#allocation68_spill] sm:$0xff] %v8222_v58  ;;  %v8241_v22 = vpack.c.bf16 %v9144_v51, %v9143_v37  ;;  %v8245_v58 = vpack.c.bf16 %v607_v16, %v600_v10  ;;  %v609_v50 = vand.u32 4294901760, %v608_v26  ;;  %v6890_v16 = vpack.c.bf16 %v7806_v39, %v7800_v36  ;;  %v9159_v10 = vld [vmem:[#allocation19_spill] sm:$0xff]  ;;  %v9161_v12 = vld [vmem:[#allocation53_spill] sm:$0xff]  ;;  %v9164_v51 = vld [vmem:[#allocation32_spill] sm:$0xff] }
  0x70   : > { %v8234_v53 = vpack.c.bf16 %v9142_v34, %v9141_v23  ;;  %6199 = vmatmul.mubr.f32.gmra.mrb[8].mxu0 %v8083_v13  ;;  %v602_v23 = vand.u32 4294901760, %v601_v59  ;;  %v6898_v59 = vpack.c.bf16 %v7923_v42, %v7914_v56  ;;  %v6902_v36 = vpack.c.bf16 %v7995_v52, %v7969_v9  ;;  %v9146_v9 = vld [vmem:[#allocation13_spill] sm:$0xff]  ;;  %v9147_v56 = vld [vmem:[#allocation8_spill] sm:$0xff]  ;;  %v9162_v26 = vld [vmem:[#allocation27_spill] sm:$0xff] }
  0x71   : > { %6877 = vmatpush3.bf16.msra.mxu0 %v6874_v2  ;;  %6201 = vmatprep.mubr.f32.mxu0 %v8101_v32  ;;  %v6906_v39 = vpack.c.bf16 %v8044_v25, %v8027_v48  ;;  %v6910_v42 = vpack.c.bf16 %v8069_v45, %v8064_v8  ;;  %v6918_v52 = vpack.c.bf16 %v8179_v46, %v8164_v27  ;;  %v9148_v8 = vld [vmem:[#allocation16_spill] sm:$0xff]  ;;  %v9150_v48 = vld [vmem:[#allocation9_spill] sm:$0xff]  ;;  %v9156_v27 = vld [vmem:[#allocation14_spill] sm:$0xff]  ;;  %vm1731_vm6 = vcmask 1045509  }
  0x72   : > { %6879 = vmatprep.subr.bf16.mxu0 %v6878_v20  ;;  %v6886_v34 = vpack.c.bf16 %v609_v50, %v602_v23  ;;  %v9149_v25 = vld [vmem:[#allocation24_spill] sm:$0xff]  ;;  %v9152_v45 = vld [vmem:[#allocation29_spill] sm:$0xff]  ;;  %v9163_v37 = vld [vmem:[#allocation59_spill] sm:$0xff]  ;;  %vm1733_vm7 = vcmask 1046534   ;;  %vm1735_vm8 = vcmask 1047559   ;;  %vm1738_vm9 = vcmask 130048  }
  0x73   : > { %v9158_v46 = vld [vmem:[#allocation44_spill] sm:$0xff]  ;;  %v9160_v2 = vld [vmem:[#allocation45_spill] sm:$0xff]  ;;  %vm7561_vm10 = vmmov 0  }
  0x74   : > { %6202 = vmatmul.mubr.f32.gmra.mrb[10].mxu0 %v8103_v14  ;;  %v9166_v23 = vld [vmem:[#allocation12_spill] sm:$0xff] }
  0x75   : > { %6881 = vmatpush3.bf16.msra.mxu0 %v6878_v20  ;;  %6204 = vmatprep.mubr.f32.mxu0 %v8181_v60  ;;  %v6894_v20 = vpack.c.bf16 %v7850_v54, %v7816_v44  ;;  %v6914_v44 = vpack.c.bf16 %v8133_v1, %v8121_v28  ;;  %v9145_v54 = vld [vmem:[#allocation11_spill] sm:$0xff]  ;;  %v9153_v28 = vld [vmem:[#allocation10_spill] sm:$0xff] }
  0x76   : > { %6883 = vmatprep.subr.bf16.mxu0 %v6882_v7  ;;  %v9154_v1 = vld [vmem:[#allocation30_spill] sm:$0xff]  ;;  %v9167_v50 = vld [vmem:[#allocation67_spill] sm:$0xff] }
  0x78   : > { %6205 = vmatmul.mubr.f32.gmra.mrb[12].mxu0 %v8183_v61 }
  0x79   : > { %6885 = vmatpush3.bf16.msra.mxu0 %v6882_v7  ;;  %6207 = vmatprep.mubr.f32.mxu0 %v8196_v41  ;;  %v9165_v7 = vld [vmem:[#allocation60_spill] sm:$0xff] }
  0x7a   : > { %6887 = vmatprep.subr.bf16.mxu0 %v6886_v34 }
  0x7c   : > { %6208 = vmatmul.mubr.f32.gmra.mrb[14].mxu0 %v8198_v33 }
  0x7d   : > { %6889 = vmatpush3.bf16.msra.mxu0 %v6886_v34  ;;  %6242 = vmatprep.mubr.f32.mxu0 %v7781_v29  ;;  %v9168_v34 = vld [vmem:[#allocation15_spill] sm:$0xff] }
  0x7e   : > { %6891 = vmatprep.subr.bf16.mxu0 %v6890_v16 }
  0x80   : > { %6243 = vmatmul.mubr.f32.vlgmr.msra.gmra.mrb[0].mxu0 %v7798_v35 }
  0x81   : > { %6893 = vmatpush3.bf16.msra.mxu0 %v6890_v16  ;;  %6245 = vmatprep.mubr.f32.mxu0 %v7808_v40  ;;  %v9169_v16 = vld [vmem:[#allocation17_spill] sm:$0xff] }
  0x82   : > { %6895 = vmatprep.subr.bf16.mxu0 %v6894_v20 }
  0x84   : > { %6246 = vmatmul.mubr.f32.gmra.mrb[2].mxu0 %v7814_v43 }
  0x85   : > { %6897 = vmatpush3.bf16.msra.mxu0 %v6894_v20  ;;  %6248 = vmatprep.mubr.f32.mxu0 %v7890_v24  ;;  %v9170_v20 = vld [vmem:[#allocation18_spill] sm:$0xff] }
  0x86   : > { %6899 = vmatprep.subr.bf16.mxu0 %v6898_v59 }
  0x88   : > { %6249 = vmatmul.mubr.f32.gmra.mrb[4].mxu0 %v7901_v62 }
  0x89   : > { %6901 = vmatpush3.bf16.msra.mxu0 %v6898_v59  ;;  %6251 = vmatprep.mubr.f32.mxu0 %v7925_v6  ;;  %v9171_v59 = vld [vmem:[#allocation26_spill] sm:$0xff] }
  0x8a   : > { %6903 = vmatprep.subr.bf16.mxu0 %v6902_v36 }
  0x8c   : > { %6252 = vmatmul.mubr.f32.gmra.mrb[6].mxu0 %v7934_v0 }
  0x8d   : > { %6905 = vmatpush3.bf16.msra.mxu0 %v6902_v36  ;;  %6254 = vmatprep.mubr.f32.mxu0 %v7999_v55  ;;  %v9172_v36 = vld [vmem:[#allocation68_spill] sm:$0xff] }
  0x8e   : > { %6907 = vmatprep.subr.bf16.mxu0 %v6906_v39 }
  0x90   : > { %6255 = vmatmul.mubr.f32.gmra.mrb[8].mxu0 %v8001_v4 }
  0x91   : > { %6909 = vmatpush3.bf16.msra.mxu0 %v6906_v39  ;;  %6257 = vmatprep.mubr.f32.mxu0 %v8029_v57  ;;  %v9173_v39 = vld [vmem:[#allocation28_spill] sm:$0xff] }
  0x92   : > { %6911 = vmatprep.subr.bf16.mxu0 %v6910_v42 }
  0x94   : > { %6258 = vmatmul.mubr.f32.gmra.mrb[10].mxu0 %v8031_v17 }
  0x95   : > { %6913 = vmatpush3.bf16.msra.mxu0 %v6910_v42  ;;  %6260 = vmatprep.mubr.f32.mxu0 %v8098_v21  ;;  %v9174_v42 = vld [vmem:[#allocation31_spill] sm:$0xff] }
  0x96   : > { %6915 = vmatprep.subr.bf16.mxu0 %v6914_v44 }
  0x98   : > { %6261 = vmatmul.mubr.f32.gmra.mrb[12].mxu0 %v8105_v49 }
  0x99   : > { %6917 = vmatpush3.bf16.msra.mxu0 %v6914_v44  ;;  %6263 = vmatprep.mubr.f32.mxu0 %v8135_v5  ;;  %v9175_v44 = vld [vmem:[#allocation33_spill] sm:$0xff] }
  0x9a   : > { %6919 = vmatprep.subr.bf16.mxu0 %v6918_v52 }
  0x9c   : > { %6264 = vmatmul.mubr.f32.gmra.mrb[14].mxu0 %v8146_v11 }
  0x9d   : > { %6921 = vmatpush3.bf16.msra.mxu0 %v6918_v52  ;;  %6298 = vmatprep.mubr.f32.mxu0 %v7804_v38  ;;  %v9176_v52 = vld [vmem:[#allocation42_spill] sm:$0xff] }
  0x9e   : > { %6923 = vmatprep.subr.bf16.mxu0 %v7742_v15 }
  0xa0   : > { %6299 = vmatmul.mubr.f32.vlgmr.msra.gmra.mrb[0].mxu0 %v9145_v54 }
  0xa1   : > { %6925 = vmatpush3.bf16.msra.mxu0 %v7742_v15  ;;  %6301 = vmatprep.mubr.f32.mxu0 %v9146_v9 }
  0xa2   : > { %6927 = vmatprep.subr.bf16.mxu0 %v9147_v56 }
  0xa4   : > { %6302 = vmatmul.mubr.f32.gmra.mrb[2].mxu0 %v9148_v8 }
  0xa5   : > { %6929 = vmatpush3.bf16.msra.mxu0 %v9147_v56  ;;  %6304 = vmatprep.mubr.f32.mxu0 %v9149_v25 }
  0xa6   : > { %6931 = vmatprep.subr.bf16.mxu0 %v9150_v48 }
  0xa8   : > { %6305 = vmatmul.mubr.f32.gmra.mrb[4].mxu0 %v9151_v63 }
  0xa9   : > { %6933 = vmatpush3.bf16.msra.mxu0 %v9150_v48  ;;  %6307 = vmatprep.mubr.f32.mxu0 %v9152_v45 }
  0xaa   : > { %6935 = vmatprep.subr.bf16.mxu0 %v9153_v28 }
  0xac   : > { %6308 = vmatmul.mubr.f32.gmra.mrb[6].mxu0 %v9154_v1 }
  0xad   : > { %6937 = vmatpush3.bf16.msra.mxu0 %v9153_v28  ;;  %6310 = vmatprep.mubr.f32.mxu0 %v9155_v30 }
  0xae   : > { %6939 = vmatprep.subr.bf16.mxu0 %v9156_v27 }
  0xb0   : > { %6311 = vmatmul.mubr.f32.gmra.mrb[8].mxu0 %v9157_v18 }
  0xb1   : > { %6941 = vmatpush3.bf16.msra.mxu0 %v9156_v27  ;;  %6313 = vmatprep.mubr.f32.mxu0 %v9158_v46 }
  0xb2   : > { %6943 = vmatprep.subr.bf16.mxu0 %v9159_v10 }
  0xb4   : > { %6314 = vmatmul.mubr.f32.gmra.mrb[10].mxu0 %v9160_v2 }
  0xb5   : > { %6945 = vmatpush3.bf16.msra.mxu0 %v9159_v10  ;;  %6316 = vmatprep.mubr.f32.mxu0 %v9161_v12 }
  0xb6   : > { %6947 = vmatprep.subr.bf16.mxu0 %v9162_v26 }
  0xb8   : > { %6317 = vmatmul.mubr.f32.gmra.mrb[12].mxu0 %v8128_v3 }
  0xb9   : > { %6949 = vmatpush3.bf16.msra.mxu0 %v9162_v26  ;;  %6319 = vmatprep.mubr.f32.mxu0 %v9163_v37  ;;  %v9182_v37 = vld [vmem:[#allocation61_spill] sm:$0xff] }
  0xba   : > { %6951 = vmatprep.subr.bf16.mxu0 %v9164_v51 }
  0xbc   : > { %6320 = vmatmul.mubr.f32.gmra.mrb[14].mxu0 %v9165_v7  ;;  %v9180_v7 = vld [vmem:[#allocation56_spill] sm:$0xff] }
  0xbd   : > { %6953 = vmatpush3.bf16.msra.mxu0 %v9164_v51  ;;  %6354 = vmatprep.mubr.f32.mxu0 %v9166_v23 }
  0xbe   : > { %6955 = vmatprep.subr.bf16.mxu0 %v9167_v50 }
  0xc0   : > { %6355 = vmatmul.mubr.f32.vlgmr.msra.gmra.mrb[0].mxu0 %v9168_v34 }
  0xc1   : > { %6957 = vmatpush3.bf16.msra.mxu0 %v9167_v50  ;;  %6357 = vmatprep.mubr.f32.mxu0 %v9169_v16  ;;  %v9178_v50 = vld [vmem:[#allocation46_spill] sm:$0xff] }
  0xc2   : > { %6959 = vmatprep.subr.bf16.mxu0 %v8215_v31 }
  0xc4   : > { %6358 = vmatmul.mubr.f32.gmra.mrb[2].mxu0 %v9170_v20 }
  0xc5   : > { %6961 = vmatpush3.bf16.msra.mxu0 %v8215_v31  ;;  %6360 = vmatprep.mubr.f32.mxu0 %v9171_v59  ;;  %v9177_v31 = vld [vmem:[#allocation43_spill] sm:$0xff] }
  0xc6   : > { %6963 = vmatprep.subr.bf16.mxu0 %v9172_v36 }
  0xc8   : > { %6361 = vmatmul.mubr.f32.gmra.mrb[4].mxu0 %v9173_v39 }
  0xc9   : > { %6965 = vmatpush3.bf16.msra.mxu0 %v9172_v36  ;;  %6363 = vmatprep.mubr.f32.mxu0 %v9174_v42  ;;  %v9179_v36 = vld [vmem:[#allocation47_spill] sm:$0xff] }
  0xca   : > { %6967 = vmatprep.subr.bf16.mxu0 %v8228_v47 }
  0xcc   : > { %6364 = vmatmul.mubr.f32.gmra.mrb[6].mxu0 %v9175_v44 }
  0xcd   : > { %6969 = vmatpush3.bf16.msra.mxu0 %v8228_v47  ;;  %6366 = vmatprep.mubr.f32.mxu0 %v9176_v52  ;;  %v9181_v47 = vld [vmem:[#allocation58_spill] sm:$0xff] }
  0xce   : > { %6971 = vmatprep.subr.bf16.mxu0 %v8234_v53 }
  0xd0   : > { %6367 = vmatmul.mubr.f32.gmra.mrb[8].mxu0 %v9177_v31 }
  0xd1   : > { %6973 = vmatpush3.bf16.msra.mxu0 %v8234_v53  ;;  %6369 = vmatprep.mubr.f32.mxu0 %v9178_v50  ;;  %v9183_v53 = vld [vmem:[#allocation62_spill] sm:$0xff] }
  0xd2   : > { %6975 = vmatprep.subr.bf16.mxu0 %v8241_v22 }
  0xd4   : > { %6370 = vmatmul.mubr.f32.gmra.mrb[10].mxu0 %v9179_v36 }
  0xd5   : > { %6977 = vmatpush3.bf16.msra.mxu0 %v8241_v22  ;;  %6372 = vmatprep.mubr.f32.mxu0 %v9180_v7 }
  0xd6   : > { %6979 = vmatprep.subr.bf16.mxu0 %v8243_v19 }
  0xd8   : > { %6373 = vmatmul.mubr.f32.gmra.mrb[12].mxu0 %v9181_v47 }
  0xd9   : > { %6981 = vmatpush3.bf16.msra.mxu0 %v8243_v19  ;;  %6375 = vmatprep.mubr.f32.mxu0 %v9182_v37 }
  0xda   : > { %6983 = vmatprep.subr.bf16.mxu0 %v8245_v58 }
  0xdc   : > { %6376 = vmatmul.mubr.f32.gmra.mrb[14].mxu0 %v9183_v53 }
  0xdd   : > { %6985 = vmatpush3.bf16.msra.mxu0 %v8245_v58  ;;  %6410 = vmatprep.mubr.f32.mxu0 %v7781_v29 }
  0xde   : > { %6987 = vmatprep.subr.bf16.mxu0 %v7742_v15 }
  0xe0   : > { %6411 = vmatmul.mubr.f32.vlgmr.msra.gmra.mrb[0].mxu0 %v7798_v35 }
  0xe1   : > { %6989 = vmatpush3.bf16.msra.mxu0 %v7742_v15  ;;  %6413 = vmatprep.mubr.f32.mxu0 %v7808_v40  ;;  %v8401_v15 = vld [vmem:[%s8935_s2] ss:$0 sm:$0xff] }
  0xe2   : > { %6991 = vmatprep.subr.bf16.mxu0 %v9147_v56 }
  0xe4   : > { %6414 = vmatmul.mubr.f32.gmra.mrb[2].mxu0 %v7814_v43 }
  0xe5   : > { %6993 = vmatpush3.bf16.msra.mxu0 %v9147_v56  ;;  %6416 = vmatprep.mubr.f32.mxu0 %v7890_v24 }
  0xe6   : > { %6995 = vmatprep.subr.bf16.mxu0 %v9150_v48 }
  0xe8   : > { %6417 = vmatmul.mubr.f32.gmra.mrb[4].mxu0 %v7901_v62 }
  0xe9   : > { %6997 = vmatpush3.bf16.msra.mxu0 %v9150_v48  ;;  %6419 = vmatprep.mubr.f32.mxu0 %v7925_v6 }
  0xea   : > { %6999 = vmatprep.subr.bf16.mxu0 %v9153_v28 }
  0xec   : > { %6420 = vmatmul.mubr.f32.gmra.mrb[6].mxu0 %v7934_v0 }
  0xed   : > { %7001 = vmatpush3.bf16.msra.mxu0 %v9153_v28  ;;  %6422 = vmatprep.mubr.f32.mxu0 %v7999_v55 }
  0xee   : > { %7003 = vmatprep.subr.bf16.mxu0 %v9156_v27 }
  0xf0   : > { %6423 = vmatmul.mubr.f32.gmra.mrb[8].mxu0 %v8001_v4 }
  0xf1   : > { %7005 = vmatpush3.bf16.msra.mxu0 %v9156_v27  ;;  %6425 = vmatprep.mubr.f32.mxu0 %v8029_v57 }
  0xf2   : > { %7007 = vmatprep.subr.bf16.mxu0 %v9159_v10 }
  0xf4   : > { %6426 = vmatmul.mubr.f32.gmra.mrb[10].mxu0 %v8031_v17 }
  0xf5   : > { %7009 = vmatpush3.bf16.msra.mxu0 %v9159_v10  ;;  %6428 = vmatprep.mubr.f32.mxu0 %v8098_v21 }
  0xf6   : > { %7011 = vmatprep.subr.bf16.mxu0 %v9162_v26 }
  0xf8   : > { %6429 = vmatmul.mubr.f32.gmra.mrb[12].mxu0 %v8105_v49 }
  0xf9   : > { %7013 = vmatpush3.bf16.msra.mxu0 %v9162_v26  ;;  %6431 = vmatprep.mubr.f32.mxu0 %v8135_v5 }
  0xfa   : > { %7015 = vmatprep.subr.bf16.mxu0 %v9164_v51 }
  0xfc   : > { %6432 = vmatmul.mubr.f32.gmra.mrb[14].mxu0 %v8146_v11 }
  0xfd   : > { %7017 = vmatpush3.bf16.msra.mxu0 %v9164_v51  ;;  %6466 = vmatprep.mubr.f32.mxu0 %v7781_v29 }
 0x100   : > { %6467 = vmatmul.mubr.f32.vlgmr.msra.gmra.mrb[0].mxu0 %v7798_v35 }
 0x101   : > { %6469 = vmatprep.mubr.f32.mxu0 %v7808_v40 }
 0x104   : > { %6470 = vmatmul.mubr.f32.gmra.mrb[2].mxu0 %v7814_v43 }
 0x105   : > { %6472 = vmatprep.mubr.f32.mxu0 %v7890_v24 }
 0x108   : > { %6473 = vmatmul.mubr.f32.gmra.mrb[4].mxu0 %v7901_v62 }
 0x109   : > { %6475 = vmatprep.mubr.f32.mxu0 %v7925_v6 }
 0x10c   : > { %6476 = vmatmul.mubr.f32.gmra.mrb[6].mxu0 %v7934_v0 }
 0x10d   : > { %6478 = vmatprep.mubr.f32.mxu0 %v7999_v55 }
 0x110   : > { %6479 = vmatmul.mubr.f32.gmra.mrb[8].mxu0 %v8001_v4 }
 0x111   : > { %6481 = vmatprep.mubr.f32.mxu0 %v8029_v57 }
 0x114   : > { %6482 = vmatmul.mubr.f32.gmra.mrb[10].mxu0 %v8031_v17 }
 0x115   : > { %6484 = vmatprep.mubr.f32.mxu0 %v8098_v21 }
 0x118   : > { %6485 = vmatmul.mubr.f32.gmra.mrb[12].mxu0 %v8105_v49 }
 0x119   : > { %6487 = vmatprep.mubr.f32.mxu0 %v8135_v5 }
 0x11c   : > { %6488 = vmatmul.mubr.f32.gmra.mrb[14].mxu0 %v8146_v11 }
 0x1d3   : > { %v6468_v19 = vpop.f32.mrb[0].mxu0 }
 0x1d4   : > { %v7162_v58 = vadd.f32 %v6468_v19, %v8401_v15  ;;  %v1450_v22 = vpop.f32.mrb[1].mxu0  ;;  %v8412_v19 = vld [vmem:[%s8936_s3] ss:$0 sm:$0xff] }
 0x1d5   : > { %v7163_v56 = vadd.f32 %v8401_v15, %v1450_v22 }
 0x1d6   : > { %7392 = vtanh.f32 %v7162_v58 }
 0x1d7   : > { %7394 = vtanh.f32 %v7163_v56  ;;  %v6471_v48 = vpop.f32.mrb[2].mxu0 }
 0x1d8   : > { %v7164_v28 = vadd.f32 %v6471_v48, %v8401_v15  ;;  %v1462_v27 = vpop.f32.mrb[3].mxu0 }
 0x1d9   : > { %v7165_v10 = vadd.f32 %v8401_v15, %v1462_v27 }
 0x1da   : > { %7396 = vtanh.f32 %v7164_v28 }
 0x1db   : > { %7398 = vtanh.f32 %v7165_v10  ;;  %v6474_v26 = vpop.f32.mrb[4].mxu0 }
 0x1dc   : > { %v7166_v51 = vadd.f32 %v6474_v26, %v8401_v15  ;;  %v1474_v53 = vpop.f32.mrb[5].mxu0 }
 0x1dd   : > { %v7167_v37 = vadd.f32 %v8401_v15, %v1474_v53 }
 0x1de   : > { %7400 = vtanh.f32 %v7166_v51 }
 0x1df   : > { %7402 = vtanh.f32 %v7167_v37  ;;  %v6477_v58 = vpop.f32.mrb[6].mxu0 }
 0x1e0   : > { %v7393_v22 = vpop.eup %7392  ;;  %v7168_v56 = vadd.f32 %v6477_v58, %v8401_v15  ;;  %v1486_v48 = vpop.f32.mrb[7].mxu0 }
 0x1e1   : > { %v7395_v28 = vpop.eup %7394  ;;  %v7169_v27 = vadd.f32 %v8401_v15, %v1486_v48  ;;  %v1567_v10 = vmul.f32 %v7393_v22, %v8412_v19 }
 0x1e2   : > { %7404 = vtanh.f32 %v7168_v56  ;;  %v1566_v51 = vmul.f32 %v7395_v28, %v8412_v19 }
 0x1e3   : > { %7406 = vtanh.f32 %v7169_v27  ;;  %v6480_v53 = vpop.f32.mrb[8].mxu0  ;;  %v1586_v26 = vsel %vm1582_vm0, %v1567_v10, 0.0 }
 0x1e4   : > { %v7397_v41 = vpop.eup %7396  ;;  %v7170_v37 = vadd.f32 %v6480_v53, %v8401_v15  ;;  %1587 = vadd.xlane.f32.xlu0 %v1586_v26  ;;  %v1498_v33 = vpop.f32.mrb[9].mxu0  ;;  %v1583_v48 = vsel %vm1582_vm0, %v1566_v51, 0.0 }
 0x1e5   : > { %v7399_v58 = vpop.eup %7398  ;;  %v7171_v11 = vadd.f32 %v8401_v15, %v1498_v33  ;;  %v1569_v5 = vmul.f32 %v7397_v41, %v8412_v19 }
 0x1e6   : > { %7408 = vtanh.f32 %v7170_v37  ;;  %v1568_v27 = vmul.f32 %v7399_v58, %v8412_v19 }
 0x1e7   : > { %7410 = vtanh.f32 %v7171_v11  ;;  %v6483_v22 = vpop.f32.mrb[10].mxu0  ;;  %v1592_v56 = vsel %vm1582_vm0, %v1569_v5, 0.0 }
 0x1e8   : > { %v7401_v28 = vpop.eup %7400  ;;  %v7172_v10 = vadd.f32 %v6483_v22, %v8401_v15  ;;  %1593 = vadd.xlane.f32.xlu1 %v1592_v56  ;;  %v1510_v53 = vpop.f32.mrb[11].mxu0  ;;  %1584 = vadd.xlane.f32.xlu0 %v1583_v48  ;;  %v1589_v5 = vsel %vm1582_vm0, %v1568_v27, 0.0 }
 0x1e9   : > { %v7403_v26 = vpop.eup %7402  ;;  %v7173_v33 = vadd.f32 %v8401_v15, %v1510_v53  ;;  %v1571_v51 = vmul.f32 %v7401_v28, %v8412_v19 }
 0x1ea   : > { %7412 = vtanh.f32 %v7172_v10  ;;  %v1570_v41 = vmul.f32 %v7403_v26, %v8412_v19 }
 0x1eb   : > { %7414 = vtanh.f32 %v7173_v33  ;;  %v6486_v11 = vpop.f32.mrb[12].mxu0  ;;  %v1598_v27 = vsel %vm1582_vm0, %v1571_v51, 0.0 }
 0x1ec   : > { %v7405_v37 = vpop.eup %7404  ;;  %v7174_v58 = vadd.f32 %v6486_v11, %v8401_v15  ;;  %v1522_v47 = vpop.f32.mrb[13].mxu0  ;;  %1590 = vadd.xlane.f32.xlu1 %v1589_v5  ;;  %v1595_v22 = vsel %vm1582_vm0, %v1570_v41, 0.0 }
 0x1ed   : > { %v7407_v56 = vpop.eup %7406  ;;  %v7175_v48 = vadd.f32 %v8401_v15, %v1522_v47  ;;  %1596 = vadd.xlane.f32.xlu0 %v1595_v22  ;;  %v1573_v28 = vmul.f32 %v7405_v37, %v8412_v19 }
 0x1ee   : > { %7416 = vtanh.f32 %v7174_v58  ;;  %v1572_v10 = vmul.f32 %v7407_v56, %v8412_v19 }
 0x1ef   : > { %7418 = vtanh.f32 %v7175_v48  ;;  %v6489_v53 = vpop.f32.mrb[14].mxu0  ;;  %v1604_v22 = vsel %vm1582_vm0, %v1573_v28, 0.0 }
 0x1f0   : > { %v7409_v26 = vpop.eup %7408  ;;  %v7176_v33 = vadd.f32 %v6489_v53, %v8401_v15  ;;  %v1534_v11 = vpop.f32.mrb[15].mxu0  ;;  %1599 = vadd.xlane.f32.xlu1 %v1598_v27  ;;  %v1601_v41 = vsel %vm1582_vm0, %v1572_v10, 0.0 }
 0x1f1   : > { %v7411_v5 = vpop.eup %7410  ;;  %v7177_v47 = vadd.f32 %v8401_v15, %v1534_v11  ;;  %1602 = vadd.xlane.f32.xlu0 %v1601_v41  ;;  %v1575_v51 = vmul.f32 %v7409_v26, %v8412_v19 }
 0x1f2   : > { %7420 = vtanh.f32 %v7176_v33  ;;  %v1574_v58 = vmul.f32 %v7411_v5, %v8412_v19 }
 0x1f3   : > { %7422 = vtanh.f32 %v7177_v47  ;;  %v1610_v53 = vsel %vm1582_vm0, %v1575_v51, 0.0 }
 0x1f4   : > { %v7413_v37 = vpop.eup %7412  ;;  %1605 = vadd.xlane.f32.xlu1 %v1604_v22  ;;  %v1607_v56 = vsel %vm1582_vm0, %v1574_v58, 0.0 }
 0x1f5   : > { %v7415_v48 = vpop.eup %7414  ;;  %1608 = vadd.xlane.f32.xlu0 %v1607_v56  ;;  %v1577_v15 = vmul.f32 %v7413_v37, %v8412_v19 }
 0x1f6   : > { %v1576_v10 = vmul.f32 %v7415_v48, %v8412_v19 }
 0x1f7   : > { %v1616_v26 = vsel %vm1582_vm0, %v1577_v15, 0.0 }
 0x1f8   : > { %v7417_v27 = vpop.eup %7416  ;;  %1611 = vadd.xlane.f32.xlu1 %v1610_v53  ;;  %v1613_v33 = vsel %vm1582_vm0, %v1576_v10, 0.0 }
 0x1f9   : > { %v7419_v11 = vpop.eup %7418  ;;  %1614 = vadd.xlane.f32.xlu0 %v1613_v33  ;;  %v1579_v41 = vmul.f32 %v7417_v27, %v8412_v19 }
 0x1fa   : > { %v1578_v28 = vmul.f32 %v7419_v11, %v8412_v19  ;;  %v1647_v11 = vlaneseq }
 0x1fb   : > { %v1622_v51 = vsel %vm1582_vm0, %v1579_v41, 0.0 }
 0x1fc   : > { %v7421_v5 = vpop.eup %7420  ;;  %1617 = vadd.xlane.f32.xlu1 %v1616_v26  ;;  %v1619_v47 = vsel %vm1582_vm0, %v1578_v28, 0.0  ;;  %v1648_v26 = vand.u32 127, %v1647_v11 }
 0x1fd   : > { %v7423_v58 = vpop.eup %7422  ;;  %1620 = vadd.xlane.f32.xlu0 %v1619_v47  ;;  %v1581_v37 = vmul.f32 %v7421_v5, %v8412_v19  ;;  %v8474_v47 = vshrl.u32 %v1647_v11, 7 }
 0x1fe   : > { %v1580_v22 = vmul.f32 %v7423_v58, %v8412_v19  ;;  %v1653_v58 = vadd.s32 4294967288, %v1648_v26 }
 0x1ff   : > { %v1628_v48 = vsel %vm1582_vm0, %v1581_v37, 0.0 }
 0x200   : > { %1623 = vadd.xlane.f32.xlu1 %v1622_v51  ;;  %v1625_v56 = vsel %vm1582_vm0, %v1580_v22, 0.0  ;;  %v8479_v51 = vsub.s32 %v1648_v26, %v8474_v47 }
 0x201   : > { %1626 = vadd.xlane.f32.xlu0 %v1625_v56  ;;  %v8484_v56 = vsub.s32 %v1653_v58, %v8474_v47 }
 0x204   : > { %1629 = vadd.xlane.f32.xlu1 %v1628_v48 }
 0x271   : > { %v8456_v10 = vpop.xlane.xlu0 %1587 }
 0x272   : > { %v1657_v49 = vrot.slane %v8456_v10, %v8484_v56 }
 0x275   : > { %v8458_v53 = vpop.xlane.xlu1 %1593  ;;  %v8460_v15 = vpop.xlane.xlu0 %1584 }
 0x276   : > { %v1667_v11 = vrot.slane %v8458_v53, %v8484_v56  ;;  %v1652_v26 = vrot.slane %v8460_v15, %v8479_v51 }
 0x278   : > { %v1659_v14 = vsel %vm1658_vm1, %v1657_v49, %v1652_v26 }
 0x279   : > { %v8462_v27 = vpop.xlane.xlu1 %1590 }
 0x27a   : > { %v8464_v33 = vpop.xlane.xlu0 %1596  ;;  %v1663_v48 = vrot.slane %v8462_v27, %v8479_v51 }
 0x27b   : > { %v1672_v58 = vrot.slane %v8464_v33, %v8479_v51 }
 0x27c   : > { %v1668_v21 = vsel %vm1658_vm1, %v1667_v11, %v1663_v48 }
 0x27d   : > { %v8466_v28 = vpop.xlane.xlu1 %1599  ;;  %v1724_v57 = vsel %vm1723_vm2, %v1668_v21, %v1659_v14 }
 0x27e   : > { %v8468_v19 = vpop.xlane.xlu0 %1602  ;;  %v1676_v7 = vrot.slane %v8466_v28, %v8484_v56 }
 0x27f   : > { %v1681_v36 = vrot.slane %v8468_v19, %v8479_v51 }
 0x280   : > { %v1677_v2 = vsel %vm1658_vm1, %v1676_v7, %v1672_v58 }
 0x281   : > { %v8470_v41 = vpop.xlane.xlu1 %1605  ;;  %v1726_v49 = vsel %vm1725_vm3, %v1677_v2, %v1724_v57 }
 0x282   : > { %v8472_v5 = vpop.xlane.xlu0 %1608  ;;  %v1685_v12 = vrot.slane %v8470_v41, %v8484_v56 }
 0x283   : > { %v1690_v46 = vrot.slane %v8472_v5, %v8479_v51 }
 0x284   : > { %v1686_v17 = vsel %vm1658_vm1, %v1685_v12, %v1681_v36 }
 0x285   : > { %v8476_v22 = vpop.xlane.xlu1 %1611  ;;  %v1728_v36 = vsel %vm1727_vm4, %v1686_v17, %v1726_v49 }
 0x286   : > { %v8481_v37 = vpop.xlane.xlu0 %1614  ;;  %v1694_v61 = vrot.slane %v8476_v22, %v8484_v56 }
 0x287   : > { %v1699_v48 = vrot.slane %v8481_v37, %v8479_v51 }
 0x288   : > { %v1695_v7 = vsel %vm1658_vm1, %v1694_v61, %v1690_v46 }
 0x289   : > { %v8490_v3 = vpop.xlane.xlu1 %1617  ;;  %v1730_v61 = vsel %vm1729_vm5, %v1695_v7, %v1728_v36  ;;  %v1749_v7 = vsub.s32 1, %v8474_v47  ;;  %v1765_v36 = vsub.s32 5, %v8474_v47 }
 0x28a   : > { %v8498_v60 = vpop.xlane.xlu0 %1620  ;;  %v1703_v50 = vrot.slane %v8490_v3, %v8484_v56 }
 0x28b   : > { %v1708_v58 = vrot.slane %v8498_v60, %v8479_v51 }
 0x28c   : > { %v1704_v12 = vsel %vm1658_vm1, %v1703_v50, %v1699_v48  ;;  %v7559_v48 = vmov 0  }
 0x28d   : > { %v8514_v32 = vpop.xlane.xlu1 %1623  ;;  %v1732_v57 = vsel %vm1731_vm6, %v1704_v12, %v1730_v61  ;;  %7391 = vset.pattern.permute.xlu0 %v7559_v48  ;;  %7390 = vset.pattern.permute.xlu1 %v7559_v48 }
 0x28e   : > { %v1712_v11 = vrot.slane %v8514_v32, %v8484_v56  ;;  %v8526_v31 = vpop.xlane.xlu0 %1626 }
 0x28f   : > { %v1717_v21 = vrot.slane %v8526_v31, %v8479_v51 }
 0x290   : > { %v1713_v52 = vsel %vm1658_vm1, %v1712_v11, %v1708_v58  ;;  %v1745_v11 = vsub.s32 0, %v8474_v47 }
 0x291   : > { %v8531_v26 = vpop.xlane.xlu1 %1629  ;;  %v1734_v17 = vsel %vm1733_vm7, %v1713_v52, %v1732_v57  ;;  %v1769_v57 = vsub.s32 6, %v8474_v47 }
 0x292   : > { %v1721_v14 = vrot.slane %v8531_v26, %v8484_v56 }
 0x294   : > { %v1722_v46 = vsel %vm1658_vm1, %v1721_v14, %v1717_v21  ;;  %v1753_v14 = vsub.s32 2, %v8474_v47 }
 0x295   : > { %v1736_v2 = vsel %vm1735_vm8, %v1722_v46, %v1734_v17 }
 0x296   : > { %v1739_v50 = vsel %vm1738_vm9, %v1736_v2, -inf }
 0x297   : > { %1740 = vmax.xlane.f32.xlu0 %v1739_v50 }
 0x324   : > { %v1741_v58 = vpop.xlane.xlu0 %1740 }
 0x325   : > { %v1746_v49 = vrot.slane %v1741_v58, %v1745_v11  ;;  %v1750_v12 = vrot.slane %v1741_v58, %v1749_v7  ;;  %v8552_v46 = vrot.slane %v1741_v58, %v1765_v36  ;;  %v1754_v50 = vrot.slane %v1741_v58, %v1753_v14 }
 0x326   : > { %v8556_v7 = vrot.slane %v1741_v58, %v1769_v57 }
 0x327   : > { %v1783_v21 = vsub.f32 %v8460_v15, %v1746_v49  ;;  %v1784_v52 = vsub.f32 %v8456_v10, %v1746_v49  ;;  %v1785_v61 = vsub.f32 %v8462_v27, %v1750_v12  ;;  %v1786_v48 = vsub.f32 %v8458_v53, %v1750_v12 }
 0x328   : > { %v1773_v15 = vsub.s32 7, %v8474_v47  ;;  %v1793_v10 = vsub.f32 %v8481_v37, %v8552_v46  ;;  %v1757_v27 = vsub.s32 3, %v8474_v47  ;;  %v1787_v49 = vsub.f32 %v8464_v33, %v1754_v50 }
 0x329   : > { %v1799_v17 = vmul.f32 1.442695, %v1783_v21  ;;  %v1801_v2 = vmul.f32 1.442695, %v1784_v52  ;;  %v1803_v11 = vmul.f32 1.442695, %v1785_v61  ;;  %v1795_v53 = vsub.f32 %v8498_v60, %v8556_v7 }
 0x32a   : > { %v1805_v36 = vmul.f32 1.442695, %v1786_v48  ;;  %v8562_v21 = vrot.slane %v1741_v58, %v1773_v15  ;;  %v1819_v12 = vmul.f32 1.442695, %v1793_v10  ;;  %v1758_v52 = vrot.slane %v1741_v58, %v1757_v27 }
 0x32b   : > { %7424 = vpow2.f32 %v1799_v17  ;;  %v1788_v14 = vsub.f32 %v8466_v28, %v1754_v50  ;;  %v1807_v61 = vmul.f32 1.442695, %v1787_v49  ;;  %v1823_v17 = vmul.f32 1.442695, %v1795_v53 }
 0x32c   : > { %7426 = vpow2.f32 %v1801_v2  ;;  %v1797_v37 = vsub.f32 %v8526_v31, %v8562_v21  ;;  %v1761_v2 = vsub.s32 4, %v8474_v47  ;;  %v1789_v48 = vsub.f32 %v8468_v19, %v1758_v52 }
 0x32d   : > { %7428 = vpow2.f32 %v1803_v11  ;;  %v1809_v60 = vmul.f32 1.442695, %v1788_v14  ;;  %v1790_v15 = vsub.f32 %v8470_v41, %v1758_v52  ;;  %v8576_v41 = vpack.c.bf16 %v7798_v35, %v7781_v29 }
 0x32e   : > { %7430 = vpow2.f32 %v1805_v36  ;;  %v1827_v28 = vmul.f32 1.442695, %v1797_v37  ;;  %v1762_v50 = vrot.slane %v1741_v58, %v1761_v2  ;;  %v1811_v31 = vmul.f32 1.442695, %v1789_v48 }
 0x32f   : > { %7432 = vpow2.f32 %v1819_v12  ;;  %v1813_v19 = vmul.f32 1.442695, %v1790_v15  ;;  %v7560_v52 = vmov 0.0|0.0   ;;  %v1794_v14 = vsub.f32 %v8490_v3, %v8552_v46 }
 0x330   : > { %7434 = vpow2.f32 %v1807_v61  ;;  %v1791_v47 = vsub.f32 %v8472_v5, %v1762_v50  ;;  %v1792_v53 = vsub.f32 %v8476_v22, %v1762_v50  ;;  %7018 = vmatprep.subr.bf16.mxu1 %v7560_v52  ;;  %v7562_v29 = vmov 0.0  }
 0x331   : > { %7436 = vpow2.f32 %v1823_v17  ;;  %7020 = vmatpush3.bf16.msra.mxu1 %v8576_v41  ;;  %6494 = vmatprep.mubr.msk.f32.mxu1 %vm7561_vm10, %v7562_v29  ;;  %v1796_v35 = vsub.f32 %v8514_v32, %v8556_v7  ;;  %v1798_v3 = vsub.f32 %v8531_v26, %v8562_v21 }
 0x332   : > { %7438 = vpow2.f32 %v1809_v60  ;;  %v1815_v58 = vmul.f32 1.442695, %v1791_v47  ;;  %v1817_v22 = vmul.f32 1.442695, %v1792_v53  ;;  %7021 = vmatprep.subr.bf16.mxu1 %v7560_v52 }
 0x333   : > { %7440 = vpow2.f32 %v1827_v28  ;;  %v1825_v46 = vmul.f32 1.442695, %v1796_v35 }
 0x334   : > { %7442 = vpow2.f32 %v1811_v31 }
 0x335   : > { %v7425_v57 = vpop.eup %7424  ;;  %7444 = vpow2.f32 %v1813_v19 }
 0x336   : > { %v7427_v33 = vpop.eup %7426  ;;  %1848 = vperm.xlu1 %7390, %v7425_v57   ;;  %7446 = vpow2.f32 %v1815_v58  ;;  %v1821_v57 = vmul.f32 1.442695, %v1794_v14  ;;  %v9184_v58 = vld [vmem:[#allocation21_spill] sm:$0xff] }
 0x337   : > { %1851 = vperm.xlu0 %7391, %v7427_v33   ;;  %v7429_v11 = vpop.eup %7428  ;;  %7448 = vpow2.f32 %v1817_v22  ;;  %v1829_v33 = vmul.f32 1.442695, %v1798_v3  ;;  %v7025_v22 = vpack.c.bf16 %v9145_v54, %v7804_v38 }
 0x338   : > { %v7431_v10 = vpop.eup %7430  ;;  %7450 = vpow2.f32 %v1821_v57 }
 0x339   : > { %v7433_v27 = vpop.eup %7432  ;;  %7452 = vpow2.f32 %v1825_v46 }
 0x33a   : > { %1854 = vperm.xlu1 %7390, %v7429_v11   ;;  %v7435_v49 = vpop.eup %7434  ;;  %7454 = vpow2.f32 %v1829_v33 }
 0x33b   : > { %1878 = vperm.xlu0 %7391, %v7433_v27   ;;  %v7437_v36 = vpop.eup %7436 }
 0x33c   : > { %v7439_v12 = vpop.eup %7438 }
 0x33d   : > { %v7441_v5 = vpop.eup %7440 }
 0x33e   : > { %1857 = vperm.xlu1 %7390, %v7431_v10   ;;  %v7443_v61 = vpop.eup %7442 }
 0x33f   : > { %1884 = vperm.xlu0 %7391, %v7437_v36   ;;  %v7445_v37 = vpop.eup %7444 }
 0x340   : > { %v7447_v17 = vpop.eup %7446 }
 0x341   : > { %v7449_v2 = vpop.eup %7448 }
 0x342   : > { %1860 = vperm.xlu1 %7390, %v7435_v49   ;;  %v7451_v48 = vpop.eup %7450 }
 0x343   : > { %1890 = vperm.xlu0 %7391, %v7441_v5   ;;  %v7453_v60 = vpop.eup %7452 }
 0x344   : > { %v7455_v32 = vpop.eup %7454 }
 0x346   : > { %1863 = vperm.xlu1 %7390, %v7439_v12   ;;  %v9185_v12 = vld [vmem:[#allocation20_spill] sm:$0xff] }
 0x347   : > { %v9186_v5 = vpack.c.bf16 %v9184_v58, %v9185_v12 }
 0x34a   : > { %1866 = vperm.xlu1 %7390, %v7443_v61  }
 0x34e   : > { %1869 = vperm.xlu1 %7390, %v7445_v37  }
 0x352   : > { %1872 = vperm.xlu1 %7390, %v7447_v17  }
 0x356   : > { %1875 = vperm.xlu1 %7390, %v7449_v2  }
 0x35a   : > { %1881 = vperm.xlu1 %7390, %v7451_v48   ;;  %v7031_v48 = vpack.c.bf16 %v9168_v34, %v9166_v23 }
 0x35e   : > { %1887 = vperm.xlu1 %7390, %v7453_v60  }
 0x362   : > { %1893 = vperm.xlu1 %7390, %v7455_v32  }
 0x3b5   : > { %v1849_v7 = vpop.permute.xlu1 %1848 }
 0x3b6   : > { %v1852_v11 = vpop.permute.xlu0 %1851  ;;  %v1898_v28 = vrot.slane %v1849_v7, %v8479_v51 }
 0x3b7   : > { %v1902_v26 = vrot.slane %v1852_v11, %v8484_v56 }
 0x3b9   : > { %v1903_v21 = vsel %vm1658_vm1, %v1902_v26, %v1898_v28  ;;  %v1855_v50 = vpop.permute.xlu1 %1854 }
 0x3ba   : > { %v1978_v15 = vsel %vm1738_vm9, %v1903_v21, 0  ;;  %v1879_v57 = vpop.permute.xlu0 %1878  ;;  %v1907_v38 = vrot.slane %v1855_v50, %v8479_v51 }
 0x3bb   : > { %v8593_v31 = vand.u32 4294901760, %v1978_v15 }
 0x3bd   : > { %v2048_v10 = vsub.f32 %v1978_v15, %v8593_v31  ;;  %v1858_v27 = vpop.permute.xlu1 %1857 }
 0x3be   : > { %v1911_v37 = vrot.slane %v1858_v27, %v8484_v56  ;;  %v1885_v54 = vpop.permute.xlu0 %1884 }
 0x3bf   : > { %v2049_v47 = vand.u32 4294901760, %v2048_v10  ;;  %v1952_v27 = vrot.slane %v1885_v54, %v8479_v51  ;;  %v7037_v54 = vpack.c.bf16 %v7814_v43, %v7808_v40  ;;  %v7043_v40 = vpack.c.bf16 %v9148_v8, %v9146_v9 }
 0x3c0   : > { %v1912_v46 = vsel %vm1658_vm1, %v1911_v37, %v1907_v38  ;;  %v7049_v43 = vpack.c.bf16 %v9170_v20, %v9169_v16  ;;  %v7055_v16 = vpack.c.bf16 %v7901_v62, %v7890_v24  ;;  %v7061_v24 = vpack.c.bf16 %v9151_v63, %v9149_v25 }
 0x3c1   : > { %v1861_v19 = vpop.permute.xlu1 %1860  ;;  %v2050_v49 = vsub.f32 %v2048_v10, %v2049_v47  ;;  %v2439_v7 = vsel %vm1738_vm9, %v1912_v46, 0  ;;  %v7067_v62 = vpack.c.bf16 %v9173_v39, %v9171_v59  ;;  %v7073_v39 = vpack.c.bf16 %v7934_v0, %v7925_v6 }
 0x3c2   : > { %v1916_v60 = vrot.slane %v1861_v19, %v8479_v51  ;;  %v1967_v19 = vsel %vm1723_vm2, %v1912_v46, %v1903_v21  ;;  %v7079_v6 = vpack.c.bf16 %v9154_v1, %v9152_v45  ;;  %v7085_v0 = vpack.c.bf16 %v9175_v44, %v9174_v42 }
 0x3c3   : > { %v2051_v36 = vand.u32 4294901760, %v2050_v49  ;;  %v2508_v49 = vand.u32 4294901760, %v2439_v7  ;;  %v7091_v44 = vpack.c.bf16 %v8001_v4, %v7999_v55  ;;  %v7097_v55 = vpack.c.bf16 %v9157_v18, %v9155_v30  ;;  %v9198_v4 = vld [vmem:[#allocation42_spill] sm:$0xff] }
 0x3c5   : > { %6495 = vmatmul.mubr.f32.vlgmr.msra.gmra.mrb[0].mxu1 %v2051_v36  ;;  %v1864_v53 = vpop.permute.xlu1 %1863  ;;  %v1891_v36 = vpop.permute.xlu0 %1890 }
 0x3c6   : > { %7023 = vmatpush3.bf16.msra.mxu1 %v9186_v5  ;;  %6501 = vmatprep.mubr.msk.f32.mxu1 %vm7561_vm10, %v7562_v29  ;;  %v1920_v17 = vrot.slane %v1864_v53, %v8484_v56  ;;  %v1961_v21 = vrot.slane %v1891_v36, %v8479_v51 }
 0x3c7   : > { %7024 = vmatprep.subr.bf16.mxu1 %v7560_v52 }
 0x3c8   : > { %v1921_v26 = vsel %vm1658_vm1, %v1920_v17, %v1916_v60  ;;  %v9187_v17 = vld [vmem:[#allocation23_spill] sm:$0xff] }
 0x3c9   : > { %v1867_v14 = vpop.permute.xlu1 %1866  ;;  %v1968_v53 = vsel %vm1725_vm3, %v1921_v26, %v1967_v19 }
 0x3ca   : > { %v1925_v11 = vrot.slane %v1867_v14, %v8479_v51 }
 0x3cd   : > { %6502 = vmatmul.mubr.f32.vlgmr.msra.gmra.mrb[0].mxu1 %v8593_v31  ;;  %v1870_v61 = vpop.permute.xlu1 %1869 }
 0x3ce   : > { %7026 = vmatpush3.bf16.msra.mxu1 %v7025_v22  ;;  %6508 = vmatprep.mubr.msk.f32.mxu1 %vm7561_vm10, %v7562_v29  ;;  %v1929_v2 = vrot.slane %v1870_v61, %v8484_v56 }
 0x3cf   : > { %7027 = vmatprep.subr.bf16.mxu1 %v7560_v52 }
 0x3d0   : > { %v8628_v23 = vsel %vm1658_vm1, %v1929_v2, %v1925_v11 }
 0x3d1   : > { %v1873_v35 = vpop.permute.xlu1 %1872  ;;  %v1969_v12 = vsel %vm1727_vm4, %v8628_v23, %v1968_v53  ;;  %v3361_v25 = vsel %vm1738_vm9, %v8628_v23, 0 }
 0x3d2   : > { %v1934_v50 = vrot.slane %v1873_v35, %v8479_v51  ;;  %v2509_v35 = vsub.f32 %v2439_v7, %v2508_v49  ;;  %v9191_v7 = vld [vmem:[#allocation34_spill] sm:$0xff]  ;;  %v3430_v63 = vand.u32 4294901760, %v3361_v25 }
 0x3d5   : > { %6509 = vmatmul.mubr.f32.vlgmr.msra.gmra.mrb[0].mxu1 %v2048_v10  ;;  %v1876_v3 = vpop.permute.xlu1 %1875  ;;  %v1943_v10 = vrot.slane %v1879_v57, %v8479_v51 }
 0x3d6   : > { %7029 = vmatpush3.bf16.msra.mxu1 %v8576_v41  ;;  %6515 = vmatprep.mubr.msk.f32.mxu1 %vm7561_vm10, %v7562_v29  ;;  %v1938_v32 = vrot.slane %v1876_v3, %v8484_v56 }
 0x3d7   : > { %7030 = vmatprep.subr.bf16.mxu1 %v7560_v52 }
 0x3d9   : > { %v1882_v33 = vpop.permute.xlu1 %1881 }
 0x3da   : > { %v1947_v28 = vrot.slane %v1882_v33, %v8484_v56  ;;  %v9188_v33 = vld [vmem:[#allocation22_spill] sm:$0xff] }
 0x3db   : > { %v9189_v2 = vpack.c.bf16 %v9187_v17, %v9188_v33 }
 0x3dc   : > { %v8641_v58 = vsel %vm1658_vm1, %v1947_v28, %v1943_v10  ;;  %v3431_v28 = vsub.f32 %v3361_v25, %v3430_v63  ;;  %v9194_v10 = vld [vmem:[#allocation36_spill] sm:$0xff] }
 0x3dd   : > { %6516 = vmatmul.mubr.f32.vlgmr.msra.gmra.mrb[0].mxu1 %v2049_v47  ;;  %v1888_v15 = vpop.permute.xlu1 %1887  ;;  %v8636_v47 = vsel %vm1658_vm1, %v1938_v32, %v1934_v50  ;;  %v9190_v32 = vld [vmem:[#allocation35_spill] sm:$0xff]  ;;  %v4283_v30 = vsel %vm1738_vm9, %v8641_v58, 0  ;;  %v9216_v25 = vld [vmem:[#allocation56_spill] sm:$0xff] }
 0x3de   : > { %7032 = vmatpush3.bf16.msra.mxu1 %v7031_v48  ;;  %v1956_v34 = vrot.slane %v1888_v15, %v8484_v56  ;;  %6522 = vmatprep.mubr.msk.f32.mxu1 %vm7561_vm10, %v7562_v29  ;;  %v1970_v22 = vsel %vm1729_vm5, %v8636_v47, %v1969_v12  ;;  %v9192_v11 = vpack.c.bf16 %v9190_v32, %v9191_v7  ;;  %v3432_v59 = vand.u32 4294901760, %v3431_v28  ;;  %v9193_v15 = vld [vmem:[#allocation37_spill] sm:$0xff] }
 0x3df   : > { %7033 = vmatprep.subr.bf16.mxu1 %v7560_v52  ;;  %v1971_v57 = vsel %vm1731_vm6, %v8641_v58, %v1970_v22  ;;  %v9195_v23 = vpack.c.bf16 %v9193_v15, %v9194_v10  ;;  %v3822_v45 = vsel %vm1738_vm9, %v8636_v47, 0  ;;  %v4352_v18 = vand.u32 4294901760, %v4283_v30  ;;  %v9214_v7 = vld [vmem:[#allocation53_spill] sm:$0xff] }
 0x3e0   : > { %v8646_v5 = vsel %vm1658_vm1, %v1956_v34, %v1952_v27  ;;  %v3891_v1 = vand.u32 4294901760, %v3822_v45 }
 0x3e1   : > { %v1894_v14 = vpop.permute.xlu1 %1893  ;;  %v1972_v3 = vsel %vm1733_vm7, %v8646_v5, %v1971_v57  ;;  %v4353_v53 = vsub.f32 %v4283_v30, %v4352_v18  ;;  %v9203_v57 = vld [vmem:[#allocation50_spill] sm:$0xff]  ;;  %v4744_v17 = vsel %vm1738_vm9, %v8646_v5, 0  ;;  %v9209_v5 = vld [vmem:[#allocation49_spill] sm:$0xff] }
 0x3e2   : > { %v1965_v61 = vrot.slane %v1894_v14, %v8484_v56  ;;  %v2510_v56 = vand.u32 4294901760, %v2509_v35  ;;  %v3892_v34 = vsub.f32 %v3822_v45, %v3891_v1  ;;  %v9200_v14 = vld [vmem:[#allocation40_spill] sm:$0xff]  ;;  %v4813_v33 = vand.u32 4294901760, %v4744_v17  ;;  %v9225_v30 = vld [vmem:[#allocation61_spill] sm:$0xff] }
 0x3e3   : > { %v4354_v12 = vand.u32 4294901760, %v4353_v53 }
 0x3e4   : > { %v8655_v37 = vsel %vm1658_vm1, %v1965_v61, %v1961_v21  ;;  %v2511_v46 = vsub.f32 %v2509_v35, %v2510_v56  ;;  %v3893_v42 = vand.u32 4294901760, %v3892_v34  ;;  %v9201_v21 = vld [vmem:[#allocation41_spill] sm:$0xff] }
 0x3e5   : > { %6523 = vmatmul.mubr.f32.vlgmr.msra.gmra.mrb[0].mxu1 %v8593_v31  ;;  %v1973_v51 = vsel %vm1735_vm8, %v8655_v37, %v1972_v3  ;;  %v7109_v58 = vpack.c.bf16 %v9201_v21, %v9200_v14  ;;  %v4355_v22 = vsub.f32 %v4353_v53, %v4354_v12 }
 0x3e6   : > { %7035 = vmatpush3.bf16.msra.mxu1 %v8576_v41  ;;  %v1975_v38 = vsel %vm1738_vm9, %v1973_v51, 0.0  ;;  %6529 = vmatprep.mubr.msk.f32.mxu1 %vm7561_vm10, %v7562_v29  ;;  %v2512_v41 = vand.u32 4294901760, %v2511_v46  ;;  %v3894_v27 = vsub.f32 %v3892_v34, %v3893_v42  ;;  %v9205_v51 = vld [vmem:[#allocation44_spill] sm:$0xff]  ;;  %v9208_v46 = vld [vmem:[#allocation47_spill] sm:$0xff] }
 0x3e7   : > { %1976 = vadd.xlane.f32.xlu0 %v1975_v38  ;;  %7036 = vmatprep.subr.bf16.mxu1 %v7560_v52  ;;  %v4356_v61 = vand.u32 4294901760, %v4355_v22  ;;  %v9206_v38 = vld [vmem:[#allocation45_spill] sm:$0xff] }
 0x3e8   : > { %v3895_v19 = vand.u32 4294901760, %v3894_v27 }
 0x3ed   : > { %6530 = vmatmul.mubr.f32.vlgmr.msra.gmra.mrb[0].mxu1 %v8593_v31  ;;  %v2900_v31 = vsel %vm1738_vm9, %v1921_v26, 0  ;;  %v3433_v26 = vsub.f32 %v3431_v28, %v3432_v59 }
 0x3ee   : > { %7038 = vmatpush3.bf16.msra.mxu1 %v7037_v54  ;;  %6536 = vmatprep.mubr.msk.f32.mxu1 %vm7561_vm10, %v7562_v29  ;;  %v2969_v9 = vand.u32 4294901760, %v2900_v31 }
 0x3ef   : > { %7039 = vmatprep.subr.bf16.mxu1 %v7560_v52  ;;  %v3434_v50 = vand.u32 4294901760, %v3433_v26 }
 0x3f0   : > { %v2970_v8 = vsub.f32 %v2900_v31, %v2969_v9 }
 0x3f1   : > { %6537 = vmatmul.mubr.f32.vlgmr.msra.gmra.mrb[2].mxu1 %v2512_v41 }
 0x3f2   : > { %7041 = vmatpush3.bf16.msra.mxu1 %v9189_v2  ;;  %6543 = vmatprep.mubr.msk.f32.mxu1 %vm7561_vm10, %v7562_v29  ;;  %v2971_v48 = vand.u32 4294901760, %v2970_v8  ;;  %v4814_v2 = vsub.f32 %v4744_v17, %v4813_v33 }
 0x3f3   : > { %7042 = vmatprep.subr.bf16.mxu1 %v7560_v52 }
 0x3f4   : > { %v2972_v20 = vsub.f32 %v2970_v8, %v2971_v48  ;;  %v4815_v31 = vand.u32 4294901760, %v4814_v2 }
 0x3f6   : > { %v2973_v60 = vand.u32 4294901760, %v2972_v20  ;;  %v9211_v20 = vld [vmem:[#allocation64_spill] sm:$0xff] }
 0x3f9   : > { %6544 = vmatmul.mubr.f32.vlgmr.msra.gmra.mrb[2].mxu1 %v2508_v49 }
 0x3fa   : > { %7044 = vmatpush3.bf16.msra.mxu1 %v7043_v40  ;;  %6550 = vmatprep.mubr.msk.f32.mxu1 %vm7561_vm10, %v7562_v29 }
 0x3fb   : > { %7045 = vmatprep.subr.bf16.mxu1 %v7560_v52 }
 0x401   : > { %6551 = vmatmul.mubr.f32.vlgmr.msra.gmra.mrb[2].mxu1 %v2509_v35  ;;  %v9202_v35 = vld [vmem:[#allocation51_spill] sm:$0xff] }
 0x402   : > { %7047 = vmatpush3.bf16.msra.mxu1 %v7037_v54  ;;  %6557 = vmatprep.mubr.msk.f32.mxu1 %vm7561_vm10, %v7562_v29  ;;  %v9204_v3 = vpack.c.bf16 %v9202_v35, %v9203_v57 }
 0x403   : > { %7048 = vmatprep.subr.bf16.mxu1 %v7560_v52 }
 0x409   : > { %6558 = vmatmul.mubr.f32.vlgmr.msra.gmra.mrb[2].mxu1 %v2510_v56  ;;  %v7115_v56 = vpack.c.bf16 %v9206_v38, %v9205_v51 }
 0x40a   : > { %7050 = vmatpush3.bf16.msra.mxu1 %v7049_v43  ;;  %6564 = vmatprep.mubr.msk.f32.mxu1 %vm7561_vm10, %v7562_v29 }
 0x40b   : > { %7051 = vmatprep.subr.bf16.mxu1 %v7560_v52 }
 0x411   : > { %6565 = vmatmul.mubr.f32.vlgmr.msra.gmra.mrb[2].mxu1 %v2508_v49 }
 0x412   : > { %7053 = vmatpush3.bf16.msra.mxu1 %v7037_v54  ;;  %6571 = vmatprep.mubr.msk.f32.mxu1 %vm7561_vm10, %v7562_v29  ;;  %v9207_v54 = vld [vmem:[#allocation46_spill] sm:$0xff] }
 0x413   : > { %7054 = vmatprep.subr.bf16.mxu1 %v7560_v52  ;;  %v7121_v41 = vpack.c.bf16 %v9208_v46, %v9207_v54 }
 0x419   : > { %6572 = vmatmul.mubr.f32.vlgmr.msra.gmra.mrb[2].mxu1 %v2508_v49  ;;  %v9196_v49 = vld [vmem:[#allocation48_spill] sm:$0xff] }
 0x41a   : > { %7056 = vmatpush3.bf16.msra.mxu1 %v7055_v16  ;;  %6578 = vmatprep.mubr.msk.f32.mxu1 %vm7561_vm10, %v7562_v29  ;;  %v9197_v36 = vpack.c.bf16 %v8083_v13, %v9196_v49  ;;  %v9199_v13 = vld [vmem:[#allocation43_spill] sm:$0xff]  ;;  %v9220_v49 = vld [vmem:[#allocation66_spill] sm:$0xff] }
 0x41b   : > { %7057 = vmatprep.subr.bf16.mxu1 %v7560_v52  ;;  %v7103_v47 = vpack.c.bf16 %v9199_v13, %v9198_v4  ;;  %v9223_v4 = vld [vmem:[#allocation59_spill] sm:$0xff]  ;;  %v9224_v13 = vld [vmem:[#allocation60_spill] sm:$0xff] }
 0x41d   : > { %6579 = vmatmul.mubr.f32.vlgmr.msra.gmra.mrb[4].mxu1 %v2973_v60  ;;  %v9212_v60 = vld [vmem:[#allocation63_spill] sm:$0xff] }
 0x41e   : > { %7059 = vmatpush3.bf16.msra.mxu1 %v9192_v11  ;;  %6585 = vmatprep.mubr.msk.f32.mxu1 %vm7561_vm10, %v7562_v29  ;;  %v9213_v32 = vpack.c.bf16 %v9211_v20, %v9212_v60  ;;  %v9215_v11 = vld [vmem:[#allocation54_spill] sm:$0xff] }
 0x41f   : > { %7060 = vmatprep.subr.bf16.mxu1 %v7560_v52 }
 0x425   : > { %6586 = vmatmul.mubr.f32.vlgmr.msra.gmra.mrb[4].mxu1 %v2969_v9 }
 0x426   : > { %7062 = vmatpush3.bf16.msra.mxu1 %v7061_v24  ;;  %6592 = vmatprep.mubr.msk.f32.mxu1 %vm7561_vm10, %v7562_v29  ;;  %v7133_v24 = vpack.c.bf16 %v9215_v11, %v9214_v7 }
 0x427   : > { %7063 = vmatprep.subr.bf16.mxu1 %v7560_v52 }
 0x42d   : > { %6593 = vmatmul.mubr.f32.vlgmr.msra.gmra.mrb[4].mxu1 %v2970_v8 }
 0x42e   : > { %7065 = vmatpush3.bf16.msra.mxu1 %v7055_v16  ;;  %6599 = vmatprep.mubr.msk.f32.mxu1 %vm7561_vm10, %v7562_v29 }
 0x42f   : > { %7066 = vmatprep.subr.bf16.mxu1 %v7560_v52 }
 0x435   : > { %6600 = vmatmul.mubr.f32.vlgmr.msra.gmra.mrb[4].mxu1 %v2971_v48  ;;  %v4816_v48 = vsub.f32 %v4814_v2, %v4815_v31 }
 0x436   : > { %7068 = vmatpush3.bf16.msra.mxu1 %v7067_v62  ;;  %6606 = vmatprep.mubr.msk.f32.mxu1 %vm7561_vm10, %v7562_v29 }
 0x437   : > { %7069 = vmatprep.subr.bf16.mxu1 %v7560_v52 }
 0x43d   : > { %6607 = vmatmul.mubr.f32.vlgmr.msra.gmra.mrb[4].mxu1 %v2969_v9 }
 0x43e   : > { %7071 = vmatpush3.bf16.msra.mxu1 %v7055_v16  ;;  %6613 = vmatprep.mubr.msk.f32.mxu1 %vm7561_vm10, %v7562_v29  ;;  %v4817_v16 = vand.u32 4294901760, %v4816_v48 }
 0x43f   : > { %7072 = vmatprep.subr.bf16.mxu1 %v7560_v52 }
 0x445   : > { %6614 = vmatmul.mubr.f32.vlgmr.msra.gmra.mrb[4].mxu1 %v2969_v9  ;;  %v9210_v9 = vld [vmem:[#allocation52_spill] sm:$0xff] }
 0x446   : > { %7074 = vmatpush3.bf16.msra.mxu1 %v7073_v39  ;;  %6620 = vmatprep.mubr.msk.f32.mxu1 %vm7561_vm10, %v7562_v29  ;;  %v7127_v8 = vpack.c.bf16 %v9210_v9, %v9209_v5 }
 0x447   : > { %7075 = vmatprep.subr.bf16.mxu1 %v7560_v52 }
 0x449   : > { %6621 = vmatmul.mubr.f32.vlgmr.msra.gmra.mrb[6].mxu1 %v3434_v50 }
 0x44a   : > { %7077 = vmatpush3.bf16.msra.mxu1 %v9195_v23  ;;  %6627 = vmatprep.mubr.msk.f32.mxu1 %vm7561_vm10, %v7562_v29 }
 0x44b   : > { %7078 = vmatprep.subr.bf16.mxu1 %v7560_v52 }
 0x451   : > { %6628 = vmatmul.mubr.f32.vlgmr.msra.gmra.mrb[6].mxu1 %v3430_v63 }
 0x452   : > { %7080 = vmatpush3.bf16.msra.mxu1 %v7079_v6  ;;  %6634 = vmatprep.mubr.msk.f32.mxu1 %vm7561_vm10, %v7562_v29 }
 0x453   : > { %7081 = vmatprep.subr.bf16.mxu1 %v7560_v52 }
 0x459   : > { %6635 = vmatmul.mubr.f32.vlgmr.msra.gmra.mrb[6].mxu1 %v3431_v28 }
 0x45a   : > { %7083 = vmatpush3.bf16.msra.mxu1 %v7073_v39  ;;  %6641 = vmatprep.mubr.msk.f32.mxu1 %vm7561_vm10, %v7562_v29 }
 0x45b   : > { %7084 = vmatprep.subr.bf16.mxu1 %v7560_v52 }
 0x461   : > { %6642 = vmatmul.mubr.f32.vlgmr.msra.gmra.mrb[6].mxu1 %v3432_v59  ;;  %v5205_v59 = vsel %vm1738_vm9, %v8655_v37, 0 }
 0x462   : > { %7086 = vmatpush3.bf16.msra.mxu1 %v7085_v0  ;;  %6648 = vmatprep.mubr.msk.f32.mxu1 %vm7561_vm10, %v7562_v29 }
 0x463   : > { %7087 = vmatprep.subr.bf16.mxu1 %v7560_v52 }
 0x469   : > { %6649 = vmatmul.mubr.f32.vlgmr.msra.gmra.mrb[6].mxu1 %v3430_v63 }
 0x46a   : > { %7089 = vmatpush3.bf16.msra.mxu1 %v7073_v39  ;;  %6655 = vmatprep.mubr.msk.f32.mxu1 %vm7561_vm10, %v7562_v29  ;;  %v5274_v39 = vand.u32 4294901760, %v5205_v59 }
 0x46b   : > { %7090 = vmatprep.subr.bf16.mxu1 %v7560_v52 }
 0x46c   : > { %v5275_v50 = vsub.f32 %v5205_v59, %v5274_v39 }
 0x46e   : > { %v5276_v45 = vand.u32 4294901760, %v5275_v50 }
 0x470   : > { %v5277_v27 = vsub.f32 %v5275_v50, %v5276_v45 }
 0x471   : > { %6656 = vmatmul.mubr.f32.vlgmr.msra.gmra.mrb[6].mxu1 %v3430_v63  ;;  %v9217_v63 = vld [vmem:[#allocation58_spill] sm:$0xff] }
 0x472   : > { %7092 = vmatpush3.bf16.msra.mxu1 %v7091_v44  ;;  %6662 = vmatprep.mubr.msk.f32.mxu1 %vm7561_vm10, %v7562_v29  ;;  %v7139_v28 = vpack.c.bf16 %v9217_v63, %v9216_v25 }
 0x473   : > { %7093 = vmatprep.subr.bf16.mxu1 %v7560_v52 }
 0x474   : > { %v1977_v62 = vpop.xlane.xlu0 %1976 }
 0x475   : > { %6663 = vmatmul.mubr.f32.vlgmr.msra.gmra.mrb[8].mxu1 %v3895_v19  ;;  %7456 = vrcp.f32 %v1977_v62  ;;  %v5278_v19 = vand.u32 4294901760, %v5277_v27 }
 0x476   : > { %7095 = vmatpush3.bf16.msra.mxu1 %v9197_v36  ;;  %6669 = vmatprep.mubr.msk.f32.mxu1 %vm7561_vm10, %v7562_v29  ;;  %v9221_v36 = vld [vmem:[#allocation65_spill] sm:$0xff] }
 0x477   : > { %7096 = vmatprep.subr.bf16.mxu1 %v7560_v52 }
 0x47d   : > { %6670 = vmatmul.mubr.f32.vlgmr.msra.gmra.mrb[8].mxu1 %v3891_v1 }
 0x47e   : > { %7098 = vmatpush3.bf16.msra.mxu1 %v7097_v55  ;;  %6676 = vmatprep.mubr.msk.f32.mxu1 %vm7561_vm10, %v7562_v29  ;;  %v9222_v55 = vpack.c.bf16 %v9220_v49, %v9221_v36 }
 0x47f   : > { %7099 = vmatprep.subr.bf16.mxu1 %v7560_v52  ;;  %v8838_v26 = vpop.eup %7456 }
 0x480   : > { %v5669_v15 = vrot.slane %v8838_v26, 1  ;;  %v5671_v35 = vrot.slane %v8838_v26, 3  ;;  %v5674_v9 = vrot.slane %v8838_v26, 6 }
 0x485   : > { %6677 = vmatmul.mubr.f32.vlgmr.msra.gmra.mrb[8].mxu1 %v3892_v34  ;;  %v9218_v34 = vld [vmem:[#allocation55_spill] sm:$0xff] }
 0x486   : > { %7101 = vmatpush3.bf16.msra.mxu1 %v7091_v44  ;;  %6683 = vmatprep.mubr.msk.f32.mxu1 %vm7561_vm10, %v7562_v29 }
 0x487   : > { %7102 = vmatprep.subr.bf16.mxu1 %v7560_v52 }
 0x48d   : > { %6684 = vmatmul.mubr.f32.vlgmr.msra.gmra.mrb[8].mxu1 %v3893_v42  ;;  %v9219_v42 = vld [vmem:[#allocation57_spill] sm:$0xff] }
 0x48e   : > { %7104 = vmatpush3.bf16.msra.mxu1 %v7103_v47  ;;  %6690 = vmatprep.mubr.msk.f32.mxu1 %vm7561_vm10, %v7562_v29  ;;  %v7151_v47 = vpack.c.bf16 %v9224_v13, %v9223_v4 }
 0x48f   : > { %7105 = vmatprep.subr.bf16.mxu1 %v7560_v52 }
 0x495   : > { %6691 = vmatmul.mubr.f32.vlgmr.msra.gmra.mrb[8].mxu1 %v3891_v1 }
 0x496   : > { %7107 = vmatpush3.bf16.msra.mxu1 %v7091_v44  ;;  %6697 = vmatprep.mubr.msk.f32.mxu1 %vm7561_vm10, %v7562_v29  ;;  %v7145_v44 = vpack.c.bf16 %v9219_v42, %v9218_v34 }
 0x497   : > { %7108 = vmatprep.subr.bf16.mxu1 %v7560_v52 }
 0x49d   : > { %6698 = vmatmul.mubr.f32.vlgmr.msra.gmra.mrb[8].mxu1 %v3891_v1 }
 0x49e   : > { %7110 = vmatpush3.bf16.msra.mxu1 %v7109_v58  ;;  %6704 = vmatprep.mubr.msk.f32.mxu1 %vm7561_vm10, %v7562_v29 }
 0x49f   : > { %7111 = vmatprep.subr.bf16.mxu1 %v7560_v52 }
 0x4a1   : > { %6705 = vmatmul.mubr.f32.vlgmr.msra.gmra.mrb[10].mxu1 %v4356_v61 }
 0x4a2   : > { %7113 = vmatpush3.bf16.msra.mxu1 %v9204_v3  ;;  %6711 = vmatprep.mubr.msk.f32.mxu1 %vm7561_vm10, %v7562_v29 }
 0x4a3   : > { %7114 = vmatprep.subr.bf16.mxu1 %v7560_v52 }
 0x4a9   : > { %6712 = vmatmul.mubr.f32.vlgmr.msra.gmra.mrb[10].mxu1 %v4352_v18 }
 0x4aa   : > { %7116 = vmatpush3.bf16.msra.mxu1 %v7115_v56  ;;  %6718 = vmatprep.mubr.msk.f32.mxu1 %vm7561_vm10, %v7562_v29  ;;  %v5672_v56 = vrot.slane %v8838_v26, 4 }
 0x4ab   : > { %7117 = vmatprep.subr.bf16.mxu1 %v7560_v52 }
 0x4b1   : > { %6719 = vmatmul.mubr.f32.vlgmr.msra.gmra.mrb[10].mxu1 %v4353_v53 }
 0x4b2   : > { %7119 = vmatpush3.bf16.msra.mxu1 %v7109_v58  ;;  %6725 = vmatprep.mubr.msk.f32.mxu1 %vm7561_vm10, %v7562_v29 }
 0x4b3   : > { %7120 = vmatprep.subr.bf16.mxu1 %v7560_v52 }
 0x4b9   : > { %6726 = vmatmul.mubr.f32.vlgmr.msra.gmra.mrb[10].mxu1 %v4354_v12  ;;  %v5670_v12 = vrot.slane %v8838_v26, 2 }
 0x4ba   : > { %7122 = vmatpush3.bf16.msra.mxu1 %v7121_v41  ;;  %6732 = vmatprep.mubr.msk.f32.mxu1 %vm7561_vm10, %v7562_v29 }
 0x4bb   : > { %7123 = vmatprep.subr.bf16.mxu1 %v7560_v52 }
 0x4c0   : > { %v2435_v40 = vpop.f32.mrb[0].mxu1 }
 0x4c1   : > { %v6531_v43 = vpop.f32.mrb[1].mxu1  ;;  %6733 = vmatmul.mubr.f32.vlgmr.msra.gmra.mrb[10].mxu1 %v4352_v18  ;;  %v5684_v37 = vmul.f32 %v8838_v26, %v2435_v40 }
 0x4c2   : > { %7125 = vmatpush3.bf16.msra.mxu1 %v7109_v58  ;;  %6739 = vmatprep.mubr.msk.f32.mxu1 %vm7561_vm10, %v7562_v29 }
 0x4c3   : > { %7126 = vmatprep.subr.bf16.mxu1 %v7560_v52 }
 0x4c9   : > { %6740 = vmatmul.mubr.f32.vlgmr.msra.gmra.mrb[10].mxu1 %v4352_v18  ;;  %v9226_v18 = vld [vmem:[#allocation62_spill] sm:$0xff] }
 0x4ca   : > { %7128 = vmatpush3.bf16.msra.mxu1 %v7127_v8  ;;  %6746 = vmatprep.mubr.msk.f32.mxu1 %vm7561_vm10, %v7562_v29  ;;  %v7157_v53 = vpack.c.bf16 %v9226_v18, %v9225_v30 }
 0x4cb   : > { %7129 = vmatprep.subr.bf16.mxu1 %v7560_v52 }
 0x4cd   : > { %6747 = vmatmul.mubr.f32.vlgmr.msra.gmra.mrb[12].mxu1 %v4817_v16 }
 0x4ce   : > { %7131 = vmatpush3.bf16.msra.mxu1 %v9213_v32  ;;  %6753 = vmatprep.mubr.msk.f32.mxu1 %vm7561_vm10, %v7562_v29  ;;  %v5675_v32 = vrot.slane %v8838_v26, 7 }
 0x4cf   : > { %7132 = vmatprep.subr.bf16.mxu1 %v7560_v52 }
 0x4d5   : > { %6754 = vmatmul.mubr.f32.vlgmr.msra.gmra.mrb[12].mxu1 %v4813_v33 }
 0x4d6   : > { %7134 = vmatpush3.bf16.msra.mxu1 %v7133_v24  ;;  %6760 = vmatprep.mubr.msk.f32.mxu1 %vm7561_vm10, %v7562_v29 }
 0x4d7   : > { %7135 = vmatprep.subr.bf16.mxu1 %v7560_v52 }
 0x4dd   : > { %6761 = vmatmul.mubr.f32.vlgmr.msra.gmra.mrb[12].mxu1 %v4814_v2 }
 0x4de   : > { %7137 = vmatpush3.bf16.msra.mxu1 %v7127_v8  ;;  %6767 = vmatprep.mubr.msk.f32.mxu1 %vm7561_vm10, %v7562_v29 }
 0x4df   : > { %7138 = vmatprep.subr.bf16.mxu1 %v7560_v52 }
 0x4e5   : > { %6768 = vmatmul.mubr.f32.vlgmr.msra.gmra.mrb[12].mxu1 %v4815_v31 }
 0x4e6   : > { %7140 = vmatpush3.bf16.msra.mxu1 %v7139_v28  ;;  %6774 = vmatprep.mubr.msk.f32.mxu1 %vm7561_vm10, %v7562_v29 }
 0x4e7   : > { %7141 = vmatprep.subr.bf16.mxu1 %v7560_v52 }
 0x4ec   : > { %v2896_v10 = vpop.f32.mrb[2].mxu1 }
 0x4ed   : > { %v5685_v23 = vmul.f32 %v5669_v15, %v2896_v10  ;;  %v6573_v6 = vpop.f32.mrb[3].mxu1  ;;  %6775 = vmatmul.mubr.f32.vlgmr.msra.gmra.mrb[12].mxu1 %v4813_v33 }
 0x4ee   : > { %7143 = vmatpush3.bf16.msra.mxu1 %v7127_v8  ;;  %6781 = vmatprep.mubr.msk.f32.mxu1 %vm7561_vm10, %v7562_v29 }
 0x4ef   : > { %v5700_v0 = vrot.slane %v5685_v23, 7  ;;  %7144 = vmatprep.subr.bf16.mxu1 %v7560_v52 }
 0x4f1   : > { %v5701_v1 = vsel %vm1723_vm2, %v5700_v0, %v5684_v37 }
 0x4f5   : > { %6782 = vmatmul.mubr.f32.vlgmr.msra.gmra.mrb[12].mxu1 %v4813_v33  ;;  %v5673_v33 = vrot.slane %v8838_v26, 5 }
 0x4f6   : > { %7146 = vmatpush3.bf16.msra.mxu1 %v7145_v44  ;;  %6788 = vmatprep.mubr.msk.f32.mxu1 %vm7561_vm10, %v7562_v29 }
 0x4f7   : > { %7147 = vmatprep.subr.bf16.mxu1 %v7560_v52 }
 0x4f9   : > { %6789 = vmatmul.mubr.f32.vlgmr.msra.gmra.mrb[14].mxu1 %v5278_v19 }
 0x4fa   : > { %7149 = vmatpush3.bf16.msra.mxu1 %v9222_v55  ;;  %6795 = vmatprep.mubr.msk.f32.mxu1 %vm7561_vm10, %v7562_v29 }
 0x4fb   : > { %7150 = vmatprep.subr.bf16.mxu1 %v7560_v52 }
 0x501   : > { %6796 = vmatmul.mubr.f32.vlgmr.msra.gmra.mrb[14].mxu1 %v5274_v39 }
 0x502   : > { %7152 = vmatpush3.bf16.msra.mxu1 %v7151_v47  ;;  %6802 = vmatprep.mubr.msk.f32.mxu1 %vm7561_vm10, %v7562_v29 }
 0x503   : > { %7153 = vmatprep.subr.bf16.mxu1 %v7560_v52 }
 0x509   : > { %6803 = vmatmul.mubr.f32.vlgmr.msra.gmra.mrb[14].mxu1 %v5275_v50 }
 0x50a   : > { %7155 = vmatpush3.bf16.msra.mxu1 %v7145_v44  ;;  %6809 = vmatprep.mubr.msk.f32.mxu1 %vm7561_vm10, %v7562_v29 }
 0x50b   : > { %7156 = vmatprep.subr.bf16.mxu1 %v7560_v52 }
 0x511   : > { %6810 = vmatmul.mubr.f32.vlgmr.msra.gmra.mrb[14].mxu1 %v5276_v45 }
 0x512   : > { %7158 = vmatpush3.bf16.msra.mxu1 %v7157_v53  ;;  %6816 = vmatprep.mubr.msk.f32.mxu1 %vm7561_vm10, %v7562_v29 }
 0x513   : > { %7159 = vmatprep.subr.bf16.mxu1 %v7560_v52 }
 0x518   : > { %v3357_v14 = vpop.f32.mrb[4].mxu1 }
 0x519   : > { %v5686_v21 = vmul.f32 %v5670_v12, %v3357_v14  ;;  %v6615_v58 = vpop.f32.mrb[5].mxu1  ;;  %6817 = vmatmul.mubr.f32.vlgmr.msra.gmra.mrb[14].mxu1 %v5274_v39 }
 0x51a   : > { %7161 = vmatpush3.bf16.msra.mxu1 %v7145_v44  ;;  %6823 = vmatprep.mubr.msk.f32.mxu1 %vm7561_vm10, %v7562_v29 }
 0x51b   : > { %v5702_v22 = vrot.slane %v5686_v21, 6 }
 0x51d   : > { %v5703_v61 = vsel %vm1725_vm3, %v5702_v22, %v5701_v1 }
 0x521   : > { %6824 = vmatmul.mubr.f32.vlgmr.msra.gmra.mrb[14].mxu1 %v5274_v39 }
 0x544   : > { %v3818_v57 = vpop.f32.mrb[6].mxu1 }
 0x545   : > { %v5687_v3 = vmul.f32 %v5671_v35, %v3818_v57  ;;  %v6657_v51 = vpop.f32.mrb[7].mxu1 }
 0x547   : > { %v5704_v52 = vrot.slane %v5687_v3, 5 }
 0x549   : > { %v5705_v38 = vsel %vm1727_vm4, %v5704_v52, %v5703_v61 }
 0x570   : > { %v4279_v54 = vpop.f32.mrb[8].mxu1 }
 0x571   : > { %v5688_v46 = vmul.f32 %v5672_v56, %v4279_v54  ;;  %v6699_v41 = vpop.f32.mrb[9].mxu1 }
 0x573   : > { %v5706_v17 = vrot.slane %v5688_v46, 4 }
 0x575   : > { %v5707_v29 = vsel %vm1729_vm5, %v5706_v17, %v5705_v38 }
 0x59c   : > { %v4740_v2 = vpop.f32.mrb[10].mxu1 }
 0x59d   : > { %v5689_v40 = vmul.f32 %v5673_v33, %v4740_v2  ;;  %v6741_v43 = vpop.f32.mrb[11].mxu1 }
 0x59f   : > { %v5708_v31 = vrot.slane %v5689_v40, 3 }
 0x5a1   : > { %v5709_v5 = vsel %vm1731_vm6, %v5708_v31, %v5707_v29 }
 0x5c8   : > { %v5201_v8 = vpop.f32.mrb[12].mxu1 }
 0x5c9   : > { %v5690_v48 = vmul.f32 %v5674_v9, %v5201_v8  ;;  %v6783_v16 = vpop.f32.mrb[13].mxu1 }
 0x5cb   : > { %v5710_v20 = vrot.slane %v5690_v48, 2 }
 0x5cd   : > { %v5711_v60 = vsel %vm1733_vm7, %v5710_v20, %v5709_v5 }
 0x5f4   : > { %v5662_v7 = vpop.f32.mrb[14].mxu1 }
 0x5f5   : > { %v5691_v11 = vmul.f32 %v5675_v32, %v5662_v7  ;;  %v6825_v24 = vpop.f32.mrb[15].mxu1 }
 0x5f7   : > { %v5712_v62 = vrot.slane %v5691_v11, 1 }
 0x5f9   : > { %v5713_v25 = vsel %vm1735_vm8, %v5712_v62, %v5711_v60 }
 0x5fa   : > { %5715 = vst [vmem:[%s216_s30] sm:$0xff] %v5713_v25 }
 0x5fb   : > { %7501 = shalt.err (!%p7498_p2)
}
 0x5fc   : > { %s7502_s13 = scalar_lea.hbm %s8888_s7, 128  ;;  %s7506_s11 = scalar_lea.hbm %s8937_s4, 256 }
 0x5fd   : > { %p7503_p4 = scmp.ne.s32.totalorder %s8888_s7, %s7502_s13  ;;  %p7507_p9 = scmp.lt.u32.totalorder %s8888_s7, %s8937_s4 }
 0x5fe   : > { %p7508_p1 = scmp.lt.u32.totalorder %s7506_s11, %s7502_s13  ;;  %p7510_p6 = scmp.lt.u32.totalorder %s7502_s13, %s8888_s7 }
 0x5ff   : > { %p7504_p5 = pnand %p7503_p4, %p9227_p11 }
 0x600   : > { %p7509_p3 = por %p7508_p1, %p7507_p9 }
 0x601   : > { %p7505_p7 = pneg %p7504_p5 }
 0x602   : > { %p7511_p12 = por %p7510_p6, %p7509_p3 }
 0x604   : > { %p7512_p13 = pnand %p7511_p12, %p7505_p7 }
 0x606   : > { %7515 = shalt.err (!%p7512_p13)
}
 0x607   : > { %7340 = dma.vmem_to_hbm [thread:$0]  (%p9227_p11), %s8890_s26, 128, %s8888_s7, %s5717_s9  }
 0x608 PF: > { %s5742_s25 = sand.u32 1, %s7542_s15   ;;  %p9228_p8 = scmp.ne.s32.totalorder %s9054_s28, 0 }
 0x609   : > { %p9229_p10 = scmp.ge.s32.totalorder %s7554_s18, 2  ;;  %s5743_s29 = scalar_lea.sflag [#allocation4], %s5742_s25 }
 0x60b   : > { %p7347_p0 = pnand %p9229_p10, %p9228_p8 }
 0x60d   : > { %7537 = dma.done.wait (!%p7347_p0), %s5743_s29, 128  }
 0x60e   : > { %7539 = vsyncadd (!%p7347_p0), %s5743_s29, 4294967168  ;;  %p17_p2 = scmp.ge.s32.totalorder %s7614_s21, 4   ;;  %s9230_s15 = smov %s7546_s16 }
 0x60f   : > { %s9231_s16 = smov %s7550_s17  ;;  %s9232_s17 = smov %s7626_s24 }
 0x610   : > { %s9233_s18 = smov %s7614_s21  ;;  %19 = sbr.rel (!%p17_p2) target bundleno = 5 (0x5), region = 81 }
 0x617   :  { %5748 = vsyncpa [#allocation3], 1 }
 0x618   :  { %5750 = vsyncpa [#allocation3 + $0x1], 1 }
 0x619   :  { %5751 = vsyncpa [#allocation4], 1 }
 0x61a   :  { %5753 = vsyncpa [#allocation4 + $0x1], 1 }

// kernel: tpu_custom_call.1
= control target key start
LH: loop header
LB: loop body
LE: loop exit
PB: predicated region body
PF: predicated region fallthrough
CT: control target
= control target key end

     0   :  { %9 = vsyncpa [#allocation3], 0  ;;  %s8933_s0 = inlined_call_operand.hbm [shape: f32[16,16,128], index: 0, kind: input, shape index: {}]   ;;  %s8934_s1 = inlined_call_operand.vmem [shape: f32[128,64], index: 1, kind: input, shape index: {}]   ;;  %s8935_s2 = inlined_call_operand.vmem [shape: f32[1,64], index: 2, kind: input, shape index: {}]   ;;  %s8936_s3 = inlined_call_operand.vmem [shape: f32[1,64], index: 3, kind: input, shape index: {}]   ;;  %s8937_s4 = inlined_call_operand.hbm [shape: f32[16,128], index: 4, kind: output, shape index: {}]  }
   0x1   :  { %11 = vsyncpa [#allocation3 + $0x1], 0 }
   0x2   :  { %12 = vsyncpa [#allocation4], 0 }
   0x3   :  { %14 = vsyncpa [#allocation4 + $0x1], 0  ;;  %s7589_s15 = smov 0   ;;  %s7591_s16 = smov 0  }
   0x4   :  { %s7593_s17 = smov 0   ;;  %s7595_s18 = smov 0  }
   0x5 LB: > { %s7610_s19 = sadd.s32 4294967295, %s7554_s18   ;;  %s5800_s20 = sadd.s32 4294967294, %s7554_s18   ;;  %s7554_s18 = sphi %s7595_s18, %s9233_s18   ;;  %s7550_s17 = sphi %s7593_s17, %s9232_s17   ;;  %s7546_s16 = sphi %s7591_s16, %s9231_s16   ;;  %s7542_s15 = sphi %s7589_s15, %s9230_s15  }
   0x6   : > { %s7614_s21 = sadd.s32 1, %s7554_s18   ;;  %s27_s22 = sadd.s32 1, %s7550_s17 }
   0x7   : > { %s24_s23 = ssub.s32 %s7554_s18, %s7614_s21  ;;  %p34_p0 = scmp.ne.s32.totalorder %s7550_s17, %s7546_s16 }
   0x8   : > { %p25_p1 = scmp.eq.s32.totalorder %s24_s23, 0  ;;  %p35_p2 = scmp.eq.s32.totalorder %s7554_s18, 0 }
   0x9   : > { %p40_p3 = scmp.ne.s32.totalorder %s7546_s16, %s7542_s15  ;;  %p41_p4 = scmp.eq.s32.totalorder %s7610_s19, 0 }
   0xa   : > { %s7626_s24 = scalar_select %p25_p1, %s7550_s17, %s27_s22  }
   0xb   : > { %p7628_p5 = por %p35_p2, %p34_p0  ;;  %p7632_p6 = por %p41_p4, %p40_p3 }
   0xc   : > { %p127_p7 = scmp.eq.s32.totalorder %s7610_s19, 1  ;;  %p133_p8 = scmp.eq.s32.totalorder %s5800_s20, 1 }
   0xd   : > { %p7350_p10 = scmp.lt.s32.totalorder %s7554_s18, 2  ;;  %s162_s29 = sand.u32 1, %s7550_s17  }
   0xe   : > { %p7639_p11 = por %p127_p7, %p34_p0  ;;  %p7643_p12 = por %p133_p8, %p40_p3 }
   0xf   : > { %s5817_s30 = sshll.u32 %s7554_s18, 11  ;;  %s5803_s5 = sshll.u32 %s162_s29, 7 }
  0x10   : > { %s9053_s27 = scalar_select %p7639_p11, 1, 0 }
  0x11   : > { %s9054_s28 = scalar_select %p7643_p12, 1, 0 }
  0x12   : > { %s7652_s8 = scalar_lea.hbm %s8933_s0, %s5817_s30  ;;  %s166_s9 = scalar_lea.vmem [#allocation2], %s5803_s5 }
  0x13   : > { %s174_s10 = sshll.u32 %s166_s9, 4  ;;  %p7656_p13 = pnand %p7350_p10, %p7628_p5  ;;  %s7660_s10 = int_to_ptr.vmem [resolvable:$true] %s174_s10 }
  0x14   : > { %s7662_s12 = scalar_lea.sflag [#allocation3], %s162_s29  ;;  %s7458_s13 = scalar_lea.hbm %s7652_s8, 2048 }
  0x15   : > { %p7459_p0 = scmp.ne.s32.totalorder %s7652_s8, %s7458_s13  ;;  %p7460_p1 = pneg %p7656_p13 }
  0x16   : > { %s7463_s22 = scalar_lea.hbm %s8933_s0, 4096  ;;  %p7464_p4 = scmp.lt.u32.totalorder %s7652_s8, %s8933_s0 }
  0x17   : > { %p7461_p2 = pnand %p7460_p1, %p7459_p0  ;;  %p7465_p5 = scmp.lt.u32.totalorder %s7463_s22, %s7458_s13 }
  0x18   : > { %p7467_p8 = scmp.lt.u32.totalorder %s7458_s13, %s7652_s8 }
  0x19   : > { %p7462_p3 = pneg %p7461_p2  ;;  %p7466_p7 = por %p7465_p5, %p7464_p4 }
  0x1b   : > { %p7468_p10 = por %p7467_p8, %p7466_p7 }
  0x1d   : > { %p7469_p9 = pnand %p7468_p10, %p7462_p3 }
  0x1f   : > { %7472 = shalt.err (!%p7469_p9)
}
  0x20   : > { %s7473_s29 = scalar_lea.vmem %s7660_s10, 2048  ;;  %s7556_s30 = smov [#allocation2]  }
  0x21   : > { %p7474_p0 = scmp.ne.s32.totalorder %s7660_s10, %s7473_s29  ;;  %s7478_s5 = sshll.u32 %s7556_s30, 4  ;;  %s7479_s5 = int_to_ptr.vmem [resolvable:$false] %s7478_s5 }
  0x22   : > { %s7480_s6 = scalar_lea.vmem %s7479_s5, 4096  ;;  %p7481_p11 = scmp.lt.s32.totalorder %s7660_s10, %s7479_s5 }
  0x23   : > { %p7476_p2 = pnand %p7474_p0, %p7460_p1  ;;  %p7482_p4 = scmp.lt.s32.totalorder %s7480_s6, %s7473_s29 }
  0x25   : > { %p7477_p12 = pneg %p7476_p2  ;;  %p7483_p5 = por %p7482_p4, %p7481_p11 }
  0x27   : > { %p7484_p7 = pnand %p7483_p5, %p7477_p12 }
  0x29   : > { %7487 = shalt.err (!%p7484_p7)
}
  0x2a   : > { %s7557_s7 = smov 128   ;;  %s7558_s9 = smov 8  }
  0x2b   : > { %7345 = dma.hbm_to_vmem [thread:$0]  (!%p7656_p13), %s7652_s8, 2048, %s7660_s10, %s7662_s12, %s7557_s7, %s7557_s7, %s7558_s9  }
  0x2c   : > { %p5807_p9 = scmp.ge.s32.totalorder %s7554_s18, 1  ;;  %p182_p1 = scmp.lt.s32.totalorder %s7554_s18, 3 }
  0x2e   : > { %p183_p3 = pnand %p5807_p9, %p182_p1 }
  0x30   : > { %186 = sbr.rel (%p183_p3) target bundleno = 1544 (0x608), region = 36 }
  0x37   : > { %s7693_s13 = sand.u32 1, %s7546_s16  }
  0x38   : > { %s5808_s14 = sshll.u32 %s7693_s13, 7  ;;  %s189_s20 = scalar_lea.sflag [#allocation3], %s7693_s13 }
  0x39   : > { %s7697_s22 = scalar_lea.vmem [#allocation2], %s5808_s14 }
  0x3a   : > { %7533 = dma.done.wait (%p7632_p6), %s189_s20, 2048  }
  0x3b   : > { %7535 = vsyncadd (%p7632_p6), %s189_s20, 4294965248  ;;  %v234_v0 = vld [vmem:[%s8934_s1] sm:$0xff]  ;;  %v235_v1 = vld [vmem:[%s8934_s1 + $0x8] sm:$0xff]  ;;  %vm1582_vm0 = vcmask 523264   ;;  %vm1658_vm1 = vcmask 130112   ;;  %vm1723_vm2 = vcmask 1041409  }
  0x3c   : > { %v236_v2 = vld [vmem:[%s8934_s1 + $0x10] sm:$0xff]  ;;  %v259_v3 = vand.u32 4294901760, %v234_v0  ;;  %v262_v4 = vand.u32 4294901760, %v235_v1  ;;  %v237_v5 = vld [vmem:[%s8934_s1 + $0x18] sm:$0xff]  ;;  %v7718_v7 = vld [vmem:[%s8934_s1 + $0x20] sm:$0xff]  ;;  %vm1725_vm3 = vcmask 1042434  }
  0x3d   : > { %v265_v6 = vand.u32 4294901760, %v236_v2  ;;  %v7723_v8 = vld [vmem:[%s8934_s1 + $0x28] sm:$0xff]  ;;  %v268_v9 = vand.u32 4294901760, %v237_v5  ;;  %v271_v10 = vand.u32 4294901760, %v7718_v7  ;;  %v7730_v12 = vld [vmem:[%s8934_s1 + $0x30] sm:$0xff]  ;;  %v7735_v13 = vld [vmem:[%s8934_s1 + $0x38] sm:$0xff] }
  0x3e   : > { %v274_v11 = vand.u32 4294901760, %v7723_v8  ;;  %v7740_v14 = vld [vmem:[%s8934_s1 + $0x40] sm:$0xff]  ;;  %v7742_v15 = vpack.c.bf16 %v262_v4, %v259_v3  ;;  %v277_v16 = vand.u32 4294901760, %v7730_v12  ;;  %v8946_v17 = vand.u32 4294901760, %v7735_v13  ;;  %v7749_v18 = vld [vmem:[%s8934_s1 + $0x48] sm:$0xff]  ;;  %v7754_v19 = vld [vmem:[%s8934_s1 + $0x50] sm:$0xff] }
  0x3f   : > { %v7756_v20 = vpack.c.bf16 %v268_v9, %v265_v6  ;;  %v7761_v21 = vld [vmem:[%s8934_s1 + $0x58] sm:$0xff]  ;;  %v8945_v22 = vand.u32 4294901760, %v7740_v14  ;;  %v7768_v23 = vld [vmem:[%s8934_s1 + $0x60] sm:$0xff]  ;;  %v219_v25 = vld [vmem:[%s7697_s22 + $0x8] sm:$0xff]  ;;  %v8944_v27 = vand.u32 4294901760, %v7749_v18  ;;  %v8942_v28 = vand.u32 4294901760, %v7754_v19 }
  0x40   : > { %6827 = vmatprep.subr.bf16.mxu0 %v7742_v15  ;;  %v218_v24 = vld [vmem:[%s7697_s22] sm:$0xff]  ;;  %v7777_v26 = vpack.c.bf16 %v274_v11, %v271_v10  ;;  %v220_v30 = vld [vmem:[%s7697_s22 + $0x10] sm:$0xff]  ;;  %v221_v31 = vld [vmem:[%s7697_s22 + $0x18] sm:$0xff]  ;;  %v7790_v32 = vpack.c.bf16 %v8946_v17, %v277_v16  ;;  %v8941_v33 = vand.u32 4294901760, %v7761_v21  ;;  %v7798_v35 = vand.u32 4294901760, %v219_v25  ;;  %s5809_s25 = sshll.u32 %s7693_s13, 3 }
  0x41   : > { %9056 = vst [vmem:[#allocation8_spill] sm:$0xff] %v7756_v20  ;;  %6829 = vmatpush3.bf16.msra.mxu0 %v7742_v15  ;;  %v7781_v29 = vand.u32 4294901760, %v218_v24  ;;  %v7796_v34 = vld [vmem:[%s8934_s1 + $0x68] sm:$0xff]  ;;  %v7800_v36 = vsub.f32 %v234_v0, %v259_v3  ;;  %v8948_v37 = vand.u32 4294901760, %v7768_v23  ;;  %v7806_v39 = vsub.f32 %v235_v1, %v262_v4  ;;  %v7823_v46 = vld [vmem:[%s8934_s1 + $0x70] sm:$0xff]  ;;  %v7828_v47 = vld [vmem:[%s8934_s1 + $0x78] sm:$0xff] }
  0x42   : > { %9057 = vst [vmem:[#allocation9_spill] sm:$0xff] %v7777_v26  ;;  %6831 = vmatprep.subr.bf16.mxu0 %v7756_v20  ;;  %9058 = vst [vmem:[#allocation10_spill] sm:$0xff] %v7790_v32  ;;  %v7808_v40 = vand.u32 4294901760, %v220_v30  ;;  %v7811_v41 = vsub.f32 %v219_v25, %v7798_v35  ;;  %v7814_v43 = vand.u32 4294901760, %v221_v31  ;;  %v7816_v44 = vsub.f32 %v236_v2, %v265_v6  ;;  %v222_v59 = vld [vmem:[%s7697_s22 + $0x20] sm:$0xff]  ;;  %v223_v0 = vld [vmem:[%s7697_s22 + $0x28] sm:$0xff] }
  0x43   : > { %v7804_v38 = vsub.f32 %v218_v24, %v7781_v29  ;;  %v8940_v42 = vand.u32 4294901760, %v7800_v36  ;;  %v8947_v45 = vand.u32 4294901760, %v7796_v34  ;;  %v8939_v49 = vand.u32 4294901760, %v7806_v39  ;;  %v224_v25 = vld [vmem:[%s7697_s22 + $0x30] sm:$0xff]  ;;  %s5813_s29 = sshll.u32 %s7610_s19, 7  ;;  %s216_s30 = scalar_lea.vmem [#allocation5], %s5809_s25 }
  0x44   : > { %9059 = vst [vmem:[#allocation11_spill] sm:$0xff] %v7811_v41  ;;  %v7835_v50 = vsub.f32 %v220_v30, %v7808_v40  ;;  %v7842_v51 = vpack.c.bf16 %v8944_v27, %v8945_v22  ;;  %v7845_v52 = vand.u32 4294901760, %v7811_v41  ;;  %v7848_v53 = vsub.f32 %v221_v31, %v7814_v43  ;;  %v227_v22 = vld [vmem:[%s7697_s22 + $0x48] sm:$0xff]  ;;  %s5730_s26 = sshll.u32 %s216_s30, 4  ;;  %s8888_s7 = scalar_lea.hbm %s8937_s4, %s5813_s29  ;;  %s8890_s26 = int_to_ptr.vmem [resolvable:$true] %s5730_s26 }
  0x45   : > { %6833 = vmatpush3.bf16.msra.mxu0 %v7756_v20  ;;  %v7831_v48 = vand.u32 4294901760, %v7804_v38  ;;  %v7850_v54 = vsub.f32 %v237_v5, %v268_v9  ;;  %v503_v56 = vsub.f32 %v7800_v36, %v8940_v42  ;;  %v8943_v58 = vand.u32 4294901760, %v7816_v44  ;;  %s5717_s9 = scalar_lea.sflag [#allocation4], %s7693_s13  ;;  %s7488_s14 = scalar_lea.vmem %s8890_s26, 128 }
  0x46   : > { %9061 = vst [vmem:[#allocation13_spill] sm:$0xff] %v7835_v50  ;;  %6835 = vmatprep.subr.bf16.mxu0 %v7777_v26  ;;  %9062 = vst [vmem:[#allocation14_spill] sm:$0xff] %v7842_v51  ;;  %v7858_v57 = vand.u32 4294901760, %v7835_v50  ;;  %v8963_v60 = vand.u32 4294901760, %v7823_v46  ;;  %v8962_v61 = vand.u32 4294901760, %v7828_v47  ;;  %v352_v62 = vsub.f32 %v7811_v41, %v7845_v52  ;;  %p7489_p6 = scmp.ne.s32.totalorder %s8890_s26, %s7488_s14  ;;  %p9227_p11 = scmp.ne.s32.totalorder %s9053_s27, 0 }
  0x47   : > { %9060 = vst [vmem:[#allocation12_spill] sm:$0xff] %v7831_v48  ;;  %9063 = vst [vmem:[#allocation15_spill] sm:$0xff] %v7845_v52  ;;  %v342_v55 = vsub.f32 %v7804_v38, %v7831_v48  ;;  %v7867_v63 = vand.u32 4294901760, %v7848_v53  ;;  %v7875_v1 = vpack.c.bf16 %v8941_v33, %v8942_v28  ;;  %v510_v3 = vsub.f32 %v7806_v39, %v8939_v49  ;;  %v225_v49 = vld [vmem:[%s7697_s22 + $0x38] sm:$0xff]  ;;  %s7563_s19 = smov [#allocation5]  }
  0x48   : > { %9064 = vst [vmem:[#allocation16_spill] sm:$0xff] %v7848_v53  ;;  %9065 = vst [vmem:[#allocation17_spill] sm:$0xff] %v7858_v57  ;;  %v362_v4 = vsub.f32 %v7835_v50, %v7858_v57  ;;  %v7885_v5 = vand.u32 4294901760, %v352_v62  ;;  %v8949_v9 = vand.u32 4294901760, %v7850_v54  ;;  %v7890_v24 = vand.u32 4294901760, %v222_v59  ;;  %p7490_p12 = pnand %p7489_p6, %p9227_p11  ;;  %s7492_s20 = sshll.u32 %s7563_s19, 4  ;;  %s7493_s20 = int_to_ptr.vmem [resolvable:$false] %s7492_s20 }
  0x49   : > { %9066 = vst [vmem:[#allocation18_spill] sm:$0xff] %v7867_v63  ;;  %6837 = vmatpush3.bf16.msra.mxu0 %v7777_v26  ;;  %9067 = vst [vmem:[#allocation19_spill] sm:$0xff] %v7875_v1  ;;  %v7877_v2 = vand.u32 4294901760, %v342_v55  ;;  %v372_v6 = vsub.f32 %v7848_v53, %v7867_v63  ;;  %v504_v30 = vand.u32 4294901760, %v503_v56  ;;  %v7899_v55 = vsub.f32 %v7816_v44, %v8943_v58  ;;  %s7494_s8 = scalar_lea.vmem %s7493_s20, 256  ;;  %p7495_p8 = scmp.lt.s32.totalorder %s8890_s26, %s7493_s20 }
  0x4a   : > { %6839 = vmatprep.subr.bf16.mxu0 %v7790_v32  ;;  %9069 = vst [vmem:[#allocation21_spill] sm:$0xff] %v7885_v5  ;;  %v7894_v31 = vand.u32 4294901760, %v362_v4  ;;  %v7901_v62 = vand.u32 4294901760, %v223_v0  ;;  %v7909_v28 = vsub.f32 %v222_v59, %v7890_v24  ;;  %v7914_v56 = vsub.f32 %v7718_v7, %v271_v10  ;;  %p7491_p13 = pneg %p7490_p12  ;;  %p7496_p10 = scmp.lt.s32.totalorder %s7494_s8, %s7488_s14 }
  0x4b   : > { %9068 = vst [vmem:[#allocation20_spill] sm:$0xff] %v7877_v2  ;;  %6186 = vmatprep.mubr.f32.mxu0 %v7877_v2  ;;  %v7906_v33 = vand.u32 4294901760, %v372_v6  ;;  %v511_v4 = vand.u32 4294901760, %v510_v3  ;;  %v7923_v42 = vsub.f32 %v7723_v8, %v274_v11  ;;  %v7925_v6 = vand.u32 4294901760, %v224_v25 }
  0x4c   : > { %9070 = vst [vmem:[#allocation22_spill] sm:$0xff] %v7894_v31  ;;  %9072 = vst [vmem:[#allocation24_spill] sm:$0xff] %v7909_v28  ;;  %v7918_v58 = vsub.f32 %v223_v0, %v7901_v62  ;;  %v7931_v7 = vand.u32 4294901760, %v7909_v28  ;;  %v8951_v10 = vand.u32 4294901760, %v7914_v56  ;;  %v7934_v0 = vand.u32 4294901760, %v225_v49  ;;  %p7497_p0 = por %p7496_p10, %p7495_p8 }
  0x4d   : > { %9071 = vst [vmem:[#allocation23_spill] sm:$0xff] %v7906_v33  ;;  %6841 = vmatpush3.bf16.msra.mxu0 %v7790_v32  ;;  %v7940_v8 = vpack.c.bf16 %v8947_v45, %v8948_v37  ;;  %v7946_v3 = vsub.f32 %v224_v25, %v7925_v6  ;;  %v524_v59 = vsub.f32 %v7850_v54, %v8949_v9  ;;  %v9084_v57 = vand.u32 4294901760, %v7735_v13 }
  0x4e   : > { %9073 = vst [vmem:[#allocation25_spill] sm:$0xff] %v7918_v58  ;;  %6843 = vmatprep.subr.bf16.mxu0 %v7842_v51  ;;  %9074 = vst [vmem:[#allocation26_spill] sm:$0xff] %v7931_v7  ;;  %v7943_v11 = vand.u32 4294901760, %v7918_v58  ;;  %v382_v27 = vsub.f32 %v7909_v28, %v7931_v7  ;;  %v7955_v17 = vsub.f32 %v225_v49, %v7934_v0  ;;  %v226_v49 = vld [vmem:[%s7697_s22 + $0x40] sm:$0xff]  ;;  %v9085_v48 = vand.u32 4294901760, %v7923_v42  ;;  %p7498_p2 = pnand %p7497_p0, %p7491_p13 }
  0x4f   : > { %9075 = vst [vmem:[#allocation27_spill] sm:$0xff] %v7940_v8  ;;  %9077 = vst [vmem:[#allocation29_spill] sm:$0xff] %v7946_v3  ;;  %v531_v25 = vsub.f32 %v7914_v56, %v8951_v10  ;;  %v7964_v37 = vand.u32 4294901760, %v7946_v3  ;;  %v7969_v9 = vsub.f32 %v7730_v12, %v277_v16  ;;  %v7978_v2 = vpack.c.bf16 %v8962_v61, %v8963_v60  ;;  %v229_v60 = vld [vmem:[%s7697_s22 + $0x58] sm:$0xff] }
  0x50   : > { %9076 = vst [vmem:[#allocation28_spill] sm:$0xff] %v7943_v11  ;;  %9078 = vst [vmem:[#allocation30_spill] sm:$0xff] %v7955_v17  ;;  %v392_v45 = vsub.f32 %v7918_v58, %v7943_v11  ;;  %v7980_v10 = vpack.c.bf16 %v511_v4, %v504_v30  ;;  %v518_v11 = vand.u32 4294901760, %v7899_v55  ;;  %v7984_v7 = vand.u32 4294901760, %v7955_v17 }
  0x51   : > { %6845 = vmatpush3.bf16.msra.mxu0 %v7842_v51  ;;  %9079 = vst [vmem:[#allocation31_spill] sm:$0xff] %v7964_v37  ;;  %9080 = vst [vmem:[#allocation32_spill] sm:$0xff] %v7978_v2  ;;  %v7986_v12 = vand.u32 4294901760, %v382_v27  ;;  %v402_v63 = vsub.f32 %v7946_v3, %v7964_v37  ;;  %v7995_v52 = vsub.f32 %v7735_v13, %v9084_v57  ;;  %v525_v61 = vand.u32 4294901760, %v524_v59  ;;  %v228_v27 = vld [vmem:[%s7697_s22 + $0x50] sm:$0xff] }
  0x52   : > { %6847 = vmatprep.subr.bf16.mxu0 %v7875_v1  ;;  %9081 = vst [vmem:[#allocation33_spill] sm:$0xff] %v7984_v7  ;;  %v7988_v16 = vand.u32 4294901760, %v392_v45  ;;  %v412_v30 = vsub.f32 %v7955_v17, %v7984_v7  ;;  %v7999_v55 = vand.u32 4294901760, %v226_v49  ;;  %v8001_v4 = vand.u32 4294901760, %v227_v22 }
  0x53   : > { %9082 = vst [vmem:[#allocation34_spill] sm:$0xff] %v7986_v12  ;;  %v532_v37 = vand.u32 4294901760, %v531_v25  ;;  %v538_v13 = vsub.f32 %v7923_v42, %v9085_v48  ;;  %v8013_v59 = vand.u32 4294901760, %v402_v63  ;;  %v9090_v45 = vand.u32 4294901760, %v7740_v14 }
  0x54   : > { %9083 = vst [vmem:[#allocation35_spill] sm:$0xff] %v7988_v16  ;;  %v8015_v7 = vand.u32 4294901760, %v412_v30  ;;  %v8018_v51 = vsub.f32 %v226_v49, %v7999_v55  ;;  %v8029_v57 = vand.u32 4294901760, %v228_v27  ;;  %v8031_v17 = vand.u32 4294901760, %v229_v60 }
  0x55   : > { %6849 = vmatpush3.bf16.msra.mxu0 %v7875_v1  ;;  %9086 = vst [vmem:[#allocation36_spill] sm:$0xff] %v8013_v59  ;;  %v8021_v1 = vsub.f32 %v227_v22, %v8001_v4  ;;  %v8027_v48 = vsub.f32 %v7740_v14, %v9090_v45  ;;  %v9095_v30 = vand.u32 4294901760, %v7749_v18  ;;  %v539_v14 = vand.u32 4294901760, %v538_v13 }
  0x56   : > { %6851 = vmatprep.subr.bf16.mxu0 %v7940_v8  ;;  %9087 = vst [vmem:[#allocation37_spill] sm:$0xff] %v8015_v7  ;;  %9088 = vst [vmem:[#allocation38_spill] sm:$0xff] %v8018_v51  ;;  %v8036_v49 = vand.u32 4294901760, %v8018_v51  ;;  %v9096_v45 = vand.u32 4294901760, %v7969_v9  ;;  %v8051_v63 = vsub.f32 %v228_v27, %v8029_v57  ;;  %v8054_v3 = vsub.f32 %v229_v60, %v8031_v17 }
  0x57   : > { %9089 = vst [vmem:[#allocation39_spill] sm:$0xff] %v8021_v1  ;;  %9091 = vst [vmem:[#allocation40_spill] sm:$0xff] %v8029_v57  ;;  %v8039_v22 = vand.u32 4294901760, %v8021_v1  ;;  %v8044_v25 = vsub.f32 %v7749_v18, %v9095_v30  ;;  %v9099_v13 = vand.u32 4294901760, %v7754_v19  ;;  %v9100_v27 = vand.u32 4294901760, %v7761_v21 }
  0x58   : > { %9092 = vst [vmem:[#allocation41_spill] sm:$0xff] %v8031_v17  ;;  %9093 = vst [vmem:[#allocation42_spill] sm:$0xff] %v8036_v49  ;;  %v545_v32 = vsub.f32 %v7969_v9, %v9096_v45  ;;  %v422_v18 = vsub.f32 %v8018_v51, %v8036_v49  ;;  %v6862_v60 = vpack.c.bf16 %v525_v61, %v518_v11  ;;  %v9101_v58 = vand.u32 4294901760, %v7995_v52  ;;  %v231_v11 = vld [vmem:[%s7697_s22 + $0x68] sm:$0xff] }
  0x59   : > { %9094 = vst [vmem:[#allocation43_spill] sm:$0xff] %v8039_v22  ;;  %6853 = vmatpush3.bf16.msra.mxu0 %v7940_v8  ;;  %9097 = vst [vmem:[#allocation44_spill] sm:$0xff] %v8051_v63  ;;  %v432_v30 = vsub.f32 %v8021_v1, %v8039_v22  ;;  %v8064_v8 = vsub.f32 %v7754_v19, %v9099_v13  ;;  %v8069_v45 = vsub.f32 %v7761_v21, %v9100_v27  ;;  %v230_v1 = vld [vmem:[%s7697_s22 + $0x60] sm:$0xff]  ;;  %vm1727_vm4 = vcmask 1043459  }
  0x5a   : > { %9098 = vst [vmem:[#allocation45_spill] sm:$0xff] %v8054_v3  ;;  %6855 = vmatprep.subr.bf16.mxu0 %v7978_v2  ;;  %v552_v26 = vsub.f32 %v7995_v52, %v9101_v58  ;;  %v8075_v49 = vand.u32 4294901760, %v8051_v63  ;;  %v8078_v22 = vand.u32 4294901760, %v8054_v3  ;;  %v8081_v19 = vand.u32 4294901760, %v422_v18 }
  0x5b   : > { %v8083_v13 = vand.u32 4294901760, %v432_v30  ;;  %v6866_v58 = vpack.c.bf16 %v539_v14, %v532_v37  ;;  %v546_v27 = vand.u32 4294901760, %v545_v32  ;;  %v8098_v21 = vand.u32 4294901760, %v230_v1 }
  0x5c   : > { %9102 = vst [vmem:[#allocation46_spill] sm:$0xff] %v8075_v49  ;;  %9103 = vst [vmem:[#allocation47_spill] sm:$0xff] %v8078_v22  ;;  %v442_v51 = vsub.f32 %v8051_v63, %v8075_v49  ;;  %v452_v28 = vsub.f32 %v8054_v3, %v8078_v22  ;;  %v553_v37 = vand.u32 4294901760, %v552_v26  ;;  %v8105_v49 = vand.u32 4294901760, %v231_v11  ;;  %v233_v22 = vld [vmem:[%s7697_s22 + $0x78] sm:$0xff] }
  0x5d   : > { %9104 = vst [vmem:[#allocation48_spill] sm:$0xff] %v8081_v19  ;;  %6857 = vmatpush3.bf16.msra.mxu0 %v7978_v2  ;;  %9105 = vst [vmem:[#allocation49_spill] sm:$0xff] %v8098_v21  ;;  %v232_v2 = vld [vmem:[%s7697_s22 + $0x70] sm:$0xff]  ;;  %v9109_v3 = vand.u32 4294901760, %v8027_v48  ;;  %v9110_v30 = vand.u32 4294901760, %v8044_v25  ;;  %v8116_v63 = vsub.f32 %v230_v1, %v8098_v21  ;;  %v9112_v26 = vand.u32 4294901760, %v7768_v23 }
  0x5e   : > { %6859 = vmatprep.subr.bf16.mxu0 %v7980_v10  ;;  %v8101_v32 = vand.u32 4294901760, %v442_v51  ;;  %v8103_v14 = vand.u32 4294901760, %v452_v28  ;;  %9108 = vst [vmem:[#allocation52_spill] sm:$0xff] %v8105_v49  ;;  %v6870_v53 = vpack.c.bf16 %v553_v37, %v546_v27  ;;  %v9123_v41 = vand.u32 4294901760, %v7823_v46 }
  0x5f   : > { %v559_v18 = vsub.f32 %v8027_v48, %v9109_v3  ;;  %v566_v61 = vsub.f32 %v8044_v25, %v9110_v30  ;;  %9111 = vst [vmem:[#allocation53_spill] sm:$0xff] %v8116_v63  ;;  %v8121_v28 = vsub.f32 %v7768_v23, %v9112_v26  ;;  %v8128_v3 = vsub.f32 %v231_v11, %v8105_v49 }
  0x60   : > { %9106 = vst [vmem:[#allocation50_spill] sm:$0xff] %v8101_v32  ;;  %9107 = vst [vmem:[#allocation51_spill] sm:$0xff] %v8103_v14  ;;  %6187 = vmatmul.mubr.f32.vlgmr.msra.gmra.mrb[0].mxu0 %v7885_v5  ;;  %v9114_v30 = vand.u32 4294901760, %v7796_v34  ;;  %v8135_v5 = vand.u32 4294901760, %v232_v2  ;;  %v9116_v23 = vand.u32 4294901760, %v8064_v8  ;;  %v9117_v26 = vand.u32 4294901760, %v8069_v45 }
  0x61   : > { %6861 = vmatpush3.bf16.msra.mxu0 %v7980_v10  ;;  %6189 = vmatprep.mubr.f32.mxu0 %v7894_v31  ;;  %9113 = vst [vmem:[#allocation54_spill] sm:$0xff] %v8128_v3  ;;  %v8144_v51 = vand.u32 4294901760, %v8116_v63  ;;  %v8146_v11 = vand.u32 4294901760, %v233_v22  ;;  %v8164_v27 = vsub.f32 %v7823_v46, %v9123_v41  ;;  %v567_v37 = vand.u32 4294901760, %v566_v61 }
  0x62   : > { %v8133_v1 = vsub.f32 %v7796_v34, %v9114_v30  ;;  %9115 = vst [vmem:[#allocation55_spill] sm:$0xff] %v8135_v5  ;;  %6863 = vmatprep.subr.bf16.mxu0 %v6862_v60  ;;  %v573_v10 = vsub.f32 %v8064_v8, %v9116_v23  ;;  %v580_v31 = vsub.f32 %v8069_v45, %v9117_v26  ;;  %v8149_v34 = vand.u32 4294901760, %v8128_v3 }
  0x63   : > { %9118 = vst [vmem:[#allocation56_spill] sm:$0xff] %v8144_v51  ;;  %9119 = vst [vmem:[#allocation57_spill] sm:$0xff] %v8146_v11  ;;  %v586_v30 = vand.u32 4294901760, %v8121_v28  ;;  %v8153_v20 = vsub.f32 %v232_v2, %v8135_v5  ;;  %v560_v23 = vand.u32 4294901760, %v559_v18  ;;  %v462_v26 = vsub.f32 %v8116_v63, %v8144_v51 }
  0x64   : > { %9120 = vst [vmem:[#allocation58_spill] sm:$0xff] %v8149_v34  ;;  %6190 = vmatmul.mubr.f32.gmra.mrb[2].mxu0 %v7906_v33  ;;  %v8159_v50 = vsub.f32 %v233_v22, %v8146_v11  ;;  %v472_v2 = vsub.f32 %v8128_v3, %v8149_v34  ;;  %v593_v18 = vand.u32 4294901760, %v8133_v1  ;;  %v574_v22 = vand.u32 4294901760, %v573_v10 }
  0x65   : > { %9121 = vst [vmem:[#allocation59_spill] sm:$0xff] %v8153_v20  ;;  %6865 = vmatpush3.bf16.msra.mxu0 %v6862_v60  ;;  %6192 = vmatprep.mubr.f32.mxu0 %v7986_v12  ;;  %v8171_v33 = vand.u32 4294901760, %v8153_v20  ;;  %v581_v51 = vand.u32 4294901760, %v580_v31  ;;  %v9126_v41 = vand.u32 4294901760, %v7828_v47  ;;  %v8181_v60 = vand.u32 4294901760, %v462_v26 }
  0x66   : > { %9122 = vst [vmem:[#allocation60_spill] sm:$0xff] %v8159_v50  ;;  %6867 = vmatprep.subr.bf16.mxu0 %v6866_v58  ;;  %v8174_v63 = vand.u32 4294901760, %v8159_v50  ;;  %v8183_v61 = vand.u32 4294901760, %v472_v2  ;;  %v587_v12 = vsub.f32 %v8121_v28, %v586_v30  ;;  %v600_v10 = vand.u32 4294901760, %v8164_v27 }
  0x67   : > { %9124 = vst [vmem:[#allocation61_spill] sm:$0xff] %v8171_v33  ;;  %v8179_v46 = vsub.f32 %v7828_v47, %v9126_v41  ;;  %9127 = vst [vmem:[#allocation63_spill] sm:$0xff] %v8181_v60  ;;  %v482_v34 = vsub.f32 %v8153_v20, %v8171_v33  ;;  %v594_v26 = vsub.f32 %v8133_v1, %v593_v18  ;;  %v9131_v47 = vand.u32 4294901760, %v7800_v36 }
  0x68   : > { %9125 = vst [vmem:[#allocation62_spill] sm:$0xff] %v8174_v63  ;;  %9128 = vst [vmem:[#allocation64_spill] sm:$0xff] %v8183_v61  ;;  %6193 = vmatmul.mubr.f32.gmra.mrb[4].mxu0 %v7988_v16  ;;  %v492_v31 = vsub.f32 %v8159_v50, %v8174_v63  ;;  %v6874_v2 = vpack.c.bf16 %v567_v37, %v560_v23  ;;  %v6878_v20 = vpack.c.bf16 %v581_v51, %v574_v22  ;;  %vm1729_vm5 = vcmask 1044484  }
  0x69   : > { %6869 = vmatpush3.bf16.msra.mxu0 %v6866_v58  ;;  %6195 = vmatprep.mubr.f32.mxu0 %v8013_v59  ;;  %v8196_v41 = vand.u32 4294901760, %v482_v34  ;;  %v607_v16 = vand.u32 4294901760, %v8179_v46  ;;  %v588_v63 = vand.u32 4294901760, %v587_v12  ;;  %v601_v59 = vsub.f32 %v8164_v27, %v600_v10 }
  0x6a   : > { %6871 = vmatprep.subr.bf16.mxu0 %v6870_v53  ;;  %v8198_v33 = vand.u32 4294901760, %v492_v31  ;;  %v9132_v50 = vand.u32 4294901760, %v7806_v39  ;;  %v9134_v34 = vand.u32 4294901760, %v7816_v44  ;;  %v9135_v37 = vand.u32 4294901760, %v7850_v54 }
  0x6b   : > { %9129 = vst [vmem:[#allocation65_spill] sm:$0xff] %v8196_v41  ;;  %v595_v12 = vand.u32 4294901760, %v594_v26  ;;  %v9136_v51 = vand.u32 4294901760, %v7914_v56  ;;  %v9137_v22 = vand.u32 4294901760, %v7923_v42  ;;  %v608_v26 = vsub.f32 %v8179_v46, %v607_v16 }
  0x6c   : > { %9130 = vst [vmem:[#allocation66_spill] sm:$0xff] %v8198_v33  ;;  %6196 = vmatmul.mubr.f32.gmra.mrb[6].mxu0 %v8015_v7  ;;  %v8209_v23 = vpack.c.bf16 %v9132_v50, %v9131_v47  ;;  %v8215_v31 = vpack.c.bf16 %v9135_v37, %v9134_v34  ;;  %v9139_v7 = vand.u32 4294901760, %v7969_v9  ;;  %v9140_v50 = vand.u32 4294901760, %v7995_v52 }
  0x6d   : > { %6873 = vmatpush3.bf16.msra.mxu0 %v6870_v53  ;;  %6198 = vmatprep.mubr.f32.mxu0 %v8081_v19  ;;  %v8222_v58 = vpack.c.bf16 %v9137_v22, %v9136_v51  ;;  %v9142_v34 = vand.u32 4294901760, %v8044_v25  ;;  %v9143_v37 = vand.u32 4294901760, %v8064_v8  ;;  %v9144_v51 = vand.u32 4294901760, %v8069_v45 }
  0x6e   : > { %9133 = vst [vmem:[#allocation67_spill] sm:$0xff] %v8209_v23  ;;  %v8228_v47 = vpack.c.bf16 %v9140_v50, %v9139_v7  ;;  %v9141_v23 = vand.u32 4294901760, %v8027_v48  ;;  %6875 = vmatprep.subr.bf16.mxu0 %v6874_v2  ;;  %v8243_v19 = vpack.c.bf16 %v593_v18, %v586_v30  ;;  %v6882_v7 = vpack.c.bf16 %v595_v12, %v588_v63  ;;  %v9151_v63 = vld [vmem:[#allocation25_spill] sm:$0xff]  ;;  %v9155_v30 = vld [vmem:[#allocation38_spill] sm:$0xff]  ;;  %v9157_v18 = vld [vmem:[#allocation39_spill] sm:$0xff] }
  0x6f   : > { %9138 = vst [vmem:[#allocation68_spill] sm:$0xff] %v8222_v58  ;;  %v8241_v22 = vpack.c.bf16 %v9144_v51, %v9143_v37  ;;  %v8245_v58 = vpack.c.bf16 %v607_v16, %v600_v10  ;;  %v609_v50 = vand.u32 4294901760, %v608_v26  ;;  %v6890_v16 = vpack.c.bf16 %v7806_v39, %v7800_v36  ;;  %v9159_v10 = vld [vmem:[#allocation19_spill] sm:$0xff]  ;;  %v9161_v12 = vld [vmem:[#allocation53_spill] sm:$0xff]  ;;  %v9164_v51 = vld [vmem:[#allocation32_spill] sm:$0xff] }
  0x70   : > { %v8234_v53 = vpack.c.bf16 %v9142_v34, %v9141_v23  ;;  %6199 = vmatmul.mubr.f32.gmra.mrb[8].mxu0 %v8083_v13  ;;  %v602_v23 = vand.u32 4294901760, %v601_v59  ;;  %v6898_v59 = vpack.c.bf16 %v7923_v42, %v7914_v56  ;;  %v6902_v36 = vpack.c.bf16 %v7995_v52, %v7969_v9  ;;  %v9146_v9 = vld [vmem:[#allocation13_spill] sm:$0xff]  ;;  %v9147_v56 = vld [vmem:[#allocation8_spill] sm:$0xff]  ;;  %v9162_v26 = vld [vmem:[#allocation27_spill] sm:$0xff] }
  0x71   : > { %6877 = vmatpush3.bf16.msra.mxu0 %v6874_v2  ;;  %6201 = vmatprep.mubr.f32.mxu0 %v8101_v32  ;;  %v6906_v39 = vpack.c.bf16 %v8044_v25, %v8027_v48  ;;  %v6910_v42 = vpack.c.bf16 %v8069_v45, %v8064_v8  ;;  %v6918_v52 = vpack.c.bf16 %v8179_v46, %v8164_v27  ;;  %v9148_v8 = vld [vmem:[#allocation16_spill] sm:$0xff]  ;;  %v9150_v48 = vld [vmem:[#allocation9_spill] sm:$0xff]  ;;  %v9156_v27 = vld [vmem:[#allocation14_spill] sm:$0xff]  ;;  %vm1731_vm6 = vcmask 1045509  }
  0x72   : > { %6879 = vmatprep.subr.bf16.mxu0 %v6878_v20  ;;  %v6886_v34 = vpack.c.bf16 %v609_v50, %v602_v23  ;;  %v9149_v25 = vld [vmem:[#allocation24_spill] sm:$0xff]  ;;  %v9152_v45 = vld [vmem:[#allocation29_spill] sm:$0xff]  ;;  %v9163_v37 = vld [vmem:[#allocation59_spill] sm:$0xff]  ;;  %vm1733_vm7 = vcmask 1046534   ;;  %vm1735_vm8 = vcmask 1047559   ;;  %vm1738_vm9 = vcmask 130048  }
  0x73   : > { %v9158_v46 = vld [vmem:[#allocation44_spill] sm:$0xff]  ;;  %v9160_v2 = vld [vmem:[#allocation45_spill] sm:$0xff]  ;;  %vm7561_vm10 = vmmov 0  }
  0x74   : > { %6202 = vmatmul.mubr.f32.gmra.mrb[10].mxu0 %v8103_v14  ;;  %v9166_v23 = vld [vmem:[#allocation12_spill] sm:$0xff] }
  0x75   : > { %6881 = vmatpush3.bf16.msra.mxu0 %v6878_v20  ;;  %6204 = vmatprep.mubr.f32.mxu0 %v8181_v60  ;;  %v6894_v20 = vpack.c.bf16 %v7850_v54, %v7816_v44  ;;  %v6914_v44 = vpack.c.bf16 %v8133_v1, %v8121_v28  ;;  %v9145_v54 = vld [vmem:[#allocation11_spill] sm:$0xff]  ;;  %v9153_v28 = vld [vmem:[#allocation10_spill] sm:$0xff] }
  0x76   : > { %6883 = vmatprep.subr.bf16.mxu0 %v6882_v7  ;;  %v9154_v1 = vld [vmem:[#allocation30_spill] sm:$0xff]  ;;  %v9167_v50 = vld [vmem:[#allocation67_spill] sm:$0xff] }
  0x78   : > { %6205 = vmatmul.mubr.f32.gmra.mrb[12].mxu0 %v8183_v61 }
  0x79   : > { %6885 = vmatpush3.bf16.msra.mxu0 %v6882_v7  ;;  %6207 = vmatprep.mubr.f32.mxu0 %v8196_v41  ;;  %v9165_v7 = vld [vmem:[#allocation60_spill] sm:$0xff] }
  0x7a   : > { %6887 = vmatprep.subr.bf16.mxu0 %v6886_v34 }
  0x7c   : > { %6208 = vmatmul.mubr.f32.gmra.mrb[14].mxu0 %v8198_v33 }
  0x7d   : > { %6889 = vmatpush3.bf16.msra.mxu0 %v6886_v34  ;;  %6242 = vmatprep.mubr.f32.mxu0 %v7781_v29  ;;  %v9168_v34 = vld [vmem:[#allocation15_spill] sm:$0xff] }
  0x7e   : > { %6891 = vmatprep.subr.bf16.mxu0 %v6890_v16 }
  0x80   : > { %6243 = vmatmul.mubr.f32.vlgmr.msra.gmra.mrb[0].mxu0 %v7798_v35 }
  0x81   : > { %6893 = vmatpush3.bf16.msra.mxu0 %v6890_v16  ;;  %6245 = vmatprep.mubr.f32.mxu0 %v7808_v40  ;;  %v9169_v16 = vld [vmem:[#allocation17_spill] sm:$0xff] }
  0x82   : > { %6895 = vmatprep.subr.bf16.mxu0 %v6894_v20 }
  0x84   : > { %6246 = vmatmul.mubr.f32.gmra.mrb[2].mxu0 %v7814_v43 }
  0x85   : > { %6897 = vmatpush3.bf16.msra.mxu0 %v6894_v20  ;;  %6248 = vmatprep.mubr.f32.mxu0 %v7890_v24  ;;  %v9170_v20 = vld [vmem:[#allocation18_spill] sm:$0xff] }
  0x86   : > { %6899 = vmatprep.subr.bf16.mxu0 %v6898_v59 }
  0x88   : > { %6249 = vmatmul.mubr.f32.gmra.mrb[4].mxu0 %v7901_v62 }
  0x89   : > { %6901 = vmatpush3.bf16.msra.mxu0 %v6898_v59  ;;  %6251 = vmatprep.mubr.f32.mxu0 %v7925_v6  ;;  %v9171_v59 = vld [vmem:[#allocation26_spill] sm:$0xff] }
  0x8a   : > { %6903 = vmatprep.subr.bf16.mxu0 %v6902_v36 }
  0x8c   : > { %6252 = vmatmul.mubr.f32.gmra.mrb[6].mxu0 %v7934_v0 }
  0x8d   : > { %6905 = vmatpush3.bf16.msra.mxu0 %v6902_v36  ;;  %6254 = vmatprep.mubr.f32.mxu0 %v7999_v55  ;;  %v9172_v36 = vld [vmem:[#allocation68_spill] sm:$0xff] }
  0x8e   : > { %6907 = vmatprep.subr.bf16.mxu0 %v6906_v39 }
  0x90   : > { %6255 = vmatmul.mubr.f32.gmra.mrb[8].mxu0 %v8001_v4 }
  0x91   : > { %6909 = vmatpush3.bf16.msra.mxu0 %v6906_v39  ;;  %6257 = vmatprep.mubr.f32.mxu0 %v8029_v57  ;;  %v9173_v39 = vld [vmem:[#allocation28_spill] sm:$0xff] }
  0x92   : > { %6911 = vmatprep.subr.bf16.mxu0 %v6910_v42 }
  0x94   : > { %6258 = vmatmul.mubr.f32.gmra.mrb[10].mxu0 %v8031_v17 }
  0x95   : > { %6913 = vmatpush3.bf16.msra.mxu0 %v6910_v42  ;;  %6260 = vmatprep.mubr.f32.mxu0 %v8098_v21  ;;  %v9174_v42 = vld [vmem:[#allocation31_spill] sm:$0xff] }
  0x96   : > { %6915 = vmatprep.subr.bf16.mxu0 %v6914_v44 }
  0x98   : > { %6261 = vmatmul.mubr.f32.gmra.mrb[12].mxu0 %v8105_v49 }
  0x99   : > { %6917 = vmatpush3.bf16.msra.mxu0 %v6914_v44  ;;  %6263 = vmatprep.mubr.f32.mxu0 %v8135_v5  ;;  %v9175_v44 = vld [vmem:[#allocation33_spill] sm:$0xff] }
  0x9a   : > { %6919 = vmatprep.subr.bf16.mxu0 %v6918_v52 }
  0x9c   : > { %6264 = vmatmul.mubr.f32.gmra.mrb[14].mxu0 %v8146_v11 }
  0x9d   : > { %6921 = vmatpush3.bf16.msra.mxu0 %v6918_v52  ;;  %6298 = vmatprep.mubr.f32.mxu0 %v7804_v38  ;;  %v9176_v52 = vld [vmem:[#allocation42_spill] sm:$0xff] }
  0x9e   : > { %6923 = vmatprep.subr.bf16.mxu0 %v7742_v15 }
  0xa0   : > { %6299 = vmatmul.mubr.f32.vlgmr.msra.gmra.mrb[0].mxu0 %v9145_v54 }
  0xa1   : > { %6925 = vmatpush3.bf16.msra.mxu0 %v7742_v15  ;;  %6301 = vmatprep.mubr.f32.mxu0 %v9146_v9 }
  0xa2   : > { %6927 = vmatprep.subr.bf16.mxu0 %v9147_v56 }
  0xa4   : > { %6302 = vmatmul.mubr.f32.gmra.mrb[2].mxu0 %v9148_v8 }
  0xa5   : > { %6929 = vmatpush3.bf16.msra.mxu0 %v9147_v56  ;;  %6304 = vmatprep.mubr.f32.mxu0 %v9149_v25 }
  0xa6   : > { %6931 = vmatprep.subr.bf16.mxu0 %v9150_v48 }
  0xa8   : > { %6305 = vmatmul.mubr.f32.gmra.mrb[4].mxu0 %v9151_v63 }
  0xa9   : > { %6933 = vmatpush3.bf16.msra.mxu0 %v9150_v48  ;;  %6307 = vmatprep.mubr.f32.mxu0 %v9152_v45 }
  0xaa   : > { %6935 = vmatprep.subr.bf16.mxu0 %v9153_v28 }
  0xac   : > { %6308 = vmatmul.mubr.f32.gmra.mrb[6].mxu0 %v9154_v1 }
  0xad   : > { %6937 = vmatpush3.bf16.msra.mxu0 %v9153_v28  ;;  %6310 = vmatprep.mubr.f32.mxu0 %v9155_v30 }
  0xae   : > { %6939 = vmatprep.subr.bf16.mxu0 %v9156_v27 }
  0xb0   : > { %6311 = vmatmul.mubr.f32.gmra.mrb[8].mxu0 %v9157_v18 }
  0xb1   : > { %6941 = vmatpush3.bf16.msra.mxu0 %v9156_v27  ;;  %6313 = vmatprep.mubr.f32.mxu0 %v9158_v46 }
  0xb2   : > { %6943 = vmatprep.subr.bf16.mxu0 %v9159_v10 }
  0xb4   : > { %6314 = vmatmul.mubr.f32.gmra.mrb[10].mxu0 %v9160_v2 }
  0xb5   : > { %6945 = vmatpush3.bf16.msra.mxu0 %v9159_v10  ;;  %6316 = vmatprep.mubr.f32.mxu0 %v9161_v12 }
  0xb6   : > { %6947 = vmatprep.subr.bf16.mxu0 %v9162_v26 }
  0xb8   : > { %6317 = vmatmul.mubr.f32.gmra.mrb[12].mxu0 %v8128_v3 }
  0xb9   : > { %6949 = vmatpush3.bf16.msra.mxu0 %v9162_v26  ;;  %6319 = vmatprep.mubr.f32.mxu0 %v9163_v37  ;;  %v9182_v37 = vld [vmem:[#allocation61_spill] sm:$0xff] }
  0xba   : > { %6951 = vmatprep.subr.bf16.mxu0 %v9164_v51 }
  0xbc   : > { %6320 = vmatmul.mubr.f32.gmra.mrb[14].mxu0 %v9165_v7  ;;  %v9180_v7 = vld [vmem:[#allocation56_spill] sm:$0xff] }
  0xbd   : > { %6953 = vmatpush3.bf16.msra.mxu0 %v9164_v51  ;;  %6354 = vmatprep.mubr.f32.mxu0 %v9166_v23 }
  0xbe   : > { %6955 = vmatprep.subr.bf16.mxu0 %v9167_v50 }
  0xc0   : > { %6355 = vmatmul.mubr.f32.vlgmr.msra.gmra.mrb[0].mxu0 %v9168_v34 }
  0xc1   : > { %6957 = vmatpush3.bf16.msra.mxu0 %v9167_v50  ;;  %6357 = vmatprep.mubr.f32.mxu0 %v9169_v16  ;;  %v9178_v50 = vld [vmem:[#allocation46_spill] sm:$0xff] }
  0xc2   : > { %6959 = vmatprep.subr.bf16.mxu0 %v8215_v31 }
  0xc4   : > { %6358 = vmatmul.mubr.f32.gmra.mrb[2].mxu0 %v9170_v20 }
  0xc5   : > { %6961 = vmatpush3.bf16.msra.mxu0 %v8215_v31  ;;  %6360 = vmatprep.mubr.f32.mxu0 %v9171_v59  ;;  %v9177_v31 = vld [vmem:[#allocation43_spill] sm:$0xff] }
  0xc6   : > { %6963 = vmatprep.subr.bf16.mxu0 %v9172_v36 }
  0xc8   : > { %6361 = vmatmul.mubr.f32.gmra.mrb[4].mxu0 %v9173_v39 }
  0xc9   : > { %6965 = vmatpush3.bf16.msra.mxu0 %v9172_v36  ;;  %6363 = vmatprep.mubr.f32.mxu0 %v9174_v42  ;;  %v9179_v36 = vld [vmem:[#allocation47_spill] sm:$0xff] }
  0xca   : > { %6967 = vmatprep.subr.bf16.mxu0 %v8228_v47 }
  0xcc   : > { %6364 = vmatmul.mubr.f32.gmra.mrb[6].mxu0 %v9175_v44 }
  0xcd   : > { %6969 = vmatpush3.bf16.msra.mxu0 %v8228_v47  ;;  %6366 = vmatprep.mubr.f32.mxu0 %v9176_v52  ;;  %v9181_v47 = vld [vmem:[#allocation58_spill] sm:$0xff] }
  0xce   : > { %6971 = vmatprep.subr.bf16.mxu0 %v8234_v53 }
  0xd0   : > { %6367 = vmatmul.mubr.f32.gmra.mrb[8].mxu0 %v9177_v31 }
  0xd1   : > { %6973 = vmatpush3.bf16.msra.mxu0 %v8234_v53  ;;  %6369 = vmatprep.mubr.f32.mxu0 %v9178_v50  ;;  %v9183_v53 = vld [vmem:[#allocation62_spill] sm:$0xff] }
  0xd2   : > { %6975 = vmatprep.subr.bf16.mxu0 %v8241_v22 }
  0xd4   : > { %6370 = vmatmul.mubr.f32.gmra.mrb[10].mxu0 %v9179_v36 }
  0xd5   : > { %6977 = vmatpush3.bf16.msra.mxu0 %v8241_v22  ;;  %6372 = vmatprep.mubr.f32.mxu0 %v9180_v7 }
  0xd6   : > { %6979 = vmatprep.subr.bf16.mxu0 %v8243_v19 }
  0xd8   : > { %6373 = vmatmul.mubr.f32.gmra.mrb[12].mxu0 %v9181_v47 }
  0xd9   : > { %6981 = vmatpush3.bf16.msra.mxu0 %v8243_v19  ;;  %6375 = vmatprep.mubr.f32.mxu0 %v9182_v37 }
  0xda   : > { %6983 = vmatprep.subr.bf16.mxu0 %v8245_v58 }
  0xdc   : > { %6376 = vmatmul.mubr.f32.gmra.mrb[14].mxu0 %v9183_v53 }
  0xdd   : > { %6985 = vmatpush3.bf16.msra.mxu0 %v8245_v58  ;;  %6410 = vmatprep.mubr.f32.mxu0 %v7781_v29 }
  0xde   : > { %6987 = vmatprep.subr.bf16.mxu0 %v7742_v15 }
  0xe0   : > { %6411 = vmatmul.mubr.f32.vlgmr.msra.gmra.mrb[0].mxu0 %v7798_v35 }
  0xe1   : > { %6989 = vmatpush3.bf16.msra.mxu0 %v7742_v15  ;;  %6413 = vmatprep.mubr.f32.mxu0 %v7808_v40  ;;  %v8401_v15 = vld [vmem:[%s8935_s2] ss:$0 sm:$0xff] }
  0xe2   : > { %6991 = vmatprep.subr.bf16.mxu0 %v9147_v56 }
  0xe4   : > { %6414 = vmatmul.mubr.f32.gmra.mrb[2].mxu0 %v7814_v43 }
  0xe5   : > { %6993 = vmatpush3.bf16.msra.mxu0 %v9147_v56  ;;  %6416 = vmatprep.mubr.f32.mxu0 %v7890_v24 }
  0xe6   : > { %6995 = vmatprep.subr.bf16.mxu0 %v9150_v48 }
  0xe8   : > { %6417 = vmatmul.mubr.f32.gmra.mrb[4].mxu0 %v7901_v62 }
  0xe9   : > { %6997 = vmatpush3.bf16.msra.mxu0 %v9150_v48  ;;  %6419 = vmatprep.mubr.f32.mxu0 %v7925_v6 }
  0xea   : > { %6999 = vmatprep.subr.bf16.mxu0 %v9153_v28 }
  0xec   : > { %6420 = vmatmul.mubr.f32.gmra.mrb[6].mxu0 %v7934_v0 }
  0xed   : > { %7001 = vmatpush3.bf16.msra.mxu0 %v9153_v28  ;;  %6422 = vmatprep.mubr.f32.mxu0 %v7999_v55 }
  0xee   : > { %7003 = vmatprep.subr.bf16.mxu0 %v9156_v27 }
  0xf0   : > { %6423 = vmatmul.mubr.f32.gmra.mrb[8].mxu0 %v8001_v4 }
  0xf1   : > { %7005 = vmatpush3.bf16.msra.mxu0 %v9156_v27  ;;  %6425 = vmatprep.mubr.f32.mxu0 %v8029_v57 }
  0xf2   : > { %7007 = vmatprep.subr.bf16.mxu0 %v9159_v10 }
  0xf4   : > { %6426 = vmatmul.mubr.f32.gmra.mrb[10].mxu0 %v8031_v17 }
  0xf5   : > { %7009 = vmatpush3.bf16.msra.mxu0 %v9159_v10  ;;  %6428 = vmatprep.mubr.f32.mxu0 %v8098_v21 }
  0xf6   : > { %7011 = vmatprep.subr.bf16.mxu0 %v9162_v26 }
  0xf8   : > { %6429 = vmatmul.mubr.f32.gmra.mrb[12].mxu0 %v8105_v49 }
  0xf9   : > { %7013 = vmatpush3.bf16.msra.mxu0 %v9162_v26  ;;  %6431 = vmatprep.mubr.f32.mxu0 %v8135_v5 }
  0xfa   : > { %7015 = vmatprep.subr.bf16.mxu0 %v9164_v51 }
  0xfc   : > { %6432 = vmatmul.mubr.f32.gmra.mrb[14].mxu0 %v8146_v11 }
  0xfd   : > { %7017 = vmatpush3.bf16.msra.mxu0 %v9164_v51  ;;  %6466 = vmatprep.mubr.f32.mxu0 %v7781_v29 }
 0x100   : > { %6467 = vmatmul.mubr.f32.vlgmr.msra.gmra.mrb[0].mxu0 %v7798_v35 }
 0x101   : > { %6469 = vmatprep.mubr.f32.mxu0 %v7808_v40 }
 0x104   : > { %6470 = vmatmul.mubr.f32.gmra.mrb[2].mxu0 %v7814_v43 }
 0x105   : > { %6472 = vmatprep.mubr.f32.mxu0 %v7890_v24 }
 0x108   : > { %6473 = vmatmul.mubr.f32.gmra.mrb[4].mxu0 %v7901_v62 }
 0x109   : > { %6475 = vmatprep.mubr.f32.mxu0 %v7925_v6 }
 0x10c   : > { %6476 = vmatmul.mubr.f32.gmra.mrb[6].mxu0 %v7934_v0 }
 0x10d   : > { %6478 = vmatprep.mubr.f32.mxu0 %v7999_v55 }
 0x110   : > { %6479 = vmatmul.mubr.f32.gmra.mrb[8].mxu0 %v8001_v4 }
 0x111   : > { %6481 = vmatprep.mubr.f32.mxu0 %v8029_v57 }
 0x114   : > { %6482 = vmatmul.mubr.f32.gmra.mrb[10].mxu0 %v8031_v17 }
 0x115   : > { %6484 = vmatprep.mubr.f32.mxu0 %v8098_v21 }
 0x118   : > { %6485 = vmatmul.mubr.f32.gmra.mrb[12].mxu0 %v8105_v49 }
 0x119   : > { %6487 = vmatprep.mubr.f32.mxu0 %v8135_v5 }
 0x11c   : > { %6488 = vmatmul.mubr.f32.gmra.mrb[14].mxu0 %v8146_v11 }
 0x1d3   : > { %v6468_v19 = vpop.f32.mrb[0].mxu0 }
 0x1d4   : > { %v7162_v58 = vadd.f32 %v6468_v19, %v8401_v15  ;;  %v1450_v22 = vpop.f32.mrb[1].mxu0  ;;  %v8412_v19 = vld [vmem:[%s8936_s3] ss:$0 sm:$0xff] }
 0x1d5   : > { %v7163_v56 = vadd.f32 %v8401_v15, %v1450_v22 }
 0x1d6   : > { %7392 = vtanh.f32 %v7162_v58 }
 0x1d7   : > { %7394 = vtanh.f32 %v7163_v56  ;;  %v6471_v48 = vpop.f32.mrb[2].mxu0 }
 0x1d8   : > { %v7164_v28 = vadd.f32 %v6471_v48, %v8401_v15  ;;  %v1462_v27 = vpop.f32.mrb[3].mxu0 }
 0x1d9   : > { %v7165_v10 = vadd.f32 %v8401_v15, %v1462_v27 }
 0x1da   : > { %7396 = vtanh.f32 %v7164_v28 }
 0x1db   : > { %7398 = vtanh.f32 %v7165_v10  ;;  %v6474_v26 = vpop.f32.mrb[4].mxu0 }
 0x1dc   : > { %v7166_v51 = vadd.f32 %v6474_v26, %v8401_v15  ;;  %v1474_v53 = vpop.f32.mrb[5].mxu0 }
 0x1dd   : > { %v7167_v37 = vadd.f32 %v8401_v15, %v1474_v53 }
 0x1de   : > { %7400 = vtanh.f32 %v7166_v51 }
 0x1df   : > { %7402 = vtanh.f32 %v7167_v37  ;;  %v6477_v58 = vpop.f32.mrb[6].mxu0 }
 0x1e0   : > { %v7393_v22 = vpop.eup %7392  ;;  %v7168_v56 = vadd.f32 %v6477_v58, %v8401_v15  ;;  %v1486_v48 = vpop.f32.mrb[7].mxu0 }
 0x1e1   : > { %v7395_v28 = vpop.eup %7394  ;;  %v7169_v27 = vadd.f32 %v8401_v15, %v1486_v48  ;;  %v1567_v10 = vmul.f32 %v7393_v22, %v8412_v19 }
 0x1e2   : > { %7404 = vtanh.f32 %v7168_v56  ;;  %v1566_v51 = vmul.f32 %v7395_v28, %v8412_v19 }
 0x1e3   : > { %7406 = vtanh.f32 %v7169_v27  ;;  %v6480_v53 = vpop.f32.mrb[8].mxu0  ;;  %v1586_v26 = vsel %vm1582_vm0, %v1567_v10, 0.0 }
 0x1e4   : > { %v7397_v41 = vpop.eup %7396  ;;  %v7170_v37 = vadd.f32 %v6480_v53, %v8401_v15  ;;  %1587 = vadd.xlane.f32.xlu0 %v1586_v26  ;;  %v1498_v33 = vpop.f32.mrb[9].mxu0  ;;  %v1583_v48 = vsel %vm1582_vm0, %v1566_v51, 0.0 }
 0x1e5   : > { %v7399_v58 = vpop.eup %7398  ;;  %v7171_v11 = vadd.f32 %v8401_v15, %v1498_v33  ;;  %v1569_v5 = vmul.f32 %v7397_v41, %v8412_v19 }
 0x1e6   : > { %7408 = vtanh.f32 %v7170_v37  ;;  %v1568_v27 = vmul.f32 %v7399_v58, %v8412_v19 }
 0x1e7   : > { %7410 = vtanh.f32 %v7171_v11  ;;  %v6483_v22 = vpop.f32.mrb[10].mxu0  ;;  %v1592_v56 = vsel %vm1582_vm0, %v1569_v5, 0.0 }
 0x1e8   : > { %v7401_v28 = vpop.eup %7400  ;;  %v7172_v10 = vadd.f32 %v6483_v22, %v8401_v15  ;;  %1593 = vadd.xlane.f32.xlu1 %v1592_v56  ;;  %v1510_v53 = vpop.f32.mrb[11].mxu0  ;;  %1584 = vadd.xlane.f32.xlu0 %v1583_v48  ;;  %v1589_v5 = vsel %vm1582_vm0, %v1568_v27, 0.0 }
 0x1e9   : > { %v7403_v26 = vpop.eup %7402  ;;  %v7173_v33 = vadd.f32 %v8401_v15, %v1510_v53  ;;  %v1571_v51 = vmul.f32 %v7401_v28, %v8412_v19 }
 0x1ea   : > { %7412 = vtanh.f32 %v7172_v10  ;;  %v1570_v41 = vmul.f32 %v7403_v26, %v8412_v19 }
 0x1eb   : > { %7414 = vtanh.f32 %v7173_v33  ;;  %v6486_v11 = vpop.f32.mrb[12].mxu0  ;;  %v1598_v27 = vsel %vm1582_vm0, %v1571_v51, 0.0 }
 0x1ec   : > { %v7405_v37 = vpop.eup %7404  ;;  %v7174_v58 = vadd.f32 %v6486_v11, %v8401_v15  ;;  %v1522_v47 = vpop.f32.mrb[13].mxu0  ;;  %1590 = vadd.xlane.f32.xlu1 %v1589_v5  ;;  %v1595_v22 = vsel %vm1582_vm0, %v1570_v41, 0.0 }
 0x1ed   : > { %v7407_v56 = vpop.eup %7406  ;;  %v7175_v48 = vadd.f32 %v8401_v15, %v1522_v47  ;;  %1596 = vadd.xlane.f32.xlu0 %v1595_v22  ;;  %v1573_v28 = vmul.f32 %v7405_v37, %v8412_v19 }
 0x1ee   : > { %7416 = vtanh.f32 %v7174_v58  ;;  %v1572_v10 = vmul.f32 %v7407_v56, %v8412_v19 }
 0x1ef   : > { %7418 = vtanh.f32 %v7175_v48  ;;  %v6489_v53 = vpop.f32.mrb[14].mxu0  ;;  %v1604_v22 = vsel %vm1582_vm0, %v1573_v28, 0.0 }
 0x1f0   : > { %v7409_v26 = vpop.eup %7408  ;;  %v7176_v33 = vadd.f32 %v6489_v53, %v8401_v15  ;;  %v1534_v11 = vpop.f32.mrb[15].mxu0  ;;  %1599 = vadd.xlane.f32.xlu1 %v1598_v27  ;;  %v1601_v41 = vsel %vm1582_vm0, %v1572_v10, 0.0 }
 0x1f1   : > { %v7411_v5 = vpop.eup %7410  ;;  %v7177_v47 = vadd.f32 %v8401_v15, %v1534_v11  ;;  %1602 = vadd.xlane.f32.xlu0 %v1601_v41  ;;  %v1575_v51 = vmul.f32 %v7409_v26, %v8412_v19 }
 0x1f2   : > { %7420 = vtanh.f32 %v7176_v33  ;;  %v1574_v58 = vmul.f32 %v7411_v5, %v8412_v19 }
 0x1f3   : > { %7422 = vtanh.f32 %v7177_v47  ;;  %v1610_v53 = vsel %vm1582_vm0, %v1575_v51, 0.0 }
 0x1f4   : > { %v7413_v37 = vpop.eup %7412  ;;  %1605 = vadd.xlane.f32.xlu1 %v1604_v22  ;;  %v1607_v56 = vsel %vm1582_vm0, %v1574_v58, 0.0 }
 0x1f5   : > { %v7415_v48 = vpop.eup %7414  ;;  %1608 = vadd.xlane.f32.xlu0 %v1607_v56  ;;  %v1577_v15 = vmul.f32 %v7413_v37, %v8412_v19 }
 0x1f6   : > { %v1576_v10 = vmul.f32 %v7415_v48, %v8412_v19 }
 0x1f7   : > { %v1616_v26 = vsel %vm1582_vm0, %v1577_v15, 0.0 }
 0x1f8   : > { %v7417_v27 = vpop.eup %7416  ;;  %1611 = vadd.xlane.f32.xlu1 %v1610_v53  ;;  %v1613_v33 = vsel %vm1582_vm0, %v1576_v10, 0.0 }
 0x1f9   : > { %v7419_v11 = vpop.eup %7418  ;;  %1614 = vadd.xlane.f32.xlu0 %v1613_v33  ;;  %v1579_v41 = vmul.f32 %v7417_v27, %v8412_v19 }
 0x1fa   : > { %v1578_v28 = vmul.f32 %v7419_v11, %v8412_v19  ;;  %v1647_v11 = vlaneseq }
 0x1fb   : > { %v1622_v51 = vsel %vm1582_vm0, %v1579_v41, 0.0 }
 0x1fc   : > { %v7421_v5 = vpop.eup %7420  ;;  %1617 = vadd.xlane.f32.xlu1 %v1616_v26  ;;  %v1619_v47 = vsel %vm1582_vm0, %v1578_v28, 0.0  ;;  %v1648_v26 = vand.u32 127, %v1647_v11 }
 0x1fd   : > { %v7423_v58 = vpop.eup %7422  ;;  %1620 = vadd.xlane.f32.xlu0 %v1619_v47  ;;  %v1581_v37 = vmul.f32 %v7421_v5, %v8412_v19  ;;  %v8474_v47 = vshrl.u32 %v1647_v11, 7 }
 0x1fe   : > { %v1580_v22 = vmul.f32 %v7423_v58, %v8412_v19  ;;  %v1653_v58 = vadd.s32 4294967288, %v1648_v26 }
 0x1ff   : > { %v1628_v48 = vsel %vm1582_vm0, %v1581_v37, 0.0 }
 0x200   : > { %1623 = vadd.xlane.f32.xlu1 %v1622_v51  ;;  %v1625_v56 = vsel %vm1582_vm0, %v1580_v22, 0.0  ;;  %v8479_v51 = vsub.s32 %v1648_v26, %v8474_v47 }
 0x201   : > { %1626 = vadd.xlane.f32.xlu0 %v1625_v56  ;;  %v8484_v56 = vsub.s32 %v1653_v58, %v8474_v47 }
 0x204   : > { %1629 = vadd.xlane.f32.xlu1 %v1628_v48 }
 0x271   : > { %v8456_v10 = vpop.xlane.xlu0 %1587 }
 0x272   : > { %v1657_v49 = vrot.slane %v8456_v10, %v8484_v56 }
 0x275   : > { %v8458_v53 = vpop.xlane.xlu1 %1593  ;;  %v8460_v15 = vpop.xlane.xlu0 %1584 }
 0x276   : > { %v1667_v11 = vrot.slane %v8458_v53, %v8484_v56  ;;  %v1652_v26 = vrot.slane %v8460_v15, %v8479_v51 }
 0x278   : > { %v1659_v14 = vsel %vm1658_vm1, %v1657_v49, %v1652_v26 }
 0x279   : > { %v8462_v27 = vpop.xlane.xlu1 %1590 }
 0x27a   : > { %v8464_v33 = vpop.xlane.xlu0 %1596  ;;  %v1663_v48 = vrot.slane %v8462_v27, %v8479_v51 }
 0x27b   : > { %v1672_v58 = vrot.slane %v8464_v33, %v8479_v51 }
 0x27c   : > { %v1668_v21 = vsel %vm1658_vm1, %v1667_v11, %v1663_v48 }
 0x27d   : > { %v8466_v28 = vpop.xlane.xlu1 %1599  ;;  %v1724_v57 = vsel %vm1723_vm2, %v1668_v21, %v1659_v14 }
 0x27e   : > { %v8468_v19 = vpop.xlane.xlu0 %1602  ;;  %v1676_v7 = vrot.slane %v8466_v28, %v8484_v56 }
 0x27f   : > { %v1681_v36 = vrot.slane %v8468_v19, %v8479_v51 }
 0x280   : > { %v1677_v2 = vsel %vm1658_vm1, %v1676_v7, %v1672_v58 }
 0x281   : > { %v8470_v41 = vpop.xlane.xlu1 %1605  ;;  %v1726_v49 = vsel %vm1725_vm3, %v1677_v2, %v1724_v57 }
 0x282   : > { %v8472_v5 = vpop.xlane.xlu0 %1608  ;;  %v1685_v12 = vrot.slane %v8470_v41, %v8484_v56 }
 0x283   : > { %v1690_v46 = vrot.slane %v8472_v5, %v8479_v51 }
 0x284   : > { %v1686_v17 = vsel %vm1658_vm1, %v1685_v12, %v1681_v36 }
 0x285   : > { %v8476_v22 = vpop.xlane.xlu1 %1611  ;;  %v1728_v36 = vsel %vm1727_vm4, %v1686_v17, %v1726_v49 }
 0x286   : > { %v8481_v37 = vpop.xlane.xlu0 %1614  ;;  %v1694_v61 = vrot.slane %v8476_v22, %v8484_v56 }
 0x287   : > { %v1699_v48 = vrot.slane %v8481_v37, %v8479_v51 }
 0x288   : > { %v1695_v7 = vsel %vm1658_vm1, %v1694_v61, %v1690_v46 }
 0x289   : > { %v8490_v3 = vpop.xlane.xlu1 %1617  ;;  %v1730_v61 = vsel %vm1729_vm5, %v1695_v7, %v1728_v36  ;;  %v1749_v7 = vsub.s32 1, %v8474_v47  ;;  %v1765_v36 = vsub.s32 5, %v8474_v47 }
 0x28a   : > { %v8498_v60 = vpop.xlane.xlu0 %1620  ;;  %v1703_v50 = vrot.slane %v8490_v3, %v8484_v56 }
 0x28b   : > { %v1708_v58 = vrot.slane %v8498_v60, %v8479_v51 }
 0x28c   : > { %v1704_v12 = vsel %vm1658_vm1, %v1703_v50, %v1699_v48  ;;  %v7559_v48 = vmov 0  }
 0x28d   : > { %v8514_v32 = vpop.xlane.xlu1 %1623  ;;  %v1732_v57 = vsel %vm1731_vm6, %v1704_v12, %v1730_v61  ;;  %7391 = vset.pattern.permute.xlu0 %v7559_v48  ;;  %7390 = vset.pattern.permute.xlu1 %v7559_v48 }
 0x28e   : > { %v1712_v11 = vrot.slane %v8514_v32, %v8484_v56  ;;  %v8526_v31 = vpop.xlane.xlu0 %1626 }
 0x28f   : > { %v1717_v21 = vrot.slane %v8526_v31, %v8479_v51 }
 0x290   : > { %v1713_v52 = vsel %vm1658_vm1, %v1712_v11, %v1708_v58  ;;  %v1745_v11 = vsub.s32 0, %v8474_v47 }
 0x291   : > { %v8531_v26 = vpop.xlane.xlu1 %1629  ;;  %v1734_v17 = vsel %vm1733_vm7, %v1713_v52, %v1732_v57  ;;  %v1769_v57 = vsub.s32 6, %v8474_v47 }
 0x292   : > { %v1721_v14 = vrot.slane %v8531_v26, %v8484_v56 }
 0x294   : > { %v1722_v46 = vsel %vm1658_vm1, %v1721_v14, %v1717_v21  ;;  %v1753_v14 = vsub.s32 2, %v8474_v47 }
 0x295   : > { %v1736_v2 = vsel %vm1735_vm8, %v1722_v46, %v1734_v17 }
 0x296   : > { %v1739_v50 = vsel %vm1738_vm9, %v1736_v2, -inf }
 0x297   : > { %1740 = vmax.xlane.f32.xlu0 %v1739_v50 }
 0x324   : > { %v1741_v58 = vpop.xlane.xlu0 %1740 }
 0x325   : > { %v1746_v49 = vrot.slane %v1741_v58, %v1745_v11  ;;  %v1750_v12 = vrot.slane %v1741_v58, %v1749_v7  ;;  %v8552_v46 = vrot.slane %v1741_v58, %v1765_v36  ;;  %v1754_v50 = vrot.slane %v1741_v58, %v1753_v14 }
 0x326   : > { %v8556_v7 = vrot.slane %v1741_v58, %v1769_v57 }
 0x327   : > { %v1783_v21 = vsub.f32 %v8460_v15, %v1746_v49  ;;  %v1784_v52 = vsub.f32 %v8456_v10, %v1746_v49  ;;  %v1785_v61 = vsub.f32 %v8462_v27, %v1750_v12  ;;  %v1786_v48 = vsub.f32 %v8458_v53, %v1750_v12 }
 0x328   : > { %v1773_v15 = vsub.s32 7, %v8474_v47  ;;  %v1793_v10 = vsub.f32 %v8481_v37, %v8552_v46  ;;  %v1757_v27 = vsub.s32 3, %v8474_v47  ;;  %v1787_v49 = vsub.f32 %v8464_v33, %v1754_v50 }
 0x329   : > { %v1799_v17 = vmul.f32 1.442695, %v1783_v21  ;;  %v1801_v2 = vmul.f32 1.442695, %v1784_v52  ;;  %v1803_v11 = vmul.f32 1.442695, %v1785_v61  ;;  %v1795_v53 = vsub.f32 %v8498_v60, %v8556_v7 }
 0x32a   : > { %v1805_v36 = vmul.f32 1.442695, %v1786_v48  ;;  %v8562_v21 = vrot.slane %v1741_v58, %v1773_v15  ;;  %v1819_v12 = vmul.f32 1.442695, %v1793_v10  ;;  %v1758_v52 = vrot.slane %v1741_v58, %v1757_v27 }
 0x32b   : > { %7424 = vpow2.f32 %v1799_v17  ;;  %v1788_v14 = vsub.f32 %v8466_v28, %v1754_v50  ;;  %v1807_v61 = vmul.f32 1.442695, %v1787_v49  ;;  %v1823_v17 = vmul.f32 1.442695, %v1795_v53 }
 0x32c   : > { %7426 = vpow2.f32 %v1801_v2  ;;  %v1797_v37 = vsub.f32 %v8526_v31, %v8562_v21  ;;  %v1761_v2 = vsub.s32 4, %v8474_v47  ;;  %v1789_v48 = vsub.f32 %v8468_v19, %v1758_v52 }
 0x32d   : > { %7428 = vpow2.f32 %v1803_v11  ;;  %v1809_v60 = vmul.f32 1.442695, %v1788_v14  ;;  %v1790_v15 = vsub.f32 %v8470_v41, %v1758_v52  ;;  %v8576_v41 = vpack.c.bf16 %v7798_v35, %v7781_v29 }
 0x32e   : > { %7430 = vpow2.f32 %v1805_v36  ;;  %v1827_v28 = vmul.f32 1.442695, %v1797_v37  ;;  %v1762_v50 = vrot.slane %v1741_v58, %v1761_v2  ;;  %v1811_v31 = vmul.f32 1.442695, %v1789_v48 }
 0x32f   : > { %7432 = vpow2.f32 %v1819_v12  ;;  %v1813_v19 = vmul.f32 1.442695, %v1790_v15  ;;  %v7560_v52 = vmov 0.0|0.0   ;;  %v1794_v14 = vsub.f32 %v8490_v3, %v8552_v46 }
 0x330   : > { %7434 = vpow2.f32 %v1807_v61  ;;  %v1791_v47 = vsub.f32 %v8472_v5, %v1762_v50  ;;  %v1792_v53 = vsub.f32 %v8476_v22, %v1762_v50  ;;  %7018 = vmatprep.subr.bf16.mxu1 %v7560_v52  ;;  %v7562_v29 = vmov 0.0  }
 0x331   : > { %7436 = vpow2.f32 %v1823_v17  ;;  %7020 = vmatpush3.bf16.msra.mxu1 %v8576_v41  ;;  %6494 = vmatprep.mubr.msk.f32.mxu1 %vm7561_vm10, %v7562_v29  ;;  %v1796_v35 = vsub.f32 %v8514_v32, %v8556_v7  ;;  %v1798_v3 = vsub.f32 %v8531_v26, %v8562_v21 }
 0x332   : > { %7438 = vpow2.f32 %v1809_v60  ;;  %v1815_v58 = vmul.f32 1.442695, %v1791_v47  ;;  %v1817_v22 = vmul.f32 1.442695, %v1792_v53  ;;  %7021 = vmatprep.subr.bf16.mxu1 %v7560_v52 }
 0x333   : > { %7440 = vpow2.f32 %v1827_v28  ;;  %v1825_v46 = vmul.f32 1.442695, %v1796_v35 }
 0x334   : > { %7442 = vpow2.f32 %v1811_v31 }
 0x335   : > { %v7425_v57 = vpop.eup %7424  ;;  %7444 = vpow2.f32 %v1813_v19 }
 0x336   : > { %v7427_v33 = vpop.eup %7426  ;;  %1848 = vperm.xlu1 %7390, %v7425_v57   ;;  %7446 = vpow2.f32 %v1815_v58  ;;  %v1821_v57 = vmul.f32 1.442695, %v1794_v14  ;;  %v9184_v58 = vld [vmem:[#allocation21_spill] sm:$0xff] }
 0x337   : > { %1851 = vperm.xlu0 %7391, %v7427_v33   ;;  %v7429_v11 = vpop.eup %7428  ;;  %7448 = vpow2.f32 %v1817_v22  ;;  %v1829_v33 = vmul.f32 1.442695, %v1798_v3  ;;  %v7025_v22 = vpack.c.bf16 %v9145_v54, %v7804_v38 }
 0x338   : > { %v7431_v10 = vpop.eup %7430  ;;  %7450 = vpow2.f32 %v1821_v57 }
 0x339   : > { %v7433_v27 = vpop.eup %7432  ;;  %7452 = vpow2.f32 %v1825_v46 }
 0x33a   : > { %1854 = vperm.xlu1 %7390, %v7429_v11   ;;  %v7435_v49 = vpop.eup %7434  ;;  %7454 = vpow2.f32 %v1829_v33 }
 0x33b   : > { %1878 = vperm.xlu0 %7391, %v7433_v27   ;;  %v7437_v36 = vpop.eup %7436 }
 0x33c   : > { %v7439_v12 = vpop.eup %7438 }
 0x33d   : > { %v7441_v5 = vpop.eup %7440 }
 0x33e   : > { %1857 = vperm.xlu1 %7390, %v7431_v10   ;;  %v7443_v61 = vpop.eup %7442 }
 0x33f   : > { %1884 = vperm.xlu0 %7391, %v7437_v36   ;;  %v7445_v37 = vpop.eup %7444 }
 0x340   : > { %v7447_v17 = vpop.eup %7446 }
 0x341   : > { %v7449_v2 = vpop.eup %7448 }
 0x342   : > { %1860 = vperm.xlu1 %7390, %v7435_v49   ;;  %v7451_v48 = vpop.eup %7450 }
 0x343   : > { %1890 = vperm.xlu0 %7391, %v7441_v5   ;;  %v7453_v60 = vpop.eup %7452 }
 0x344   : > { %v7455_v32 = vpop.eup %7454 }
 0x346   : > { %1863 = vperm.xlu1 %7390, %v7439_v12   ;;  %v9185_v12 = vld [vmem:[#allocation20_spill] sm:$0xff] }
 0x347   : > { %v9186_v5 = vpack.c.bf16 %v9184_v58, %v9185_v12 }
 0x34a   : > { %1866 = vperm.xlu1 %7390, %v7443_v61  }
 0x34e   : > { %1869 = vperm.xlu1 %7390, %v7445_v37  }
 0x352   : > { %1872 = vperm.xlu1 %7390, %v7447_v17  }
 0x356   : > { %1875 = vperm.xlu1 %7390, %v7449_v2  }
 0x35a   : > { %1881 = vperm.xlu1 %7390, %v7451_v48   ;;  %v7031_v48 = vpack.c.bf16 %v9168_v34, %v9166_v23 }
 0x35e   : > { %1887 = vperm.xlu1 %7390, %v7453_v60  }
 0x362   : > { %1893 = vperm.xlu1 %7390, %v7455_v32  }
 0x3b5   : > { %v1849_v7 = vpop.permute.xlu1 %1848 }
 0x3b6   : > { %v1852_v11 = vpop.permute.xlu0 %1851  ;;  %v1898_v28 = vrot.slane %v1849_v7, %v8479_v51 }
 0x3b7   : > { %v1902_v26 = vrot.slane %v1852_v11, %v8484_v56 }
 0x3b9   : > { %v1903_v21 = vsel %vm1658_vm1, %v1902_v26, %v1898_v28  ;;  %v1855_v50 = vpop.permute.xlu1 %1854 }
 0x3ba   : > { %v1978_v15 = vsel %vm1738_vm9, %v1903_v21, 0  ;;  %v1879_v57 = vpop.permute.xlu0 %1878  ;;  %v1907_v38 = vrot.slane %v1855_v50, %v8479_v51 }
 0x3bb   : > { %v8593_v31 = vand.u32 4294901760, %v1978_v15 }
 0x3bd   : > { %v2048_v10 = vsub.f32 %v1978_v15, %v8593_v31  ;;  %v1858_v27 = vpop.permute.xlu1 %1857 }
 0x3be   : > { %v1911_v37 = vrot.slane %v1858_v27, %v8484_v56  ;;  %v1885_v54 = vpop.permute.xlu0 %1884 }
 0x3bf   : > { %v2049_v47 = vand.u32 4294901760, %v2048_v10  ;;  %v1952_v27 = vrot.slane %v1885_v54, %v8479_v51  ;;  %v7037_v54 = vpack.c.bf16 %v7814_v43, %v7808_v40  ;;  %v7043_v40 = vpack.c.bf16 %v9148_v8, %v9146_v9 }
 0x3c0   : > { %v1912_v46 = vsel %vm1658_vm1, %v1911_v37, %v1907_v38  ;;  %v7049_v43 = vpack.c.bf16 %v9170_v20, %v9169_v16  ;;  %v7055_v16 = vpack.c.bf16 %v7901_v62, %v7890_v24  ;;  %v7061_v24 = vpack.c.bf16 %v9151_v63, %v9149_v25 }
 0x3c1   : > { %v1861_v19 = vpop.permute.xlu1 %1860  ;;  %v2050_v49 = vsub.f32 %v2048_v10, %v2049_v47  ;;  %v2439_v7 = vsel %vm1738_vm9, %v1912_v46, 0  ;;  %v7067_v62 = vpack.c.bf16 %v9173_v39, %v9171_v59  ;;  %v7073_v39 = vpack.c.bf16 %v7934_v0, %v7925_v6 }
 0x3c2   : > { %v1916_v60 = vrot.slane %v1861_v19, %v8479_v51  ;;  %v1967_v19 = vsel %vm1723_vm2, %v1912_v46, %v1903_v21  ;;  %v7079_v6 = vpack.c.bf16 %v9154_v1, %v9152_v45  ;;  %v7085_v0 = vpack.c.bf16 %v9175_v44, %v9174_v42 }
 0x3c3   : > { %v2051_v36 = vand.u32 4294901760, %v2050_v49  ;;  %v2508_v49 = vand.u32 4294901760, %v2439_v7  ;;  %v7091_v44 = vpack.c.bf16 %v8001_v4, %v7999_v55  ;;  %v7097_v55 = vpack.c.bf16 %v9157_v18, %v9155_v30  ;;  %v9198_v4 = vld [vmem:[#allocation42_spill] sm:$0xff] }
 0x3c5   : > { %6495 = vmatmul.mubr.f32.vlgmr.msra.gmra.mrb[0].mxu1 %v2051_v36  ;;  %v1864_v53 = vpop.permute.xlu1 %1863  ;;  %v1891_v36 = vpop.permute.xlu0 %1890 }
 0x3c6   : > { %7023 = vmatpush3.bf16.msra.mxu1 %v9186_v5  ;;  %6501 = vmatprep.mubr.msk.f32.mxu1 %vm7561_vm10, %v7562_v29  ;;  %v1920_v17 = vrot.slane %v1864_v53, %v8484_v56  ;;  %v1961_v21 = vrot.slane %v1891_v36, %v8479_v51 }
 0x3c7   : > { %7024 = vmatprep.subr.bf16.mxu1 %v7560_v52 }
 0x3c8   : > { %v1921_v26 = vsel %vm1658_vm1, %v1920_v17, %v1916_v60  ;;  %v9187_v17 = vld [vmem:[#allocation23_spill] sm:$0xff] }
 0x3c9   : > { %v1867_v14 = vpop.permute.xlu1 %1866  ;;  %v1968_v53 = vsel %vm1725_vm3, %v1921_v26, %v1967_v19 }
 0x3ca   : > { %v1925_v11 = vrot.slane %v1867_v14, %v8479_v51 }
 0x3cd   : > { %6502 = vmatmul.mubr.f32.vlgmr.msra.gmra.mrb[0].mxu1 %v8593_v31  ;;  %v1870_v61 = vpop.permute.xlu1 %1869 }
 0x3ce   : > { %7026 = vmatpush3.bf16.msra.mxu1 %v7025_v22  ;;  %6508 = vmatprep.mubr.msk.f32.mxu1 %vm7561_vm10, %v7562_v29  ;;  %v1929_v2 = vrot.slane %v1870_v61, %v8484_v56 }
 0x3cf   : > { %7027 = vmatprep.subr.bf16.mxu1 %v7560_v52 }
 0x3d0   : > { %v8628_v23 = vsel %vm1658_vm1, %v1929_v2, %v1925_v11 }
 0x3d1   : > { %v1873_v35 = vpop.permute.xlu1 %1872  ;;  %v1969_v12 = vsel %vm1727_vm4, %v8628_v23, %v1968_v53  ;;  %v3361_v25 = vsel %vm1738_vm9, %v8628_v23, 0 }
 0x3d2   : > { %v1934_v50 = vrot.slane %v1873_v35, %v8479_v51  ;;  %v2509_v35 = vsub.f32 %v2439_v7, %v2508_v49  ;;  %v9191_v7 = vld [vmem:[#allocation34_spill] sm:$0xff]  ;;  %v3430_v63 = vand.u32 4294901760, %v3361_v25 }
 0x3d5   : > { %6509 = vmatmul.mubr.f32.vlgmr.msra.gmra.mrb[0].mxu1 %v2048_v10  ;;  %v1876_v3 = vpop.permute.xlu1 %1875  ;;  %v1943_v10 = vrot.slane %v1879_v57, %v8479_v51 }
 0x3d6   : > { %7029 = vmatpush3.bf16.msra.mxu1 %v8576_v41  ;;  %6515 = vmatprep.mubr.msk.f32.mxu1 %vm7561_vm10, %v7562_v29  ;;  %v1938_v32 = vrot.slane %v1876_v3, %v8484_v56 }
 0x3d7   : > { %7030 = vmatprep.subr.bf16.mxu1 %v7560_v52 }
 0x3d9   : > { %v1882_v33 = vpop.permute.xlu1 %1881 }
 0x3da   : > { %v1947_v28 = vrot.slane %v1882_v33, %v8484_v56  ;;  %v9188_v33 = vld [vmem:[#allocation22_spill] sm:$0xff] }
 0x3db   : > { %v9189_v2 = vpack.c.bf16 %v9187_v17, %v9188_v33 }
 0x3dc   : > { %v8641_v58 = vsel %vm1658_vm1, %v1947_v28, %v1943_v10  ;;  %v3431_v28 = vsub.f32 %v3361_v25, %v3430_v63  ;;  %v9194_v10 = vld [vmem:[#allocation36_spill] sm:$0xff] }
 0x3dd   : > { %6516 = vmatmul.mubr.f32.vlgmr.msra.gmra.mrb[0].mxu1 %v2049_v47  ;;  %v1888_v15 = vpop.permute.xlu1 %1887  ;;  %v8636_v47 = vsel %vm1658_vm1, %v1938_v32, %v1934_v50  ;;  %v9190_v32 = vld [vmem:[#allocation35_spill] sm:$0xff]  ;;  %v4283_v30 = vsel %vm1738_vm9, %v8641_v58, 0  ;;  %v9216_v25 = vld [vmem:[#allocation56_spill] sm:$0xff] }
 0x3de   : > { %7032 = vmatpush3.bf16.msra.mxu1 %v7031_v48  ;;  %v1956_v34 = vrot.slane %v1888_v15, %v8484_v56  ;;  %6522 = vmatprep.mubr.msk.f32.mxu1 %vm7561_vm10, %v7562_v29  ;;  %v1970_v22 = vsel %vm1729_vm5, %v8636_v47, %v1969_v12  ;;  %v9192_v11 = vpack.c.bf16 %v9190_v32, %v9191_v7  ;;  %v3432_v59 = vand.u32 4294901760, %v3431_v28  ;;  %v9193_v15 = vld [vmem:[#allocation37_spill] sm:$0xff] }
 0x3df   : > { %7033 = vmatprep.subr.bf16.mxu1 %v7560_v52  ;;  %v1971_v57 = vsel %vm1731_vm6, %v8641_v58, %v1970_v22  ;;  %v9195_v23 = vpack.c.bf16 %v9193_v15, %v9194_v10  ;;  %v3822_v45 = vsel %vm1738_vm9, %v8636_v47, 0  ;;  %v4352_v18 = vand.u32 4294901760, %v4283_v30  ;;  %v9214_v7 = vld [vmem:[#allocation53_spill] sm:$0xff] }
 0x3e0   : > { %v8646_v5 = vsel %vm1658_vm1, %v1956_v34, %v1952_v27  ;;  %v3891_v1 = vand.u32 4294901760, %v3822_v45 }
 0x3e1   : > { %v1894_v14 = vpop.permute.xlu1 %1893  ;;  %v1972_v3 = vsel %vm1733_vm7, %v8646_v5, %v1971_v57  ;;  %v4353_v53 = vsub.f32 %v4283_v30, %v4352_v18  ;;  %v9203_v57 = vld [vmem:[#allocation50_spill] sm:$0xff]  ;;  %v4744_v17 = vsel %vm1738_vm9, %v8646_v5, 0  ;;  %v9209_v5 = vld [vmem:[#allocation49_spill] sm:$0xff] }
 0x3e2   : > { %v1965_v61 = vrot.slane %v1894_v14, %v8484_v56  ;;  %v2510_v56 = vand.u32 4294901760, %v2509_v35  ;;  %v3892_v34 = vsub.f32 %v3822_v45, %v3891_v1  ;;  %v9200_v14 = vld [vmem:[#allocation40_spill] sm:$0xff]  ;;  %v4813_v33 = vand.u32 4294901760, %v4744_v17  ;;  %v9225_v30 = vld [vmem:[#allocation61_spill] sm:$0xff] }
 0x3e3   : > { %v4354_v12 = vand.u32 4294901760, %v4353_v53 }
 0x3e4   : > { %v8655_v37 = vsel %vm1658_vm1, %v1965_v61, %v1961_v21  ;;  %v2511_v46 = vsub.f32 %v2509_v35, %v2510_v56  ;;  %v3893_v42 = vand.u32 4294901760, %v3892_v34  ;;  %v9201_v21 = vld [vmem:[#allocation41_spill] sm:$0xff] }
 0x3e5   : > { %6523 = vmatmul.mubr.f32.vlgmr.msra.gmra.mrb[0].mxu1 %v8593_v31  ;;  %v1973_v51 = vsel %vm1735_vm8, %v8655_v37, %v1972_v3  ;;  %v7109_v58 = vpack.c.bf16 %v9201_v21, %v9200_v14  ;;  %v4355_v22 = vsub.f32 %v4353_v53, %v4354_v12 }
 0x3e6   : > { %7035 = vmatpush3.bf16.msra.mxu1 %v8576_v41  ;;  %v1975_v38 = vsel %vm1738_vm9, %v1973_v51, 0.0  ;;  %6529 = vmatprep.mubr.msk.f32.mxu1 %vm7561_vm10, %v7562_v29  ;;  %v2512_v41 = vand.u32 4294901760, %v2511_v46  ;;  %v3894_v27 = vsub.f32 %v3892_v34, %v3893_v42  ;;  %v9205_v51 = vld [vmem:[#allocation44_spill] sm:$0xff]  ;;  %v9208_v46 = vld [vmem:[#allocation47_spill] sm:$0xff] }
 0x3e7   : > { %1976 = vadd.xlane.f32.xlu0 %v1975_v38  ;;  %7036 = vmatprep.subr.bf16.mxu1 %v7560_v52  ;;  %v4356_v61 = vand.u32 4294901760, %v4355_v22  ;;  %v9206_v38 = vld [vmem:[#allocation45_spill] sm:$0xff] }
 0x3e8   : > { %v3895_v19 = vand.u32 4294901760, %v3894_v27 }
 0x3ed   : > { %6530 = vmatmul.mubr.f32.vlgmr.msra.gmra.mrb[0].mxu1 %v8593_v31  ;;  %v2900_v31 = vsel %vm1738_vm9, %v1921_v26, 0  ;;  %v3433_v26 = vsub.f32 %v3431_v28, %v3432_v59 }
 0x3ee   : > { %7038 = vmatpush3.bf16.msra.mxu1 %v7037_v54  ;;  %6536 = vmatprep.mubr.msk.f32.mxu1 %vm7561_vm10, %v7562_v29  ;;  %v2969_v9 = vand.u32 4294901760, %v2900_v31 }
 0x3ef   : > { %7039 = vmatprep.subr.bf16.mxu1 %v7560_v52  ;;  %v3434_v50 = vand.u32 4294901760, %v3433_v26 }
 0x3f0   : > { %v2970_v8 = vsub.f32 %v2900_v31, %v2969_v9 }
 0x3f1   : > { %6537 = vmatmul.mubr.f32.vlgmr.msra.gmra.mrb[2].mxu1 %v2512_v41 }
 0x3f2   : > { %7041 = vmatpush3.bf16.msra.mxu1 %v9189_v2  ;;  %6543 = vmatprep.mubr.msk.f32.mxu1 %vm7561_vm10, %v7562_v29  ;;  %v2971_v48 = vand.u32 4294901760, %v2970_v8  ;;  %v4814_v2 = vsub.f32 %v4744_v17, %v4813_v33 }
 0x3f3   : > { %7042 = vmatprep.subr.bf16.mxu1 %v7560_v52 }
 0x3f4   : > { %v2972_v20 = vsub.f32 %v2970_v8, %v2971_v48  ;;  %v4815_v31 = vand.u32 4294901760, %v4814_v2 }
 0x3f6   : > { %v2973_v60 = vand.u32 4294901760, %v2972_v20  ;;  %v9211_v20 = vld [vmem:[#allocation64_spill] sm:$0xff] }
 0x3f9   : > { %6544 = vmatmul.mubr.f32.vlgmr.msra.gmra.mrb[2].mxu1 %v2508_v49 }
 0x3fa   : > { %7044 = vmatpush3.bf16.msra.mxu1 %v7043_v40  ;;  %6550 = vmatprep.mubr.msk.f32.mxu1 %vm7561_vm10, %v7562_v29 }
 0x3fb   : > { %7045 = vmatprep.subr.bf16.mxu1 %v7560_v52 }
 0x401   : > { %6551 = vmatmul.mubr.f32.vlgmr.msra.gmra.mrb[2].mxu1 %v2509_v35  ;;  %v9202_v35 = vld [vmem:[#allocation51_spill] sm:$0xff] }
 0x402   : > { %7047 = vmatpush3.bf16.msra.mxu1 %v7037_v54  ;;  %6557 = vmatprep.mubr.msk.f32.mxu1 %vm7561_vm10, %v7562_v29  ;;  %v9204_v3 = vpack.c.bf16 %v9202_v35, %v9203_v57 }
 0x403   : > { %7048 = vmatprep.subr.bf16.mxu1 %v7560_v52 }
 0x409   : > { %6558 = vmatmul.mubr.f32.vlgmr.msra.gmra.mrb[2].mxu1 %v2510_v56  ;;  %v7115_v56 = vpack.c.bf16 %v9206_v38, %v9205_v51 }
 0x40a   : > { %7050 = vmatpush3.bf16.msra.mxu1 %v7049_v43  ;;  %6564 = vmatprep.mubr.msk.f32.mxu1 %vm7561_vm10, %v7562_v29 }
 0x40b   : > { %7051 = vmatprep.subr.bf16.mxu1 %v7560_v52 }
 0x411   : > { %6565 = vmatmul.mubr.f32.vlgmr.msra.gmra.mrb[2].mxu1 %v2508_v49 }
 0x412   : > { %7053 = vmatpush3.bf16.msra.mxu1 %v7037_v54  ;;  %6571 = vmatprep.mubr.msk.f32.mxu1 %vm7561_vm10, %v7562_v29  ;;  %v9207_v54 = vld [vmem:[#allocation46_spill] sm:$0xff] }
 0x413   : > { %7054 = vmatprep.subr.bf16.mxu1 %v7560_v52  ;;  %v7121_v41 = vpack.c.bf16 %v9208_v46, %v9207_v54 }
 0x419   : > { %6572 = vmatmul.mubr.f32.vlgmr.msra.gmra.mrb[2].mxu1 %v2508_v49  ;;  %v9196_v49 = vld [vmem:[#allocation48_spill] sm:$0xff] }
 0x41a   : > { %7056 = vmatpush3.bf16.msra.mxu1 %v7055_v16  ;;  %6578 = vmatprep.mubr.msk.f32.mxu1 %vm7561_vm10, %v7562_v29  ;;  %v9197_v36 = vpack.c.bf16 %v8083_v13, %v9196_v49  ;;  %v9199_v13 = vld [vmem:[#allocation43_spill] sm:$0xff]  ;;  %v9220_v49 = vld [vmem:[#allocation66_spill] sm:$0xff] }
 0x41b   : > { %7057 = vmatprep.subr.bf16.mxu1 %v7560_v52  ;;  %v7103_v47 = vpack.c.bf16 %v9199_v13, %v9198_v4  ;;  %v9223_v4 = vld [vmem:[#allocation59_spill] sm:$0xff]  ;;  %v9224_v13 = vld [vmem:[#allocation60_spill] sm:$0xff] }
 0x41d   : > { %6579 = vmatmul.mubr.f32.vlgmr.msra.gmra.mrb[4].mxu1 %v2973_v60  ;;  %v9212_v60 = vld [vmem:[#allocation63_spill] sm:$0xff] }
 0x41e   : > { %7059 = vmatpush3.bf16.msra.mxu1 %v9192_v11  ;;  %6585 = vmatprep.mubr.msk.f32.mxu1 %vm7561_vm10, %v7562_v29  ;;  %v9213_v32 = vpack.c.bf16 %v9211_v20, %v9212_v60  ;;  %v9215_v11 = vld [vmem:[#allocation54_spill] sm:$0xff] }
 0x41f   : > { %7060 = vmatprep.subr.bf16.mxu1 %v7560_v52 }
 0x425   : > { %6586 = vmatmul.mubr.f32.vlgmr.msra.gmra.mrb[4].mxu1 %v2969_v9 }
 0x426   : > { %7062 = vmatpush3.bf16.msra.mxu1 %v7061_v24  ;;  %6592 = vmatprep.mubr.msk.f32.mxu1 %vm7561_vm10, %v7562_v29  ;;  %v7133_v24 = vpack.c.bf16 %v9215_v11, %v9214_v7 }
 0x427   : > { %7063 = vmatprep.subr.bf16.mxu1 %v7560_v52 }
 0x42d   : > { %6593 = vmatmul.mubr.f32.vlgmr.msra.gmra.mrb[4].mxu1 %v2970_v8 }
 0x42e   : > { %7065 = vmatpush3.bf16.msra.mxu1 %v7055_v16  ;;  %6599 = vmatprep.mubr.msk.f32.mxu1 %vm7561_vm10, %v7562_v29 }
 0x42f   : > { %7066 = vmatprep.subr.bf16.mxu1 %v7560_v52 }
 0x435   : > { %6600 = vmatmul.mubr.f32.vlgmr.msra.gmra.mrb[4].mxu1 %v2971_v48  ;;  %v4816_v48 = vsub.f32 %v4814_v2, %v4815_v31 }
 0x436   : > { %7068 = vmatpush3.bf16.msra.mxu1 %v7067_v62  ;;  %6606 = vmatprep.mubr.msk.f32.mxu1 %vm7561_vm10, %v7562_v29 }
 0x437   : > { %7069 = vmatprep.subr.bf16.mxu1 %v7560_v52 }
 0x43d   : > { %6607 = vmatmul.mubr.f32.vlgmr.msra.gmra.mrb[4].mxu1 %v2969_v9 }
 0x43e   : > { %7071 = vmatpush3.bf16.msra.mxu1 %v7055_v16  ;;  %6613 = vmatprep.mubr.msk.f32.mxu1 %vm7561_vm10, %v7562_v29  ;;  %v4817_v16 = vand.u32 4294901760, %v4816_v48 }
 0x43f   : > { %7072 = vmatprep.subr.bf16.mxu1 %v7560_v52 }
 0x445   : > { %6614 = vmatmul.mubr.f32.vlgmr.msra.gmra.mrb[4].mxu1 %v2969_v9  ;;  %v9210_v9 = vld [vmem:[#allocation52_spill] sm:$0xff] }
 0x446   : > { %7074 = vmatpush3.bf16.msra.mxu1 %v7073_v39  ;;  %6620 = vmatprep.mubr.msk.f32.mxu1 %vm7561_vm10, %v7562_v29  ;;  %v7127_v8 = vpack.c.bf16 %v9210_v9, %v9209_v5 }
 0x447   : > { %7075 = vmatprep.subr.bf16.mxu1 %v7560_v52 }
 0x449   : > { %6621 = vmatmul.mubr.f32.vlgmr.msra.gmra.mrb[6].mxu1 %v3434_v50 }
 0x44a   : > { %7077 = vmatpush3.bf16.msra.mxu1 %v9195_v23  ;;  %6627 = vmatprep.mubr.msk.f32.mxu1 %vm7561_vm10, %v7562_v29 }
 0x44b   : > { %7078 = vmatprep.subr.bf16.mxu1 %v7560_v52 }
 0x451   : > { %6628 = vmatmul.mubr.f32.vlgmr.msra.gmra.mrb[6].mxu1 %v3430_v63 }
 0x452   : > { %7080 = vmatpush3.bf16.msra.mxu1 %v7079_v6  ;;  %6634 = vmatprep.mubr.msk.f32.mxu1 %vm7561_vm10, %v7562_v29 }
 0x453   : > { %7081 = vmatprep.subr.bf16.mxu1 %v7560_v52 }
 0x459   : > { %6635 = vmatmul.mubr.f32.vlgmr.msra.gmra.mrb[6].mxu1 %v3431_v28 }
 0x45a   : > { %7083 = vmatpush3.bf16.msra.mxu1 %v7073_v39  ;;  %6641 = vmatprep.mubr.msk.f32.mxu1 %vm7561_vm10, %v7562_v29 }
 0x45b   : > { %7084 = vmatprep.subr.bf16.mxu1 %v7560_v52 }
 0x461   : > { %6642 = vmatmul.mubr.f32.vlgmr.msra.gmra.mrb[6].mxu1 %v3432_v59  ;;  %v5205_v59 = vsel %vm1738_vm9, %v8655_v37, 0 }
 0x462   : > { %7086 = vmatpush3.bf16.msra.mxu1 %v7085_v0  ;;  %6648 = vmatprep.mubr.msk.f32.mxu1 %vm7561_vm10, %v7562_v29 }
 0x463   : > { %7087 = vmatprep.subr.bf16.mxu1 %v7560_v52 }
 0x469   : > { %6649 = vmatmul.mubr.f32.vlgmr.msra.gmra.mrb[6].mxu1 %v3430_v63 }
 0x46a   : > { %7089 = vmatpush3.bf16.msra.mxu1 %v7073_v39  ;;  %6655 = vmatprep.mubr.msk.f32.mxu1 %vm7561_vm10, %v7562_v29  ;;  %v5274_v39 = vand.u32 4294901760, %v5205_v59 }
 0x46b   : > { %7090 = vmatprep.subr.bf16.mxu1 %v7560_v52 }
 0x46c   : > { %v5275_v50 = vsub.f32 %v5205_v59, %v5274_v39 }
 0x46e   : > { %v5276_v45 = vand.u32 4294901760, %v5275_v50 }
 0x470   : > { %v5277_v27 = vsub.f32 %v5275_v50, %v5276_v45 }
 0x471   : > { %6656 = vmatmul.mubr.f32.vlgmr.msra.gmra.mrb[6].mxu1 %v3430_v63  ;;  %v9217_v63 = vld [vmem:[#allocation58_spill] sm:$0xff] }
 0x472   : > { %7092 = vmatpush3.bf16.msra.mxu1 %v7091_v44  ;;  %6662 = vmatprep.mubr.msk.f32.mxu1 %vm7561_vm10, %v7562_v29  ;;  %v7139_v28 = vpack.c.bf16 %v9217_v63, %v9216_v25 }
 0x473   : > { %7093 = vmatprep.subr.bf16.mxu1 %v7560_v52 }
 0x474   : > { %v1977_v62 = vpop.xlane.xlu0 %1976 }
 0x475   : > { %6663 = vmatmul.mubr.f32.vlgmr.msra.gmra.mrb[8].mxu1 %v3895_v19  ;;  %7456 = vrcp.f32 %v1977_v62  ;;  %v5278_v19 = vand.u32 4294901760, %v5277_v27 }
 0x476   : > { %7095 = vmatpush3.bf16.msra.mxu1 %v9197_v36  ;;  %6669 = vmatprep.mubr.msk.f32.mxu1 %vm7561_vm10, %v7562_v29  ;;  %v9221_v36 = vld [vmem:[#allocation65_spill] sm:$0xff] }
 0x477   : > { %7096 = vmatprep.subr.bf16.mxu1 %v7560_v52 }
 0x47d   : > { %6670 = vmatmul.mubr.f32.vlgmr.msra.gmra.mrb[8].mxu1 %v3891_v1 }
 0x47e   : > { %7098 = vmatpush3.bf16.msra.mxu1 %v7097_v55  ;;  %6676 = vmatprep.mubr.msk.f32.mxu1 %vm7561_vm10, %v7562_v29  ;;  %v9222_v55 = vpack.c.bf16 %v9220_v49, %v9221_v36 }
 0x47f   : > { %7099 = vmatprep.subr.bf16.mxu1 %v7560_v52  ;;  %v8838_v26 = vpop.eup %7456 }
 0x480   : > { %v5669_v15 = vrot.slane %v8838_v26, 1  ;;  %v5671_v35 = vrot.slane %v8838_v26, 3  ;;  %v5674_v9 = vrot.slane %v8838_v26, 6 }
 0x485   : > { %6677 = vmatmul.mubr.f32.vlgmr.msra.gmra.mrb[8].mxu1 %v3892_v34  ;;  %v9218_v34 = vld [vmem:[#allocation55_spill] sm:$0xff] }
 0x486   : > { %7101 = vmatpush3.bf16.msra.mxu1 %v7091_v44  ;;  %6683 = vmatprep.mubr.msk.f32.mxu1 %vm7561_vm10, %v7562_v29 }
 0x487   : > { %7102 = vmatprep.subr.bf16.mxu1 %v7560_v52 }
 0x48d   : > { %6684 = vmatmul.mubr.f32.vlgmr.msra.gmra.mrb[8].mxu1 %v3893_v42  ;;  %v9219_v42 = vld [vmem:[#allocation57_spill] sm:$0xff] }
 0x48e   : > { %7104 = vmatpush3.bf16.msra.mxu1 %v7103_v47  ;;  %6690 = vmatprep.mubr.msk.f32.mxu1 %vm7561_vm10, %v7562_v29  ;;  %v7151_v47 = vpack.c.bf16 %v9224_v13, %v9223_v4 }
 0x48f   : > { %7105 = vmatprep.subr.bf16.mxu1 %v7560_v52 }
 0x495   : > { %6691 = vmatmul.mubr.f32.vlgmr.msra.gmra.mrb[8].mxu1 %v3891_v1 }
 0x496   : > { %7107 = vmatpush3.bf16.msra.mxu1 %v7091_v44  ;;  %6697 = vmatprep.mubr.msk.f32.mxu1 %vm7561_vm10, %v7562_v29  ;;  %v7145_v44 = vpack.c.bf16 %v9219_v42, %v9218_v34 }
 0x497   : > { %7108 = vmatprep.subr.bf16.mxu1 %v7560_v52 }
 0x49d   : > { %6698 = vmatmul.mubr.f32.vlgmr.msra.gmra.mrb[8].mxu1 %v3891_v1 }
 0x49e   : > { %7110 = vmatpush3.bf16.msra.mxu1 %v7109_v58  ;;  %6704 = vmatprep.mubr.msk.f32.mxu1 %vm7561_vm10, %v7562_v29 }
 0x49f   : > { %7111 = vmatprep.subr.bf16.mxu1 %v7560_v52 }
 0x4a1   : > { %6705 = vmatmul.mubr.f32.vlgmr.msra.gmra.mrb[10].mxu1 %v4356_v61 }
 0x4a2   : > { %7113 = vmatpush3.bf16.msra.mxu1 %v9204_v3  ;;  %6711 = vmatprep.mubr.msk.f32.mxu1 %vm7561_vm10, %v7562_v29 }
 0x4a3   : > { %7114 = vmatprep.subr.bf16.mxu1 %v7560_v52 }
 0x4a9   : > { %6712 = vmatmul.mubr.f32.vlgmr.msra.gmra.mrb[10].mxu1 %v4352_v18 }
 0x4aa   : > { %7116 = vmatpush3.bf16.msra.mxu1 %v7115_v56  ;;  %6718 = vmatprep.mubr.msk.f32.mxu1 %vm7561_vm10, %v7562_v29  ;;  %v5672_v56 = vrot.slane %v8838_v26, 4 }
 0x4ab   : > { %7117 = vmatprep.subr.bf16.mxu1 %v7560_v52 }
 0x4b1   : > { %6719 = vmatmul.mubr.f32.vlgmr.msra.gmra.mrb[10].mxu1 %v4353_v53 }
 0x4b2   : > { %7119 = vmatpush3.bf16.msra.mxu1 %v7109_v58  ;;  %6725 = vmatprep.mubr.msk.f32.mxu1 %vm7561_vm10, %v7562_v29 }
 0x4b3   : > { %7120 = vmatprep.subr.bf16.mxu1 %v7560_v52 }
 0x4b9   : > { %6726 = vmatmul.mubr.f32.vlgmr.msra.gmra.mrb[10].mxu1 %v4354_v12  ;;  %v5670_v12 = vrot.slane %v8838_v26, 2 }
 0x4ba   : > { %7122 = vmatpush3.bf16.msra.mxu1 %v7121_v41  ;;  %6732 = vmatprep.mubr.msk.f32.mxu1 %vm7561_vm10, %v7562_v29 }
 0x4bb   : > { %7123 = vmatprep.subr.bf16.mxu1 %v7560_v52 }
 0x4c0   : > { %v2435_v40 = vpop.f32.mrb[0].mxu1 }
 0x4c1   : > { %v6531_v43 = vpop.f32.mrb[1].mxu1  ;;  %6733 = vmatmul.mubr.f32.vlgmr.msra.gmra.mrb[10].mxu1 %v4352_v18  ;;  %v5684_v37 = vmul.f32 %v8838_v26, %v2435_v40 }
 0x4c2   : > { %7125 = vmatpush3.bf16.msra.mxu1 %v7109_v58  ;;  %6739 = vmatprep.mubr.msk.f32.mxu1 %vm7561_vm10, %v7562_v29 }
 0x4c3   : > { %7126 = vmatprep.subr.bf16.mxu1 %v7560_v52 }
 0x4c9   : > { %6740 = vmatmul.mubr.f32.vlgmr.msra.gmra.mrb[10].mxu1 %v4352_v18  ;;  %v9226_v18 = vld [vmem:[#allocation62_spill] sm:$0xff] }
 0x4ca   : > { %7128 = vmatpush3.bf16.msra.mxu1 %v7127_v8  ;;  %6746 = vmatprep.mubr.msk.f32.mxu1 %vm7561_vm10, %v7562_v29  ;;  %v7157_v53 = vpack.c.bf16 %v9226_v18, %v9225_v30 }
 0x4cb   : > { %7129 = vmatprep.subr.bf16.mxu1 %v7560_v52 }
 0x4cd   : > { %6747 = vmatmul.mubr.f32.vlgmr.msra.gmra.mrb[12].mxu1 %v4817_v16 }
 0x4ce   : > { %7131 = vmatpush3.bf16.msra.mxu1 %v9213_v32  ;;  %6753 = vmatprep.mubr.msk.f32.mxu1 %vm7561_vm10, %v7562_v29  ;;  %v5675_v32 = vrot.slane %v8838_v26, 7 }
 0x4cf   : > { %7132 = vmatprep.subr.bf16.mxu1 %v7560_v52 }
 0x4d5   : > { %6754 = vmatmul.mubr.f32.vlgmr.msra.gmra.mrb[12].mxu1 %v4813_v33 }
 0x4d6   : > { %7134 = vmatpush3.bf16.msra.mxu1 %v7133_v24  ;;  %6760 = vmatprep.mubr.msk.f32.mxu1 %vm7561_vm10, %v7562_v29 }
 0x4d7   : > { %7135 = vmatprep.subr.bf16.mxu1 %v7560_v52 }
 0x4dd   : > { %6761 = vmatmul.mubr.f32.vlgmr.msra.gmra.mrb[12].mxu1 %v4814_v2 }
 0x4de   : > { %7137 = vmatpush3.bf16.msra.mxu1 %v7127_v8  ;;  %6767 = vmatprep.mubr.msk.f32.mxu1 %vm7561_vm10, %v7562_v29 }
 0x4df   : > { %7138 = vmatprep.subr.bf16.mxu1 %v7560_v52 }
 0x4e5   : > { %6768 = vmatmul.mubr.f32.vlgmr.msra.gmra.mrb[12].mxu1 %v4815_v31 }
 0x4e6   : > { %7140 = vmatpush3.bf16.msra.mxu1 %v7139_v28  ;;  %6774 = vmatprep.mubr.msk.f32.mxu1 %vm7561_vm10, %v7562_v29 }
 0x4e7   : > { %7141 = vmatprep.subr.bf16.mxu1 %v7560_v52 }
 0x4ec   : > { %v2896_v10 = vpop.f32.mrb[2].mxu1 }
 0x4ed   : > { %v5685_v23 = vmul.f32 %v5669_v15, %v2896_v10  ;;  %v6573_v6 = vpop.f32.mrb[3].mxu1  ;;  %6775 = vmatmul.mubr.f32.vlgmr.msra.gmra.mrb[12].mxu1 %v4813_v33 }
 0x4ee   : > { %7143 = vmatpush3.bf16.msra.mxu1 %v7127_v8  ;;  %6781 = vmatprep.mubr.msk.f32.mxu1 %vm7561_vm10, %v7562_v29 }
 0x4ef   : > { %v5700_v0 = vrot.slane %v5685_v23, 7  ;;  %7144 = vmatprep.subr.bf16.mxu1 %v7560_v52 }
 0x4f1   : > { %v5701_v1 = vsel %vm1723_vm2, %v5700_v0, %v5684_v37 }
 0x4f5   : > { %6782 = vmatmul.mubr.f32.vlgmr.msra.gmra.mrb[12].mxu1 %v4813_v33  ;;  %v5673_v33 = vrot.slane %v8838_v26, 5 }
 0x4f6   : > { %7146 = vmatpush3.bf16.msra.mxu1 %v7145_v44  ;;  %6788 = vmatprep.mubr.msk.f32.mxu1 %vm7561_vm10, %v7562_v29 }
 0x4f7   : > { %7147 = vmatprep.subr.bf16.mxu1 %v7560_v52 }
 0x4f9   : > { %6789 = vmatmul.mubr.f32.vlgmr.msra.gmra.mrb[14].mxu1 %v5278_v19 }
 0x4fa   : > { %7149 = vmatpush3.bf16.msra.mxu1 %v9222_v55  ;;  %6795 = vmatprep.mubr.msk.f32.mxu1 %vm7561_vm10, %v7562_v29 }
 0x4fb   : > { %7150 = vmatprep.subr.bf16.mxu1 %v7560_v52 }
 0x501   : > { %6796 = vmatmul.mubr.f32.vlgmr.msra.gmra.mrb[14].mxu1 %v5274_v39 }
 0x502   : > { %7152 = vmatpush3.bf16.msra.mxu1 %v7151_v47  ;;  %6802 = vmatprep.mubr.msk.f32.mxu1 %vm7561_vm10, %v7562_v29 }
 0x503   : > { %7153 = vmatprep.subr.bf16.mxu1 %v7560_v52 }
 0x509   : > { %6803 = vmatmul.mubr.f32.vlgmr.msra.gmra.mrb[14].mxu1 %v5275_v50 }
 0x50a   : > { %7155 = vmatpush3.bf16.msra.mxu1 %v7145_v44  ;;  %6809 = vmatprep.mubr.msk.f32.mxu1 %vm7561_vm10, %v7562_v29 }
 0x50b   : > { %7156 = vmatprep.subr.bf16.mxu1 %v7560_v52 }
 0x511   : > { %6810 = vmatmul.mubr.f32.vlgmr.msra.gmra.mrb[14].mxu1 %v5276_v45 }
 0x512   : > { %7158 = vmatpush3.bf16.msra.mxu1 %v7157_v53  ;;  %6816 = vmatprep.mubr.msk.f32.mxu1 %vm7561_vm10, %v7562_v29 }
 0x513   : > { %7159 = vmatprep.subr.bf16.mxu1 %v7560_v52 }
 0x518   : > { %v3357_v14 = vpop.f32.mrb[4].mxu1 }
 0x519   : > { %v5686_v21 = vmul.f32 %v5670_v12, %v3357_v14  ;;  %v6615_v58 = vpop.f32.mrb[5].mxu1  ;;  %6817 = vmatmul.mubr.f32.vlgmr.msra.gmra.mrb[14].mxu1 %v5274_v39 }
 0x51a   : > { %7161 = vmatpush3.bf16.msra.mxu1 %v7145_v44  ;;  %6823 = vmatprep.mubr.msk.f32.mxu1 %vm7561_vm10, %v7562_v29 }
 0x51b   : > { %v5702_v22 = vrot.slane %v5686_v21, 6 }
 0x51d   : > { %v5703_v61 = vsel %vm1725_vm3, %v5702_v22, %v5701_v1 }
 0x521   : > { %6824 = vmatmul.mubr.f32.vlgmr.msra.gmra.mrb[14].mxu1 %v5274_v39 }
 0x544   : > { %v3818_v57 = vpop.f32.mrb[6].mxu1 }
 0x545   : > { %v5687_v3 = vmul.f32 %v5671_v35, %v3818_v57  ;;  %v6657_v51 = vpop.f32.mrb[7].mxu1 }
 0x547   : > { %v5704_v52 = vrot.slane %v5687_v3, 5 }
 0x549   : > { %v5705_v38 = vsel %vm1727_vm4, %v5704_v52, %v5703_v61 }
 0x570   : > { %v4279_v54 = vpop.f32.mrb[8].mxu1 }
 0x571   : > { %v5688_v46 = vmul.f32 %v5672_v56, %v4279_v54  ;;  %v6699_v41 = vpop.f32.mrb[9].mxu1 }
 0x573   : > { %v5706_v17 = vrot.slane %v5688_v46, 4 }
 0x575   : > { %v5707_v29 = vsel %vm1729_vm5, %v5706_v17, %v5705_v38 }
 0x59c   : > { %v4740_v2 = vpop.f32.mrb[10].mxu1 }
 0x59d   : > { %v5689_v40 = vmul.f32 %v5673_v33, %v4740_v2  ;;  %v6741_v43 = vpop.f32.mrb[11].mxu1 }
 0x59f   : > { %v5708_v31 = vrot.slane %v5689_v40, 3 }
 0x5a1   : > { %v5709_v5 = vsel %vm1731_vm6, %v5708_v31, %v5707_v29 }
 0x5c8   : > { %v5201_v8 = vpop.f32.mrb[12].mxu1 }
 0x5c9   : > { %v5690_v48 = vmul.f32 %v5674_v9, %v5201_v8  ;;  %v6783_v16 = vpop.f32.mrb[13].mxu1 }
 0x5cb   : > { %v5710_v20 = vrot.slane %v5690_v48, 2 }
 0x5cd   : > { %v5711_v60 = vsel %vm1733_vm7, %v5710_v20, %v5709_v5 }
 0x5f4   : > { %v5662_v7 = vpop.f32.mrb[14].mxu1 }
 0x5f5   : > { %v5691_v11 = vmul.f32 %v5675_v32, %v5662_v7  ;;  %v6825_v24 = vpop.f32.mrb[15].mxu1 }
 0x5f7   : > { %v5712_v62 = vrot.slane %v5691_v11, 1 }
 0x5f9   : > { %v5713_v25 = vsel %vm1735_vm8, %v5712_v62, %v5711_v60 }
 0x5fa   : > { %5715 = vst [vmem:[%s216_s30] sm:$0xff] %v5713_v25 }
 0x5fb   : > { %7501 = shalt.err (!%p7498_p2)
}
 0x5fc   : > { %s7502_s13 = scalar_lea.hbm %s8888_s7, 128  ;;  %s7506_s11 = scalar_lea.hbm %s8937_s4, 256 }
 0x5fd   : > { %p7503_p4 = scmp.ne.s32.totalorder %s8888_s7, %s7502_s13  ;;  %p7507_p9 = scmp.lt.u32.totalorder %s8888_s7, %s8937_s4 }
 0x5fe   : > { %p7508_p1 = scmp.lt.u32.totalorder %s7506_s11, %s7502_s13  ;;  %p7510_p6 = scmp.lt.u32.totalorder %s7502_s13, %s8888_s7 }
 0x5ff   : > { %p7504_p5 = pnand %p7503_p4, %p9227_p11 }
 0x600   : > { %p7509_p3 = por %p7508_p1, %p7507_p9 }
 0x601   : > { %p7505_p7 = pneg %p7504_p5 }
 0x602   : > { %p7511_p12 = por %p7510_p6, %p7509_p3 }
 0x604   : > { %p7512_p13 = pnand %p7511_p12, %p7505_p7 }
 0x606   : > { %7515 = shalt.err (!%p7512_p13)
}
 0x607   : > { %7340 = dma.vmem_to_hbm [thread:$0]  (%p9227_p11), %s8890_s26, 128, %s8888_s7, %s5717_s9  }
 0x608 PF: > { %s5742_s25 = sand.u32 1, %s7542_s15   ;;  %p9228_p8 = scmp.ne.s32.totalorder %s9054_s28, 0 }
 0x609   : > { %p9229_p10 = scmp.ge.s32.totalorder %s7554_s18, 2  ;;  %s5743_s29 = scalar_lea.sflag [#allocation4], %s5742_s25 }
 0x60b   : > { %p7347_p0 = pnand %p9229_p10, %p9228_p8 }
 0x60d   : > { %7537 = dma.done.wait (!%p7347_p0), %s5743_s29, 128  }
 0x60e   : > { %7539 = vsyncadd (!%p7347_p0), %s5743_s29, 4294967168  ;;  %p17_p2 = scmp.ge.s32.totalorder %s7614_s21, 4   ;;  %s9230_s15 = smov %s7546_s16 }
 0x60f   : > { %s9231_s16 = smov %s7550_s17  ;;  %s9232_s17 = smov %s7626_s24 }
 0x610   : > { %s9233_s18 = smov %s7614_s21  ;;  %19 = sbr.rel (!%p17_p2) target bundleno = 5 (0x5), region = 81 }
 0x617   :  { %5748 = vsyncpa [#allocation3], 1 }
 0x618   :  { %5750 = vsyncpa [#allocation3 + $0x1], 1 }
 0x619   :  { %5751 = vsyncpa [#allocation4], 1 }
 0x61a   :  { %5753 = vsyncpa [#allocation4 + $0x1], 1 }

</bundles_post_ra>
